<compile_context>
chip_gen: v6e
topology: v6e:2x2x1
jax: 0.10.0
libtpu: 0.0.40
codegen_flags: <defaults>
</compile_context>

<pallas_src>
import jax
import jax.numpy as jnp
import numpy as np
from jax.experimental import pallas as pl
from jax.experimental.pallas import tpu as pltpu


def _round_up(x, m):
    return (x + m - 1) // m * m


# ----------------------------------------------------------------------------
# Pallas kernels
# ----------------------------------------------------------------------------
def conv_pool_relu_kernel(p_ref, w_ref, b_ref, o_ref):
    """relu(maxpool2x2(conv(x)) + b) for one tile of pooled output pixels.

    p_ref : (4*K, TM)    bf16  im2col patches, 4 pool positions stacked along K
    w_ref : (4*Cout, 4*K) bf16 block-diagonal conv weight (one block / pool pos)
    b_ref : (Cout, 1)    f32
    o_ref : (Cout, TM)   f32
    """
    cout = o_ref.shape[0]
    # One MXU matmul yields the conv result for all 4 maxpool window positions,
    # stacked along sublanes in groups of Cout rows.
    z = jnp.dot(w_ref[...], p_ref[...], preferred_element_type=jnp.float32)
    m = jnp.maximum(jnp.maximum(z[0 * cout:1 * cout], z[1 * cout:2 * cout]),
                    jnp.maximum(z[2 * cout:3 * cout], z[3 * cout:4 * cout]))
    o_ref[...] = jnp.maximum(m + b_ref[...], 0.0)


def conv_pool_relu(patches, w_blk, bias, tm):
    k4, mp = patches.shape
    c4 = w_blk.shape[0]
    cout = c4 // 4
    return pl.pallas_call(
        conv_pool_relu_kernel,
        out_shape=jax.ShapeDtypeStruct((cout, mp), jnp.float32),
        grid=(mp // tm,),
        in_specs=[
            pl.BlockSpec((k4, tm), lambda i: (0, i)),
            pl.BlockSpec((c4, k4), lambda i: (0, 0)),
            pl.BlockSpec((cout, 1), lambda i: (0, 0)),
        ],
        out_specs=pl.BlockSpec((cout, tm), lambda i: (0, i)),
        compiler_params=pltpu.CompilerParams(
            dimension_semantics=("parallel",)),
    )(patches, w_blk, bias)


def mlp_head_kernel(x_ref, w1_ref, b1_ref, w2_ref, b2_ref, o_ref):
    """log_softmax(relu(relu(x@W1+b1) @ W2 + b2), axis=-1)."""
    h = jnp.dot(x_ref[...], w1_ref[...], preferred_element_type=jnp.float32) + b1_ref[...]
    h = jnp.maximum(h, 0.0)
    # TODO(synk): nn.Dropout() treated as identity (eval-mode semantics);
    # training-mode dropout is stochastic and has no deterministic equivalent.
    y = jnp.dot(h, w2_ref[...], preferred_element_type=jnp.float32) + b2_ref[...]
    y = jnp.maximum(y, 0.0)
    m = jnp.max(y, axis=-1, keepdims=True)
    lse = m + jnp.log(jnp.sum(jnp.exp(y - m), axis=-1, keepdims=True))
    o_ref[...] = y - lse


def mlp_head(x, w1t, b1, w2t, b2):
    n, d = x.shape
    h = w1t.shape[1]
    c = w2t.shape[1]
    return pl.pallas_call(
        mlp_head_kernel,
        out_shape=jax.ShapeDtypeStruct((n, c), jnp.float32),
        grid=(1,),
        in_specs=[
            pl.BlockSpec((n, d), lambda i: (0, 0)),
            pl.BlockSpec((d, h), lambda i: (0, 0)),
            pl.BlockSpec((1, h), lambda i: (0, 0)),
            pl.BlockSpec((h, c), lambda i: (0, 0)),
            pl.BlockSpec((1, c), lambda i: (0, 0)),
        ],
        out_specs=pl.BlockSpec((n, c), lambda i: (0, 0)),
    )(x, w1t, b1.reshape(1, h), w2t, b2.reshape(1, c))


# ----------------------------------------------------------------------------
# Plain-JAX glue (static strided slices only — no gathers)
# ----------------------------------------------------------------------------
def im2col_cnhw(xc, s):
    """xc: (Cin, N, H, W) channel-major activation, conv stride s.

    Returns patches of shape (4*Cin*9, M) with
      row = d*(9*Cin) + (ky*3+kx)*Cin + ci   (d = 2*dy+dx, 2x2 pool position)
      col = n*Po*Qo + p*Qo + q               (pooled output pixel, row-major)
    """
    cin, n, hgt, wid = xc.shape
    hc = (hgt - 3) // s + 1
    wc = (wid - 3) // s + 1
    po, qo = hc // 2, wc // 2
    m = n * po * qo
    rows = []
    for dy in range(2):
        for dx in range(2):
            for ky in range(3):
                for kx in range(3):
                    r0 = s * dy + ky
                    c0 = s * dx + kx
                    sl = xc[:, :,
                            r0:r0 + 2 * s * (po - 1) + 1:2 * s,
                            c0:c0 + 2 * s * (qo - 1) + 1:2 * s]
                    rows.append(sl.reshape(cin, m))
    return jnp.concatenate(rows, axis=0), (n, po, qo, m)


def conv_pool_relu_layer(xc, w, b, s):
    """xc: (Cin, N, H, W) -> (Cout, N, Po, Qo) == relu(maxpool2(conv(x) + b))."""
    cout, cin = w.shape[0], w.shape[1]
    k = 9 * cin
    patches, (n, po, qo, m) = im2col_cnhw(xc, s)
    tm = min(512, _round_up(m, 128))
    mp = _round_up(m, tm)
    patches = jnp.pad(patches, ((0, 0), (0, mp - m))).astype(jnp.bfloat16)
    # weight (Cout, Cin, 3, 3) -> (Cout, K) with K ordered (ky, kx, ci) to match
    # the patch rows, then replicate as a 4-way block diagonal (one block per
    # maxpool window position).
    w_r = jnp.transpose(w, (0, 2, 3, 1)).reshape(cout, k)
    w_blk = jnp.kron(jnp.eye(4, dtype=w.dtype), w_r).astype(jnp.bfloat16)
    y = conv_pool_relu(patches, w_blk, b.reshape(cout, 1), tm)       # (Cout, Mp)
    return y[:, :m].reshape(cout, n, po, qo)


def gymn_forward(x, params):
    """Pallas implementation of GymnModel.forward (eval mode). x: NCHW float32."""
    xc = jnp.transpose(x, (1, 0, 2, 3))                # NCHW -> CNHW (leading-axis permute)
    xc = conv_pool_relu_layer(xc, params["wA"], params["bA"], 1)
    xc = conv_pool_relu_layer(xc, params["wB"], params["bB"], 1)
    xc = conv_pool_relu_layer(xc, params["wC"], params["bC"], 2)
    # torch's .view(-1, 288) flattens (C, H, W) of the NCHW tensor; xc is (C, N, 3, 6).
    n = xc.shape[1]
    feat = jnp.transpose(xc, (1, 0, 2, 3)).reshape(n, 288)   # tiny (16,2,3,6) permute
    return mlp_head(feat, params["w1"].T, params["b1"],
                    params["w2"].T, params["b2"])


# ----------------------------------------------------------------------------
# Pure-JAX reference (numerical sanity check)
# ----------------------------------------------------------------------------
def ref_forward(x, params):
    def conv(x, w, b, s):
        y = jax.lax.conv_general_dilated(
            x, w, (s, s), "VALID", dimension_numbers=("NCHW", "OIHW", "NCHW"))
        return y + b[None, :, None, None]

    def pool(y):
        n, c, h, w = y.shape
        po, qo = h // 2, w // 2
        y = y[:, :, : 2 * po, : 2 * qo].reshape(n, c, po, 2, qo, 2)
        return y.max(axis=(3, 5))

    x = jax.nn.relu(pool(conv(x, params["wA"], params["bA"], 1)))
    x = jax.nn.relu(pool(conv(x, params["wB"], params["bB"], 1)))
    x = jax.nn.relu(pool(conv(x, params["wC"], params["bC"], 2)))
    x = x.reshape(-1, 288)
    x = jax.nn.relu(x @ params["w1"].T + params["b1"])
    x = jax.nn.relu(x @ params["w2"].T + params["b2"])
    return jax.nn.log_softmax(x, axis=1)


# ----------------------------------------------------------------------------
if __name__ == "__main__":
    key = jax.random.PRNGKey(0)
    ks = jax.random.split(key, 11)
    params = {
        "wA": 0.10 * jax.random.normal(ks[0], (16, 3, 3, 3), jnp.float32),
        "bA": 0.10 * jax.random.normal(ks[1], (16,), jnp.float32),
        "wB": 0.05 * jax.random.normal(ks[2], (16, 16, 3, 3), jnp.float32),
        "bB": 0.05 * jax.random.normal(ks[3], (16,), jnp.float32),
        "wC": 0.05 * jax.random.normal(ks[4], (16, 16, 3, 3), jnp.float32),
        "bC": 0.05 * jax.random.normal(ks[5], (16,), jnp.float32),
        "w1": 0.05 * jax.random.normal(ks[6], (100, 288), jnp.float32),
        "b1": 0.05 * jax.random.normal(ks[7], (100,), jnp.float32),
        "w2": 0.10 * jax.random.normal(ks[8], (11, 100), jnp.float32),
        "b2": 0.10 * jax.random.normal(ks[9], (11,), jnp.float32),
    }
    # Smallest-ish NCHW input compatible with fc1's in_features=288
    # (= 16*3*6 features after convA/pool, convB/pool, convC(stride 2)/pool).
    x = jax.random.normal(ks[10], (2, 3, 64, 112), jnp.float32)

    fwd = jax.jit(gymn_forward)
    out = jax.block_until_ready(fwd(x, params))
    assert out.shape == (2, 11), out.shape

    ref = jax.block_until_ready(jax.jit(ref_forward)(x, params))
    err = float(np.max(np.abs(np.asarray(out) - np.asarray(ref))))
    if not np.allclose(np.asarray(out), np.asarray(ref), atol=3e-2, rtol=3e-2):
        raise AssertionError(f"mismatch vs reference, max abs err = {err}")
    print("KERNEL_OK")
</pallas_src>

<mosaic_0001>
module attributes {stable_mosaic.version = 11 : i64} {
  func.func @conv_pool_relu_kernel(%arg0: i32, %arg1: memref<108x512xbf16, #tpu.memory_space<vmem>>, %arg2: memref<64x108xbf16, #tpu.memory_space<vmem>>, %arg3: memref<16x1xf32, #tpu.memory_space<vmem>>, %arg4: memref<16x512xf32, #tpu.memory_space<vmem>>) attributes {dimension_semantics = [#tpu.dimension_semantics<parallel>], iteration_bounds = array<i64: 7>, scalar_prefetch = 0 : i64, scratch_operands = 0 : i64, tpu.core_type = #tpu.core_type<tc>, window_params = [{transform_indices = @transform_0, window_bounds = array<i64: 108, 512>}, {pipeline_mode = #tpu.pipeline_mode<synchronous>, transform_indices = @transform_1, window_bounds = array<i64: 64, 108>}, {pipeline_mode = #tpu.pipeline_mode<synchronous>, transform_indices = @transform_2, window_bounds = array<i64: 16, 1>}, {transform_indices = @transform_3, window_bounds = array<i64: 16, 512>}]} {
    %c0 = arith.constant 0 : index
    %c0_0 = arith.constant 0 : index
    %0 = vector.load %arg2[%c0, %c0_0] : memref<64x108xbf16, #tpu.memory_space<vmem>>, vector<64x108xbf16>
    %c0_1 = arith.constant 0 : index
    %c0_2 = arith.constant 0 : index
    %1 = vector.load %arg1[%c0_1, %c0_2] : memref<108x512xbf16, #tpu.memory_space<vmem>>, vector<108x512xbf16>
    %cst = arith.constant dense<0.000000e+00> : vector<64x512xf32>
    %2 = tpu.matmul %0, %1, %cst {dimension_numbers = #tpu.dot_dimension_numbers<[1], [0], [0], [1], [0, 0, 1, 1], [], []>} : vector<64x108xbf16>, vector<108x512xbf16>, vector<64x512xf32> -> vector<64x512xf32>
    %3 = vector.extract_strided_slice %2 {offsets = [0, 0], sizes = [16, 512], strides = [1, 1]} : vector<64x512xf32> to vector<16x512xf32>
    %4 = vector.extract_strided_slice %2 {offsets = [16, 0], sizes = [16, 512], strides = [1, 1]} : vector<64x512xf32> to vector<16x512xf32>
    %5 = arith.maximumf %3, %4 : vector<16x512xf32>
    %6 = vector.extract_strided_slice %2 {offsets = [32, 0], sizes = [16, 512], strides = [1, 1]} : vector<64x512xf32> to vector<16x512xf32>
    %7 = vector.extract_strided_slice %2 {offsets = [48, 0], sizes = [16, 512], strides = [1, 1]} : vector<64x512xf32> to vector<16x512xf32>
    %8 = arith.maximumf %6, %7 : vector<16x512xf32>
    %9 = arith.maximumf %5, %8 : vector<16x512xf32>
    %c0_3 = arith.constant 0 : index
    %c0_4 = arith.constant 0 : index
    %10 = vector.load %arg3[%c0_3, %c0_4] : memref<16x1xf32, #tpu.memory_space<vmem>>, vector<16x1xf32>
    %11 = vector.broadcast %10 : vector<16x1xf32> to vector<16x512xf32>
    %12 = arith.addf %9, %11 : vector<16x512xf32>
    %cst_5 = arith.constant 0.000000e+00 : f32
    %13 = vector.broadcast %cst_5 : f32 to vector<16x512xf32>
    %14 = arith.maximumf %12, %13 : vector<16x512xf32>
    %c0_6 = arith.constant 0 : index
    %c0_7 = arith.constant 0 : index
    %15 = vector.load %arg4[%c0_6, %c0_7] : memref<16x512xf32, #tpu.memory_space<vmem>>, vector<16x512xf32>
    tpu.vector_store %arg4[%c0_6, %c0_7], %14 {strides = array<i32>} : memref<16x512xf32, #tpu.memory_space<vmem>>, vector<16x512xf32>,
    return
  }
  func.func @transform_0(%arg0: i32) -> (i32, i32) {
    %c0_i32 = arith.constant 0 : i32
    %c0_i32_0 = arith.constant 0 : i32
    return %c0_i32, %arg0 : i32, i32
  }
  func.func @transform_1(%arg0: i32) -> (i32, i32) {
    %c0_i32 = arith.constant 0 : i32
    %c0_i32_0 = arith.constant 0 : i32
    %c0_i32_1 = arith.constant 0 : i32
    return %c0_i32, %c0_i32_0 : i32, i32
  }
  func.func @transform_2(%arg0: i32) -> (i32, i32) {
    %c0_i32 = arith.constant 0 : i32
    %c0_i32_0 = arith.constant 0 : i32
    %c0_i32_1 = arith.constant 0 : i32
    return %c0_i32, %c0_i32_0 : i32, i32
  }
  func.func @transform_3(%arg0: i32) -> (i32, i32) {
    %c0_i32 = arith.constant 0 : i32
    %c0_i32_0 = arith.constant 0 : i32
    return %c0_i32, %arg0 : i32, i32
  }
}

module attributes {stable_mosaic.version = 11 : i64} {
  func.func @conv_pool_relu_kernel(%arg0: i32, %arg1: memref<576x512xbf16, #tpu.memory_space<vmem>>, %arg2: memref<64x576xbf16, #tpu.memory_space<vmem>>, %arg3: memref<16x1xf32, #tpu.memory_space<vmem>>, %arg4: memref<16x512xf32, #tpu.memory_space<vmem>>) attributes {dimension_semantics = [#tpu.dimension_semantics<parallel>], iteration_bounds = array<i64: 2>, scalar_prefetch = 0 : i64, scratch_operands = 0 : i64, tpu.core_type = #tpu.core_type<tc>, window_params = [{transform_indices = @transform_0, window_bounds = array<i64: 576, 512>}, {pipeline_mode = #tpu.pipeline_mode<synchronous>, transform_indices = @transform_1, window_bounds = array<i64: 64, 576>}, {pipeline_mode = #tpu.pipeline_mode<synchronous>, transform_indices = @transform_2, window_bounds = array<i64: 16, 1>}, {transform_indices = @transform_3, window_bounds = array<i64: 16, 512>}]} {
    %c0 = arith.constant 0 : index
    %c0_0 = arith.constant 0 : index
    %0 = vector.load %arg2[%c0, %c0_0] : memref<64x576xbf16, #tpu.memory_space<vmem>>, vector<64x576xbf16>
    %c0_1 = arith.constant 0 : index
    %c0_2 = arith.constant 0 : index
    %1 = vector.load %arg1[%c0_1, %c0_2] : memref<576x512xbf16, #tpu.memory_space<vmem>>, vector<576x512xbf16>
    %cst = arith.constant dense<0.000000e+00> : vector<64x512xf32>
    %2 = tpu.matmul %0, %1, %cst {dimension_numbers = #tpu.dot_dimension_numbers<[1], [0], [0], [1], [0, 0, 1, 1], [], []>} : vector<64x576xbf16>, vector<576x512xbf16>, vector<64x512xf32> -> vector<64x512xf32>
    %3 = vector.extract_strided_slice %2 {offsets = [0, 0], sizes = [16, 512], strides = [1, 1]} : vector<64x512xf32> to vector<16x512xf32>
    %4 = vector.extract_strided_slice %2 {offsets = [16, 0], sizes = [16, 512], strides = [1, 1]} : vector<64x512xf32> to vector<16x512xf32>
    %5 = arith.maximumf %3, %4 : vector<16x512xf32>
    %6 = vector.extract_strided_slice %2 {offsets = [32, 0], sizes = [16, 512], strides = [1, 1]} : vector<64x512xf32> to vector<16x512xf32>
    %7 = vector.extract_strided_slice %2 {offsets = [48, 0], sizes = [16, 512], strides = [1, 1]} : vector<64x512xf32> to vector<16x512xf32>
    %8 = arith.maximumf %6, %7 : vector<16x512xf32>
    %9 = arith.maximumf %5, %8 : vector<16x512xf32>
    %c0_3 = arith.constant 0 : index
    %c0_4 = arith.constant 0 : index
    %10 = vector.load %arg3[%c0_3, %c0_4] : memref<16x1xf32, #tpu.memory_space<vmem>>, vector<16x1xf32>
    %11 = vector.broadcast %10 : vector<16x1xf32> to vector<16x512xf32>
    %12 = arith.addf %9, %11 : vector<16x512xf32>
    %cst_5 = arith.constant 0.000000e+00 : f32
    %13 = vector.broadcast %cst_5 : f32 to vector<16x512xf32>
    %14 = arith.maximumf %12, %13 : vector<16x512xf32>
    %c0_6 = arith.constant 0 : index
    %c0_7 = arith.constant 0 : index
    %15 = vector.load %arg4[%c0_6, %c0_7] : memref<16x512xf32, #tpu.memory_space<vmem>>, vector<16x512xf32>
    tpu.vector_store %arg4[%c0_6, %c0_7], %14 {strides = array<i32>} : memref<16x512xf32, #tpu.memory_space<vmem>>, vector<16x512xf32>,
    return
  }
  func.func @transform_0(%arg0: i32) -> (i32, i32) {
    %c0_i32 = arith.constant 0 : i32
    %c0_i32_0 = arith.constant 0 : i32
    return %c0_i32, %arg0 : i32, i32
  }
  func.func @transform_1(%arg0: i32) -> (i32, i32) {
    %c0_i32 = arith.constant 0 : i32
    %c0_i32_0 = arith.constant 0 : i32
    %c0_i32_1 = arith.constant 0 : i32
    return %c0_i32, %c0_i32_0 : i32, i32
  }
  func.func @transform_2(%arg0: i32) -> (i32, i32) {
    %c0_i32 = arith.constant 0 : i32
    %c0_i32_0 = arith.constant 0 : i32
    %c0_i32_1 = arith.constant 0 : i32
    return %c0_i32, %c0_i32_0 : i32, i32
  }
  func.func @transform_3(%arg0: i32) -> (i32, i32) {
    %c0_i32 = arith.constant 0 : i32
    %c0_i32_0 = arith.constant 0 : i32
    return %c0_i32, %arg0 : i32, i32
  }
}

module attributes {stable_mosaic.version = 11 : i64} {
  func.func @conv_pool_relu_kernel(%arg0: i32, %arg1: memref<576x128xbf16, #tpu.memory_space<vmem>>, %arg2: memref<64x576xbf16, #tpu.memory_space<vmem>>, %arg3: memref<16x1xf32, #tpu.memory_space<vmem>>, %arg4: memref<16x128xf32, #tpu.memory_space<vmem>>) attributes {dimension_semantics = [#tpu.dimension_semantics<parallel>], iteration_bounds = array<i64: 1>, scalar_prefetch = 0 : i64, scratch_operands = 0 : i64, tpu.core_type = #tpu.core_type<tc>, window_params = [{transform_indices = @transform_0, window_bounds = array<i64: 576, 128>}, {pipeline_mode = #tpu.pipeline_mode<synchronous>, transform_indices = @transform_1, window_bounds = array<i64: 64, 576>}, {pipeline_mode = #tpu.pipeline_mode<synchronous>, transform_indices = @transform_2, window_bounds = array<i64: 16, 1>}, {transform_indices = @transform_3, window_bounds = array<i64: 16, 128>}]} {
    %c0 = arith.constant 0 : index
    %c0_0 = arith.constant 0 : index
    %0 = vector.load %arg2[%c0, %c0_0] : memref<64x576xbf16, #tpu.memory_space<vmem>>, vector<64x576xbf16>
    %c0_1 = arith.constant 0 : index
    %c0_2 = arith.constant 0 : index
    %1 = vector.load %arg1[%c0_1, %c0_2] : memref<576x128xbf16, #tpu.memory_space<vmem>>, vector<576x128xbf16>
    %cst = arith.constant dense<0.000000e+00> : vector<64x128xf32>
    %2 = tpu.matmul %0, %1, %cst {dimension_numbers = #tpu.dot_dimension_numbers<[1], [0], [0], [1], [0, 0, 1, 1], [], []>} : vector<64x576xbf16>, vector<576x128xbf16>, vector<64x128xf32> -> vector<64x128xf32>
    %3 = vector.extract_strided_slice %2 {offsets = [0, 0], sizes = [16, 128], strides = [1, 1]} : vector<64x128xf32> to vector<16x128xf32>
    %4 = vector.extract_strided_slice %2 {offsets = [16, 0], sizes = [16, 128], strides = [1, 1]} : vector<64x128xf32> to vector<16x128xf32>
    %5 = arith.maximumf %3, %4 : vector<16x128xf32>
    %6 = vector.extract_strided_slice %2 {offsets = [32, 0], sizes = [16, 128], strides = [1, 1]} : vector<64x128xf32> to vector<16x128xf32>
    %7 = vector.extract_strided_slice %2 {offsets = [48, 0], sizes = [16, 128], strides = [1, 1]} : vector<64x128xf32> to vector<16x128xf32>
    %8 = arith.maximumf %6, %7 : vector<16x128xf32>
    %9 = arith.maximumf %5, %8 : vector<16x128xf32>
    %c0_3 = arith.constant 0 : index
    %c0_4 = arith.constant 0 : index
    %10 = vector.load %arg3[%c0_3, %c0_4] : memref<16x1xf32, #tpu.memory_space<vmem>>, vector<16x1xf32>
    %11 = vector.broadcast %10 : vector<16x1xf32> to vector<16x128xf32>
    %12 = arith.addf %9, %11 : vector<16x128xf32>
    %cst_5 = arith.constant 0.000000e+00 : f32
    %13 = vector.broadcast %cst_5 : f32 to vector<16x128xf32>
    %14 = arith.maximumf %12, %13 : vector<16x128xf32>
    %c0_6 = arith.constant 0 : index
    %c0_7 = arith.constant 0 : index
    %15 = vector.load %arg4[%c0_6, %c0_7] : memref<16x128xf32, #tpu.memory_space<vmem>>, vector<16x128xf32>
    tpu.vector_store %arg4[%c0_6, %c0_7], %14 {strides = array<i32>} : memref<16x128xf32, #tpu.memory_space<vmem>>, vector<16x128xf32>,
    return
  }
  func.func @transform_0(%arg0: i32) -> (i32, i32) {
    %c0_i32 = arith.constant 0 : i32
    %c0_i32_0 = arith.constant 0 : i32
    return %c0_i32, %arg0 : i32, i32
  }
  func.func @transform_1(%arg0: i32) -> (i32, i32) {
    %c0_i32 = arith.constant 0 : i32
    %c0_i32_0 = arith.constant 0 : i32
    %c0_i32_1 = arith.constant 0 : i32
    return %c0_i32, %c0_i32_0 : i32, i32
  }
  func.func @transform_2(%arg0: i32) -> (i32, i32) {
    %c0_i32 = arith.constant 0 : i32
    %c0_i32_0 = arith.constant 0 : i32
    %c0_i32_1 = arith.constant 0 : i32
    return %c0_i32, %c0_i32_0 : i32, i32
  }
  func.func @transform_3(%arg0: i32) -> (i32, i32) {
    %c0_i32 = arith.constant 0 : i32
    %c0_i32_0 = arith.constant 0 : i32
    return %c0_i32, %arg0 : i32, i32
  }
}

module attributes {stable_mosaic.version = 11 : i64} {
  func.func @mlp_head_kernel(%arg0: i32, %arg1: memref<2x288xf32, #tpu.memory_space<vmem>>, %arg2: memref<288x100xf32, #tpu.memory_space<vmem>>, %arg3: memref<1x100xf32, #tpu.memory_space<vmem>>, %arg4: memref<100x11xf32, #tpu.memory_space<vmem>>, %arg5: memref<1x11xf32, #tpu.memory_space<vmem>>, %arg6: memref<2x11xf32, #tpu.memory_space<vmem>>) attributes {dimension_semantics = [#tpu.dimension_semantics<arbitrary>], iteration_bounds = array<i64: 1>, scalar_prefetch = 0 : i64, scratch_operands = 0 : i64, tpu.core_type = #tpu.core_type<tc>, window_params = [{pipeline_mode = #tpu.pipeline_mode<synchronous>, transform_indices = @transform_0, window_bounds = array<i64: 2, 288>}, {pipeline_mode = #tpu.pipeline_mode<synchronous>, transform_indices = @transform_1, window_bounds = array<i64: 288, 100>}, {pipeline_mode = #tpu.pipeline_mode<synchronous>, transform_indices = @transform_2, window_bounds = array<i64: 1, 100>}, {pipeline_mode = #tpu.pipeline_mode<synchronous>, transform_indices = @transform_3, window_bounds = array<i64: 100, 11>}, {pipeline_mode = #tpu.pipeline_mode<synchronous>, transform_indices = @transform_4, window_bounds = array<i64: 1, 11>}, {pipeline_mode = #tpu.pipeline_mode<synchronous>, transform_indices = @transform_5, window_bounds = array<i64: 2, 11>}]} {
    %c0 = arith.constant 0 : index
    %c0_0 = arith.constant 0 : index
    %0 = vector.load %arg1[%c0, %c0_0] : memref<2x288xf32, #tpu.memory_space<vmem>>, vector<2x288xf32>
    %c0_1 = arith.constant 0 : index
    %c0_2 = arith.constant 0 : index
    %1 = vector.load %arg2[%c0_1, %c0_2] : memref<288x100xf32, #tpu.memory_space<vmem>>, vector<288x100xf32>
    %cst = arith.constant dense<0.000000e+00> : vector<2x100xf32>
    %2 = tpu.matmul %0, %1, %cst {dimension_numbers = #tpu.dot_dimension_numbers<[1], [0], [0], [1], [0, 0, 1, 1], [], []>} : vector<2x288xf32>, vector<288x100xf32>, vector<2x100xf32> -> vector<2x100xf32>
    %c0_3 = arith.constant 0 : index
    %c0_4 = arith.constant 0 : index
    %3 = vector.load %arg3[%c0_3, %c0_4] : memref<1x100xf32, #tpu.memory_space<vmem>>, vector<1x100xf32>
    %4 = vector.broadcast %3 : vector<1x100xf32> to vector<2x100xf32>
    %5 = arith.addf %2, %4 : vector<2x100xf32>
    %cst_5 = arith.constant 0.000000e+00 : f32
    %6 = vector.broadcast %cst_5 : f32 to vector<2x100xf32>
    %7 = arith.maximumf %5, %6 : vector<2x100xf32>
    %c0_6 = arith.constant 0 : index
    %c0_7 = arith.constant 0 : index
    %8 = vector.load %arg4[%c0_6, %c0_7] : memref<100x11xf32, #tpu.memory_space<vmem>>, vector<100x11xf32>
    %cst_8 = arith.constant dense<0.000000e+00> : vector<2x11xf32>
    %9 = tpu.matmul %7, %8, %cst_8 {dimension_numbers = #tpu.dot_dimension_numbers<[1], [0], [0], [1], [0, 0, 1, 1], [], []>} : vector<2x100xf32>, vector<100x11xf32>, vector<2x11xf32> -> vector<2x11xf32>
    %c0_9 = arith.constant 0 : index
    %c0_10 = arith.constant 0 : index
    %10 = vector.load %arg5[%c0_9, %c0_10] : memref<1x11xf32, #tpu.memory_space<vmem>>, vector<1x11xf32>
    %11 = vector.broadcast %10 : vector<1x11xf32> to vector<2x11xf32>
    %12 = arith.addf %9, %11 : vector<2x11xf32>
    %cst_11 = arith.constant 0.000000e+00 : f32
    %13 = vector.broadcast %cst_11 : f32 to vector<2x11xf32>
    %14 = arith.maximumf %12, %13 : vector<2x11xf32>
    %cst_12 = arith.constant dense<0xFF800000> : vector<2xf32>
    %15 = vector.multi_reduction <maximumf>, %14, %cst_12 [1] : vector<2x11xf32> to vector<2xf32>
    %16 = vector.shape_cast %15 : vector<2xf32> to vector<2x1xf32>
    %17 = vector.broadcast %16 : vector<2x1xf32> to vector<2x11xf32>
    %18 = arith.subf %14, %17 : vector<2x11xf32>
    %19 = math.exp %18 : vector<2x11xf32>
    %cst_13 = arith.constant dense<0.000000e+00> : vector<2xf32>
    %20 = vector.multi_reduction <add>, %19, %cst_13 [1] : vector<2x11xf32> to vector<2xf32>
    %21 = vector.shape_cast %20 : vector<2xf32> to vector<2x1xf32>
    %22 = math.log %21 : vector<2x1xf32>
    %23 = arith.addf %16, %22 : vector<2x1xf32>
    %24 = vector.broadcast %23 : vector<2x1xf32> to vector<2x11xf32>
    %25 = arith.subf %14, %24 : vector<2x11xf32>
    %c0_14 = arith.constant 0 : index
    %c0_15 = arith.constant 0 : index
    %26 = vector.load %arg6[%c0_14, %c0_15] : memref<2x11xf32, #tpu.memory_space<vmem>>, vector<2x11xf32>
    tpu.vector_store %arg6[%c0_14, %c0_15], %25 {strides = array<i32>} : memref<2x11xf32, #tpu.memory_space<vmem>>, vector<2x11xf32>,
    return
  }
  func.func @transform_0(%arg0: i32) -> (i32, i32) {
    %c0_i32 = arith.constant 0 : i32
    %c0_i32_0 = arith.constant 0 : i32
    %c0_i32_1 = arith.constant 0 : i32
    return %c0_i32, %c0_i32_0 : i32, i32
  }
  func.func @transform_1(%arg0: i32) -> (i32, i32) {
    %c0_i32 = arith.constant 0 : i32
    %c0_i32_0 = arith.constant 0 : i32
    %c0_i32_1 = arith.constant 0 : i32
    return %c0_i32, %c0_i32_0 : i32, i32
  }
  func.func @transform_2(%arg0: i32) -> (i32, i32) {
    %c0_i32 = arith.constant 0 : i32
    %c0_i32_0 = arith.constant 0 : i32
    %c0_i32_1 = arith.constant 0 : i32
    return %c0_i32, %c0_i32_0 : i32, i32
  }
  func.func @transform_3(%arg0: i32) -> (i32, i32) {
    %c0_i32 = arith.constant 0 : i32
    %c0_i32_0 = arith.constant 0 : i32
    %c0_i32_1 = arith.constant 0 : i32
    return %c0_i32, %c0_i32_0 : i32, i32
  }
  func.func @transform_4(%arg0: i32) -> (i32, i32) {
    %c0_i32 = arith.constant 0 : i32
    %c0_i32_0 = arith.constant 0 : i32
    %c0_i32_1 = arith.constant 0 : i32
    return %c0_i32, %c0_i32_0 : i32, i32
  }
  func.func @transform_5(%arg0: i32) -> (i32, i32) {
    %c0_i32 = arith.constant 0 : i32
    %c0_i32_0 = arith.constant 0 : i32
    %c0_i32_1 = arith.constant 0 : i32
    return %c0_i32, %c0_i32_0 : i32, i32
  }
}

</mosaic_0001>

<bundles_post_ra>
// kernel: mul.4
= control target key start
LH: loop header
LB: loop body
LE: loop exit
PB: predicated region body
PF: predicated region fallthrough
CT: control target
= control target key end

     0   :  { %vm47_vm0 = vcmask 130048   ;;  %s185_s0 = inlined_call_operand.vmem [shape: f32[16,3,3,3], index: 0, kind: input, shape index: {}]   ;;  %s186_s1 = inlined_call_operand.vmem [shape: f32[16,27], index: 1, kind: output, shape index: {}]  }
   0x1   :  { %v96_v0 = vld [vmem:[%s185_s0 + $0x20] sm:$0xf]  ;;  %v97_v1 = vld [vmem:[%s185_s0 + $0x1c] sm:$0xf]  ;;  %v98_v2 = vld [vmem:[%s185_s0 + $0x18] sm:$0xf] }
   0x2   :  { %9 = vst [vmem:[#allocation0 + $0x10] sm:$0xf] %v96_v0  ;;  %14 = vst [vmem:[#allocation0 + $0x40] sm:$0xf] %v97_v1  ;;  %v99_v3 = vld [vmem:[%s185_s0 + $0x14] sm:$0xf] }
   0x3   :  { %19 = vst [vmem:[#allocation0 + $0x28] sm:$0xf] %v98_v2  ;;  %v100_v4 = vld [vmem:[%s185_s0 + $0x10] sm:$0xf]  ;;  %v101_v5 = vld [vmem:[%s185_s0 + $0xc] sm:$0xf] }
   0x4   :  { %24 = vst [vmem:[#allocation0 + $0x30] sm:$0xf] %v99_v3  ;;  %29 = vst [vmem:[#allocation0 + $0x20] sm:$0xf] %v100_v4  ;;  %v102_v6 = vld [vmem:[%s185_s0 + $0x8] sm:$0xf] }
   0x5   :  { %34 = vst [vmem:[#allocation0 + $0x18] sm:$0xf] %v101_v5  ;;  %v103_v7 = vld [vmem:[%s185_s0 + $0x4] sm:$0xf]  ;;  %v44_v8 = vld [vmem:[%s185_s0] sm:$0xf] }
   0x6   :  { %39 = vst [vmem:[#allocation0] sm:$0xf] %v102_v6  ;;  %43 = vst [vmem:[#allocation0 + $0x8] sm:$0xf] %v103_v7 }
   0x7   :  { %45 = vst [vmem:[#allocation0 + $0x38] sm:$0xf] %v44_v8 }
   0x9   :  { %v80_v10 = vld [vmem:[#allocation0 + $0x40] sm:$0x7]   ;;  %v85_v11 = vld [vmem:[#allocation0 + $0x10] sm:$0x7]  }
   0xa   :  { %v75_v9 = vld [vmem:[#allocation0 + $0x28] sm:$0x7]   ;;  %110 = vst.msk [vmem:[%s186_s1 + $0x15] sm:$0x7] %vm47_vm0, %v80_v10   ;;  %111 = vst.msk [vmem:[%s186_s1 + $0x18] sm:$0x7] %vm47_vm0, %v85_v11  }
   0xb   :  { %v65_v13 = vld [vmem:[#allocation0 + $0x20] sm:$0x7]   ;;  %v70_v14 = vld [vmem:[#allocation0 + $0x30] sm:$0x7]   ;;  %109 = vst.msk [vmem:[%s186_s1 + $0x12] sm:$0x7] %vm47_vm0, %v75_v9  }
   0xc   :  { %v60_v12 = vld [vmem:[#allocation0 + $0x18] sm:$0x7]   ;;  %107 = vst.msk [vmem:[%s186_s1 + $0xc] sm:$0x7] %vm47_vm0, %v65_v13   ;;  %108 = vst.msk [vmem:[%s186_s1 + $0xf] sm:$0x7] %vm47_vm0, %v70_v14  }
   0xd   :  { %v50_v16 = vld [vmem:[#allocation0 + $0x8] sm:$0x7]   ;;  %v55_v17 = vld [vmem:[#allocation0] sm:$0x7]   ;;  %106 = vst.msk [vmem:[%s186_s1 + $0x9] sm:$0x7] %vm47_vm0, %v60_v12  }
   0xe   :  { %v46_v15 = vld [vmem:[#allocation0 + $0x38] sm:$0x7]   ;;  %104 = vst.msk [vmem:[%s186_s1 + $0x3] sm:$0x7] %vm47_vm0, %v50_v16   ;;  %105 = vst.msk [vmem:[%s186_s1 + $0x6] sm:$0x7] %vm47_vm0, %v55_v17  }
   0xf   :  { %48 = vst.msk [vmem:[%s186_s1] sm:$0x7] %vm47_vm0, %v46_v15  }

// kernel: gymn_forward.4
= control target key start
LH: loop header
LB: loop body
LE: loop exit
PB: predicated region body
PF: predicated region fallthrough
CT: control target
= control target key end

     0   :  { %s939_s12 = smov 0   ;;  %s941_s13 = smov 0   ;;  %s1152_s0 = inlined_call_operand.vmem [shape: bf16[108,3584], index: 0, kind: input, shape index: {}]   ;;  %s1153_s1 = inlined_call_operand.vmem [shape: bf16[64,108], index: 1, kind: input, shape index: {}]   ;;  %s1154_s2 = inlined_call_operand.vmem [shape: f32[16,1], index: 2, kind: input, shape index: {}]   ;;  %s1155_s3 = inlined_call_operand.vmem [shape: f32[16,3584], index: 3, kind: output, shape index: {}]  }
   0x1   :  { %s943_s14 = smov 0  }
   0x2 LB: > { %s763_s15 = sadd.s32 4294967295, %s916_s14   ;;  %s956_s16 = sadd.s32 1, %s916_s14   ;;  %s916_s14 = sphi %s943_s14, %s1159_s14   ;;  %s912_s13 = sphi %s941_s13, %s1158_s13   ;;  %s908_s12 = sphi %s939_s12, %s1157_s12  }
   0x3   : > { %s17_s17 = ssub.s32 %s916_s14, %s956_s16  ;;  %s20_s18 = sadd.s32 1, %s912_s13 }
   0x4   : > { %p18_p0 = scmp.eq.s32.totalorder %s17_s17, 0  ;;  %p27_p1 = scmp.ne.s32.totalorder %s912_s13, %s908_s12 }
   0x5   : > { %p28_p2 = scmp.eq.s32.totalorder %s916_s14, 0  ;;  %p99_p3 = scmp.eq.s32.totalorder %s763_s15, 6 }
   0x6   : > { %s967_s19 = scalar_select %p18_p0, %s912_s13, %s20_s18  }
   0x7   : > { %p29_p4 = por %p28_p2, %p27_p1  ;;  %p969_p5 = por %p99_p3, %p27_p1 }
   0x8   : > { %p766_p6 = scmp.ge.s32.totalorder %s916_s14, 7 }
   0xa   : > { %127 = sbr.rel (%p766_p6) target bundleno = 34 (0x22), region = 24 }
   0xf   : > { %130 = sbr.rel (!%p29_p4) target bundleno = 34 (0x22), region = 28  ;;  %s132_s21 = sand.u32 (%p29_p4), 1, %s912_s13  }
  0x10   : > { %s818_s22 = sshll.u32 (%p29_p4), %s916_s14, 4  ;;  %s820_s23 = smul.u32 (%p29_p4), 224, %s132_s21 }
  0x11   : > { %s979_s26 = scalar_lea.vmem (%p29_p4), %s1152_s0, %s818_s22 }
  0x12   : > { %v150_v0 = vld [vmem:[%s979_s26] sm:$0xff] (%p29_p4)  ;;  %v152_v1 = vld [vmem:[%s979_s26 + $0x8] sm:$0xff] (%p29_p4)  ;;  %v154_v2 = vld [vmem:[%s979_s26 + $0x70] sm:$0xff] (%p29_p4)  ;;  %s987_s27 = scalar_lea.vmem (%p29_p4), [#allocation2], %s820_s23 }
  0x13   : > { %v156_v3 = vld [vmem:[%s979_s26 + $0x78] sm:$0xff] (%p29_p4)  ;;  %v158_v4 = vld [vmem:[%s979_s26 + $0xe0] sm:$0xff] (%p29_p4)  ;;  %v160_v5 = vld [vmem:[%s979_s26 + $0xe8] sm:$0xff] (%p29_p4)  ;;  %151 = vst [vmem:[%s987_s27] sm:$0xff] (%p29_p4), %v150_v0 }
  0x14   : > { %153 = vst [vmem:[%s987_s27 + $0x8] sm:$0xff] %v152_v1  ;;  %155 = vst [vmem:[%s987_s27 + $0x10] sm:$0xff] %v154_v2  ;;  %v162_v6 = vld [vmem:[%s979_s26 + $0x150] sm:$0xff]  ;;  %v164_v7 = vld [vmem:[%s979_s26 + $0x158] sm:$0xff] }
  0x15   : > { %157 = vst [vmem:[%s987_s27 + $0x18] sm:$0xff] %v156_v3  ;;  %159 = vst [vmem:[%s987_s27 + $0x20] sm:$0xff] %v158_v4  ;;  %v166_v8 = vld [vmem:[%s979_s26 + $0x1c0] sm:$0xff]  ;;  %v168_v9 = vld [vmem:[%s979_s26 + $0x1c8] sm:$0xff] }
  0x16   : > { %161 = vst [vmem:[%s987_s27 + $0x28] sm:$0xff] %v160_v5  ;;  %163 = vst [vmem:[%s987_s27 + $0x30] sm:$0xff] %v162_v6  ;;  %v170_v10 = vld [vmem:[%s979_s26 + $0x230] sm:$0xff]  ;;  %v172_v11 = vld [vmem:[%s979_s26 + $0x238] sm:$0xff] }
  0x17   : > { %165 = vst [vmem:[%s987_s27 + $0x38] sm:$0xff] %v164_v7  ;;  %167 = vst [vmem:[%s987_s27 + $0x40] sm:$0xff] %v166_v8  ;;  %v174_v12 = vld [vmem:[%s979_s26 + $0x2a0] sm:$0xff]  ;;  %v176_v13 = vld [vmem:[%s979_s26 + $0x2a8] sm:$0xff] }
  0x18   : > { %169 = vst [vmem:[%s987_s27 + $0x48] sm:$0xff] %v168_v9  ;;  %171 = vst [vmem:[%s987_s27 + $0x50] sm:$0xff] %v170_v10  ;;  %v178_v14 = vld [vmem:[%s979_s26 + $0x310] sm:$0xff]  ;;  %v180_v15 = vld [vmem:[%s979_s26 + $0x318] sm:$0xff] }
  0x19   : > { %173 = vst [vmem:[%s987_s27 + $0x58] sm:$0xff] %v172_v11  ;;  %175 = vst [vmem:[%s987_s27 + $0x60] sm:$0xff] %v174_v12  ;;  %v182_v16 = vld [vmem:[%s979_s26 + $0x380] sm:$0xff]  ;;  %v184_v17 = vld [vmem:[%s979_s26 + $0x388] sm:$0xff] }
  0x1a   : > { %177 = vst [vmem:[%s987_s27 + $0x68] sm:$0xff] %v176_v13  ;;  %179 = vst [vmem:[%s987_s27 + $0x70] sm:$0xff] %v178_v14  ;;  %v186_v18 = vld [vmem:[%s979_s26 + $0x3f0] sm:$0xff]  ;;  %v188_v19 = vld [vmem:[%s979_s26 + $0x3f8] sm:$0xff] }
  0x1b   : > { %181 = vst [vmem:[%s987_s27 + $0x78] sm:$0xff] %v180_v15  ;;  %183 = vst [vmem:[%s987_s27 + $0x80] sm:$0xff] %v182_v16  ;;  %v190_v20 = vld [vmem:[%s979_s26 + $0x460] sm:$0xff]  ;;  %v192_v21 = vld [vmem:[%s979_s26 + $0x468] sm:$0xff] }
  0x1c   : > { %185 = vst [vmem:[%s987_s27 + $0x88] sm:$0xff] %v184_v17  ;;  %187 = vst [vmem:[%s987_s27 + $0x90] sm:$0xff] %v186_v18  ;;  %v194_v22 = vld [vmem:[%s979_s26 + $0x4d0] sm:$0xff]  ;;  %v196_v23 = vld [vmem:[%s979_s26 + $0x4d8] sm:$0xff] }
  0x1d   : > { %189 = vst [vmem:[%s987_s27 + $0x98] sm:$0xff] %v188_v19  ;;  %191 = vst [vmem:[%s987_s27 + $0xa0] sm:$0xff] %v190_v20  ;;  %v198_v24 = vld [vmem:[%s979_s26 + $0x540] sm:$0xff]  ;;  %v200_v25 = vld [vmem:[%s979_s26 + $0x548] sm:$0xff] }
  0x1e   : > { %193 = vst [vmem:[%s987_s27 + $0xa8] sm:$0xff] %v192_v21  ;;  %195 = vst [vmem:[%s987_s27 + $0xb0] sm:$0xff] %v194_v22  ;;  %v202_v26 = vld [vmem:[%s979_s26 + $0x5b0] sm:$0xff]  ;;  %v204_v27 = vld [vmem:[%s979_s26 + $0x5b8] sm:$0xff] }
  0x1f   : > { %197 = vst [vmem:[%s987_s27 + $0xb8] sm:$0xff] %v196_v23  ;;  %199 = vst [vmem:[%s987_s27 + $0xc0] sm:$0xff] %v198_v24 }
  0x20   : > { %201 = vst [vmem:[%s987_s27 + $0xc8] sm:$0xff] %v200_v25  ;;  %203 = vst [vmem:[%s987_s27 + $0xd0] sm:$0xff] %v202_v26 }
  0x21   : > { %205 = vst [vmem:[%s987_s27 + $0xd8] sm:$0xff] %v204_v27 }
  0x22 PF: > { %p769_p7 = scmp.ge.s32.totalorder %s916_s14, 1  ;;  %p210_p8 = scmp.lt.s32.totalorder %s916_s14, 8 }
  0x24   : > { %p211_p9 = pnand %p769_p7, %p210_p8 }
  0x25   : > { %s217_s28 = sand.u32 (!%p211_p9), 1, %s908_s12  }
  0x26   : > { %214 = sbr.rel (%p211_p9) target bundleno = 314 (0x13a), region = 51  ;;  %s770_s23 = sshll.u32 (!%p211_p9), %s217_s28, 6 }
  0x27   : > { %s821_s29 = smul.u32 (!%p211_p9), 224, %s217_s28  ;;  %s1117_s12 = scalar_lea.vmem (!%p211_p9), [#allocation3], %s770_s23 }
  0x29   : > { %s1047_s30 = scalar_lea.vmem (!%p211_p9), [#allocation2], %s821_s29 }
  0x2b   : > { %v918_v28 = vmov 0   ;;  %vm447_vm0 = vcmask 1045504   ;;  %v848_v29 = vld [vmem:[%s1047_s30 + $0xc4] ss:$16 sps:$4 sm:$0x3f]   ;;  %v631_v56 = vld [vmem:[%s1154_s2 + $0x8] sm:$0xff] }
  0x2c   : > { %492 = vmatprep.mubr.bf16.mxu0 %v918_v28  ;;  %565 = vmatprep.mubr.bf16.mxu1 %v918_v28  ;;  %v850_v30 = vld [vmem:[%s1047_s30 + $0xcc] ss:$16 sps:$4 sm:$0x3f]   ;;  %v852_v31 = vld [vmem:[%s1047_s30 + $0xc0] ss:$16 sps:$4 sm:$0x3f]  }
  0x2d   : > { %847 = vset.pattern.permute.xlu0 %v918_v28  ;;  %803 = vmatprep.subr.msk.bf16.mxu0 %vm447_vm0, %v848_v29  ;;  %v853_v32 = vld [vmem:[%s1047_s30 + $0xc8] ss:$16 sps:$4 sm:$0x3f]   ;;  %v854_v33 = vld [vmem:[%s1047_s30 + $0xa4] ss:$16 sps:$4 sm:$0xff]   ;;  %v449_v34 = vsel %vm447_vm0, %v852_v31, 0 }
  0x2e   : > { %808 = vmatprep.subr.msk.bf16.mxu1 %vm447_vm0, %v850_v30  ;;  %v455_v35 = vsel %vm447_vm0, %v853_v32, 0  ;;  %v856_v36 = vld [vmem:[%s1047_s30 + $0xac] ss:$16 sps:$4 sm:$0xff]   ;;  %463 = vmatpush1.bf16.msra.mxu0 %v449_v34  ;;  %v858_v37 = vld [vmem:[%s1047_s30 + $0xa0] ss:$16 sps:$4 sm:$0xff]   ;;  %vm434_vm1 = vcmask 883712  }
  0x2f   : > { %536 = vmatpush1.bf16.msra.mxu1 %v455_v35  ;;  %v859_v38 = vld [vmem:[%s1047_s30 + $0xa8] ss:$16 sps:$4 sm:$0xff]   ;;  %464 = vmatprep.subr.bf16.mxu0 %v854_v33  ;;  %v860_v39 = vld [vmem:[%s1047_s30 + $0x84] ss:$16 sps:$4 sm:$0xff]   ;;  %v862_v40 = vld [vmem:[%s1047_s30 + $0x8c] ss:$16 sps:$4 sm:$0xff]  }
  0x30   : > { %537 = vmatprep.subr.bf16.mxu1 %v856_v36  ;;  %v864_v41 = vld [vmem:[%s1047_s30 + $0x80] ss:$16 sps:$4 sm:$0xff]   ;;  %v865_v42 = vld [vmem:[%s1047_s30 + $0x88] ss:$16 sps:$4 sm:$0xff]   ;;  %v866_v43 = vld [vmem:[%s1047_s30 + $0x64] ss:$16 sps:$4 sm:$0xff]  }
  0x31   : > { %v868_v44 = vld [vmem:[%s1047_s30 + $0x6c] ss:$16 sps:$4 sm:$0xff]   ;;  %v870_v45 = vld [vmem:[%s1047_s30 + $0x60] ss:$16 sps:$4 sm:$0xff]   ;;  %v871_v46 = vld [vmem:[%s1047_s30 + $0x68] ss:$16 sps:$4 sm:$0xff]  }
  0x32   : > { %465 = vmatpush1.bf16.msra.mxu0 %v858_v37  ;;  %v872_v47 = vld [vmem:[%s1047_s30 + $0x44] ss:$16 sps:$4 sm:$0xff]   ;;  %v874_v48 = vld [vmem:[%s1047_s30 + $0x4c] ss:$16 sps:$4 sm:$0xff]   ;;  %v876_v49 = vld [vmem:[%s1047_s30 + $0x40] ss:$16 sps:$4 sm:$0xff]  }
  0x33   : > { %538 = vmatpush1.bf16.msra.mxu1 %v859_v38  ;;  %466 = vmatprep.subr.bf16.mxu0 %v860_v39  ;;  %v877_v50 = vld [vmem:[%s1047_s30 + $0x48] ss:$16 sps:$4 sm:$0xff]   ;;  %v878_v51 = vld [vmem:[%s1047_s30 + $0x24] ss:$16 sps:$4 sm:$0xff]   ;;  %v880_v52 = vld [vmem:[%s1047_s30 + $0x2c] ss:$16 sps:$4 sm:$0xff]  }
  0x34   : > { %539 = vmatprep.subr.bf16.mxu1 %v862_v40  ;;  %v630_v53 = vld [vmem:[%s1154_s2] sm:$0xff]  ;;  %v883_v55 = vld [vmem:[%s1047_s30 + $0x28] ss:$16 sps:$4 sm:$0xff]   ;;  %v886_v58 = vld [vmem:[%s1047_s30 + $0xc] ss:$16 sps:$4 sm:$0xff]   ;;  %s819_s24 = sshll.u32 (%p969_p5), %s763_s15, 5 }
  0x35   : > { %634 = vperm.xlu0 %847, %v630_v53   ;;  %v882_v54 = vld [vmem:[%s1047_s30 + $0x20] ss:$16 sps:$4 sm:$0xff]   ;;  %v884_v57 = vld [vmem:[%s1047_s30 + $0x4] ss:$16 sps:$4 sm:$0xff]   ;;  %v889_v60 = vld [vmem:[%s1047_s30 + $0x8] ss:$16 sps:$4 sm:$0xff]   ;;  %s675_s27 = scalar_lea.vmem (%p969_p5), %s1155_s3, %s819_s24 }
  0x36   : > { %467 = vmatpush1.bf16.msra.mxu0 %v864_v41  ;;  %v888_v59 = vld [vmem:[%s1047_s30] ss:$16 sps:$4 sm:$0xff]   ;;  %v891_v62 = vld [vmem:[%s1153_s1 + $0x8] sm:$0xff]   ;;  %v893_v0 = vld [vmem:[%s1153_s1 + $0x18] sm:$0xff]  }
  0x37   : > { %540 = vmatpush1.bf16.msra.mxu1 %v865_v42  ;;  %468 = vmatprep.subr.bf16.mxu0 %v866_v43  ;;  %v890_v61 = vld [vmem:[%s1153_s1] sm:$0xff]   ;;  %v892_v63 = vld [vmem:[%s1153_s1 + $0x10] sm:$0xff]  }
  0x38   : > { %541 = vmatprep.subr.bf16.mxu1 %v868_v44 }
  0x39   : > { %639 = vperm.xlu0 %847, %v631_v56  }
  0x3a   : > { %469 = vmatpush1.bf16.msra.mxu0 %v870_v45 }
  0x3b   : > { %542 = vmatpush1.bf16.msra.mxu1 %v871_v46  ;;  %470 = vmatprep.subr.bf16.mxu0 %v872_v47 }
  0x3c   : > { %543 = vmatprep.subr.bf16.mxu1 %v874_v48 }
  0x3e   : > { %471 = vmatpush1.bf16.msra.mxu0 %v876_v49 }
  0x3f   : > { %544 = vmatpush1.bf16.msra.mxu1 %v877_v50  ;;  %472 = vmatprep.subr.bf16.mxu0 %v878_v51 }
  0x40   : > { %545 = vmatprep.subr.bf16.mxu1 %v880_v52 }
  0x42   : > { %473 = vmatpush1.bf16.msra.mxu0 %v882_v54 }
  0x43   : > { %546 = vmatpush1.bf16.msra.mxu1 %v883_v55  ;;  %474 = vmatprep.subr.bf16.mxu0 %v884_v57 }
  0x44   : > { %547 = vmatprep.subr.bf16.mxu1 %v886_v58 }
  0x46   : > { %475 = vmatpush1.bf16.msra.mxu0 %v888_v59 }
  0x47   : > { %548 = vmatpush1.bf16.msra.mxu1 %v889_v60 }
  0x49   : > { %804 = vmatmul.mubr.msk.bf16.vlgmr.msra.gmra.mxu0 %vm434_vm1, %v890_v61 }
  0x4a   : > { %809 = vmatmul.mubr.msk.bf16.vlgmr.msra.gmra.mxu1 %vm434_vm1, %v890_v61  ;;  %502 = vmatprep.mubr.bf16.mxu0 %v918_v28 }
  0x4b   : > { %575 = vmatprep.mubr.bf16.mxu1 %v918_v28 }
  0x51   : > { %805 = vmatmul.mubr.msk.bf16.gmra.mxu0 %vm434_vm1, %v891_v62 }
  0x52   : > { %810 = vmatmul.mubr.msk.bf16.gmra.mxu1 %vm434_vm1, %v891_v62  ;;  %512 = vmatprep.mubr.bf16.mxu0 %v918_v28 }
  0x53   : > { %585 = vmatprep.mubr.bf16.mxu1 %v918_v28 }
  0x59   : > { %806 = vmatmul.mubr.msk.bf16.gmra.mxu0 %vm434_vm1, %v892_v63 }
  0x5a   : > { %811 = vmatmul.mubr.msk.bf16.gmra.mxu1 %vm434_vm1, %v892_v63  ;;  %522 = vmatprep.mubr.bf16.mxu0 %v918_v28 }
  0x5b   : > { %595 = vmatprep.mubr.bf16.mxu1 %v918_v28 }
  0x61   : > { %807 = vmatmul.mubr.msk.bf16.gmra.mxu0 %vm434_vm1, %v893_v0 }
  0x62   : > { %812 = vmatmul.mubr.msk.bf16.gmra.mxu1 %vm434_vm1, %v893_v0 }
  0xb0   : > { %v635_v37 = vpop.permute.xlu0 %634 }
  0xb4   : > { %v640_v0 = vpop.permute.xlu0 %639 }
 0x109   : > { %v494_v1 = vpop.f32.mrf.mxu0 }
 0x10a   : > { %v567_v2 = vpop.f32.mrf.mxu1 }
 0x10b   : > { %v496_v3 = vpop.f32.mrf.mxu0 }
 0x10c   : > { %v569_v4 = vpop.f32.mrf.mxu1 }
 0x10d   : > { %v498_v5 = vpop.f32.mrf.mxu0 }
 0x10e   : > { %v571_v6 = vpop.f32.mrf.mxu1 }
 0x10f   : > { %v1109_v7 = vpop.f32.mrf.mxu0 }
 0x110   : > { %v1111_v8 = vpop.f32.mrf.mxu1 }
 0x111   : > { %v504_v9 = vpop.f32.mrf.mxu0 }
 0x112   : > { %v577_v10 = vpop.f32.mrf.mxu1  ;;  %v606_v27 = vmax.f32 %v494_v1, %v504_v9 }
 0x113   : > { %v506_v11 = vpop.f32.mrf.mxu0  ;;  %v608_v28 = vmax.f32 %v567_v2, %v577_v10 }
 0x114   : > { %v579_v12 = vpop.f32.mrf.mxu1  ;;  %v607_v31 = vmax.f32 %v496_v3, %v506_v11 }
 0x115   : > { %v508_v13 = vpop.f32.mrf.mxu0  ;;  %v609_v32 = vmax.f32 %v569_v4, %v579_v12 }
 0x116   : > { %v581_v14 = vpop.f32.mrf.mxu1  ;;  %v610_v40 = vmax.f32 %v498_v5, %v508_v13 }
 0x117   : > { %v510_v15 = vpop.f32.mrf.mxu0  ;;  %v612_v41 = vmax.f32 %v571_v6, %v581_v14 }
 0x118   : > { %v583_v16 = vpop.f32.mrf.mxu1  ;;  %v611_v48 = vmax.f32 %v1109_v7, %v510_v15 }
 0x119   : > { %v514_v17 = vpop.f32.mrf.mxu0  ;;  %v613_v49 = vmax.f32 %v1111_v8, %v583_v16 }
 0x11a   : > { %v587_v18 = vpop.f32.mrf.mxu1 }
 0x11b   : > { %v516_v19 = vpop.f32.mrf.mxu0 }
 0x11c   : > { %v589_v20 = vpop.f32.mrf.mxu1 }
 0x11d   : > { %v518_v21 = vpop.f32.mrf.mxu0 }
 0x11e   : > { %v591_v22 = vpop.f32.mrf.mxu1 }
 0x11f   : > { %v520_v23 = vpop.f32.mrf.mxu0 }
 0x120   : > { %v593_v24 = vpop.f32.mrf.mxu1 }
 0x121   : > { %v524_v25 = vpop.f32.mrf.mxu0 }
 0x122   : > { %v597_v26 = vpop.f32.mrf.mxu1  ;;  %v614_v29 = vmax.f32 %v514_v17, %v524_v25 }
 0x123   : > { %v616_v30 = vmax.f32 %v587_v18, %v597_v26  ;;  %v526_v33 = vpop.f32.mrf.mxu0 }
 0x124   : > { %v599_v34 = vpop.f32.mrf.mxu1  ;;  %v622_v35 = vmax.f32 %v606_v27, %v614_v29  ;;  %v615_v38 = vmax.f32 %v516_v19, %v526_v33 }
 0x125   : > { %v624_v36 = vmax.f32 %v608_v28, %v616_v30  ;;  %v617_v39 = vmax.f32 %v589_v20, %v599_v34  ;;  %v528_v42 = vpop.f32.mrf.mxu0 }
 0x126   : > { %v601_v43 = vpop.f32.mrf.mxu1  ;;  %v642_v44 = vadd.f32 %v635_v37, %v622_v35  ;;  %v623_v46 = vmax.f32 %v607_v31, %v615_v38  ;;  %v618_v50 = vmax.f32 %v518_v21, %v528_v42 }
 0x127   : > { %v644_v45 = vadd.f32 %v635_v37, %v624_v36  ;;  %v625_v47 = vmax.f32 %v609_v32, %v617_v39  ;;  %v620_v51 = vmax.f32 %v591_v22, %v601_v43  ;;  %v530_v52 = vpop.f32.mrf.mxu0 }
 0x128   : > { %v603_v53 = vpop.f32.mrf.mxu1  ;;  %v650_v54 = vmax.f32 %v642_v44, 0.0  ;;  %v643_v56 = vadd.f32 %v635_v37, %v623_v46  ;;  %v626_v58 = vmax.f32 %v610_v40, %v618_v50  ;;  %v619_v60 = vmax.f32 %v520_v23, %v530_v52 }
 0x129   : > { %v652_v55 = vmax.f32 %v644_v45, 0.0  ;;  %v645_v57 = vadd.f32 %v635_v37, %v625_v47  ;;  %v628_v59 = vmax.f32 %v612_v41, %v620_v51  ;;  %v621_v61 = vmax.f32 %v593_v24, %v603_v53 }
 0x12a   : > { %658 = vst [vmem:[%s1117_s12] sm:$0xff] %v650_v54  ;;  %v651_v62 = vmax.f32 %v643_v56, 0.0  ;;  %v646_v1 = vadd.f32 %v640_v0, %v626_v58  ;;  %v627_v3 = vmax.f32 %v611_v48, %v619_v60 }
 0x12b   : > { %660 = vst [vmem:[%s1117_s12 + $0x10] sm:$0xff] %v652_v55  ;;  %v653_v63 = vmax.f32 %v645_v57, 0.0  ;;  %v648_v2 = vadd.f32 %v640_v0, %v628_v59  ;;  %v629_v4 = vmax.f32 %v613_v49, %v621_v61 }
 0x12c   : > { %659 = vst [vmem:[%s1117_s12 + $0x8] sm:$0xff] %v651_v62  ;;  %v654_v5 = vmax.f32 %v646_v1, 0.0  ;;  %v647_v7 = vadd.f32 %v640_v0, %v627_v3 }
 0x12d   : > { %661 = vst [vmem:[%s1117_s12 + $0x18] sm:$0xff] %v653_v63  ;;  %v656_v6 = vmax.f32 %v648_v2, 0.0  ;;  %v649_v8 = vadd.f32 %v640_v0, %v629_v4  ;;  %672 = sbr.rel (!%p969_p5) target bundleno = 314 (0x13a), region = 59 }
 0x12e   : > { %662 = vst [vmem:[%s1117_s12 + $0x20] sm:$0xff] %v654_v5  ;;  %v655_v9 = vmax.f32 %v647_v7, 0.0 }
 0x12f   : > { %664 = vst [vmem:[%s1117_s12 + $0x30] sm:$0xff] %v656_v6  ;;  %v657_v10 = vmax.f32 %v649_v8, 0.0 }
 0x130   : > { %663 = vst [vmem:[%s1117_s12 + $0x28] sm:$0xff] %v655_v9 }
 0x131   : > { %665 = vst [vmem:[%s1117_s12 + $0x38] sm:$0xff] %v657_v10  ;;  %v688_v11 = vld [vmem:[%s1117_s12] sm:$0xff] (%p969_p5) }
 0x132   : > { %v692_v13 = vld [vmem:[%s1117_s12 + $0x10] sm:$0xff]  ;;  %689 = vst [vmem:[%s675_s27] sm:$0xff] %v688_v11 }
 0x133   : > { %v690_v12 = vld [vmem:[%s1117_s12 + $0x8] sm:$0xff]  ;;  %693 = vst [vmem:[%s675_s27 + $0x10] sm:$0xff] %v692_v13 }
 0x134   : > { %v694_v14 = vld [vmem:[%s1117_s12 + $0x18] sm:$0xff]  ;;  %691 = vst [vmem:[%s675_s27 + $0x8] sm:$0xff] %v690_v12 }
 0x135   : > { %v696_v15 = vld [vmem:[%s1117_s12 + $0x20] sm:$0xff]  ;;  %695 = vst [vmem:[%s675_s27 + $0x18] sm:$0xff] %v694_v14 }
 0x136   : > { %697 = vst [vmem:[%s675_s27 + $0xe0] sm:$0xff] %v696_v15  ;;  %v700_v17 = vld [vmem:[%s1117_s12 + $0x30] sm:$0xff] }
 0x137   : > { %v698_v16 = vld [vmem:[%s1117_s12 + $0x28] sm:$0xff]  ;;  %701 = vst [vmem:[%s675_s27 + $0xf0] sm:$0xff] %v700_v17 }
 0x138   : > { %699 = vst [vmem:[%s675_s27 + $0xe8] sm:$0xff] %v698_v16  ;;  %v702_v18 = vld [vmem:[%s1117_s12 + $0x38] sm:$0xff] }
 0x139   : > { %703 = vst [vmem:[%s675_s27 + $0xf8] sm:$0xff] %v702_v18 }
 0x13a PF: > { %p10_p10 = scmp.ge.s32.totalorder %s956_s16, 9   ;;  %s1157_s12 = smov %s912_s13 }
 0x13b   : > { %s1158_s13 = smov %s967_s19  ;;  %s1159_s14 = smov %s956_s16 }
 0x13c   :  { %12 = sbr.rel (!%p10_p10) target bundleno = 2 (0x2), region = 113 }

// kernel: mul.18
= control target key start
LH: loop header
LB: loop body
LE: loop exit
PB: predicated region body
PF: predicated region fallthrough
CT: control target
= control target key end

     0   :  { %vm339_vm0 = vcmask 1047556   ;;  %s604_s4 = smov 96   ;;  %s605_s5 = smov 112   ;;  %vm243_vm1 = vcmask 130048   ;;  %vm343_vm2 = vcmask 1048448   ;;  %vm364_vm3 = vcmask 917248   ;;  %s890_s0 = inlined_call_operand.vmem [shape: f32[16,3,3,16], index: 0, kind: input, shape index: {}]   ;;  %s891_s1 = inlined_call_operand.vmem [shape: f32[16,144], index: 1, kind: output, shape index: {}]  }
   0x1   :  { %v552_v0 = vld [vmem:[%s890_s0 + $0x5c] sm:$0xf]  ;;  %v555_v1 = vld [vmem:[%s890_s0 + $0x50] sm:$0xf]  ;;  %v558_v2 = vld [vmem:[%s890_s0 + $0x44] sm:$0xf] }
   0x2   :  { %129 = vst [vmem:[#allocation0 + $0xb8] sm:$0xf] %v552_v0  ;;  %144 = vst [vmem:[#allocation0 + $0xa0] sm:$0xf] %v555_v1  ;;  %v561_v3 = vld [vmem:[%s890_s0 + $0x38] sm:$0xf] }
   0x3   :  { %159 = vst [vmem:[#allocation0 + $0x88] sm:$0xf] %v558_v2  ;;  %v564_v4 = vld [vmem:[%s890_s0 + $0x2c] sm:$0xf]  ;;  %v567_v5 = vld [vmem:[%s890_s0 + $0x20] sm:$0xf] }
   0x4   :  { %174 = vst [vmem:[#allocation0 + $0x70] sm:$0xf] %v561_v3  ;;  %189 = vst [vmem:[#allocation0 + $0x58] sm:$0xf] %v564_v4  ;;  %v570_v6 = vld [vmem:[%s890_s0 + $0x14] sm:$0xf] }
   0x5   :  { %204 = vst [vmem:[#allocation0 + $0x40] sm:$0xf] %v567_v5  ;;  %v573_v7 = vld [vmem:[%s890_s0 + $0x8] sm:$0xf]  ;;  %219 = vst [vmem:[#allocation0 + $0x28] sm:$0xf] %v570_v6 }
   0x6   :  { %234 = vst [vmem:[#allocation0 + $0x10] sm:$0xf] %v573_v7  ;;  %v528_v8 = vld [vmem:[%s890_s0 + $0xbc] sm:$0xf]  ;;  %v531_v9 = vld [vmem:[%s890_s0 + $0xb0] sm:$0xf] }
   0x7   :  { %9 = vst [vmem:[#allocation0 + $0x178] sm:$0xf] %v528_v8  ;;  %24 = vst [vmem:[#allocation0 + $0x160] sm:$0xf] %v531_v9  ;;  %v534_v10 = vld [vmem:[%s890_s0 + $0xa4] sm:$0xf] }
   0x8   :  { %v537_v11 = vld [vmem:[%s890_s0 + $0x98] sm:$0xf]  ;;  %v540_v12 = vld [vmem:[%s890_s0 + $0x8c] sm:$0xf]  ;;  %39 = vst [vmem:[#allocation0 + $0x148] sm:$0xf] %v534_v10 }
   0x9   :  { %54 = vst [vmem:[#allocation0 + $0x130] sm:$0xf] %v537_v11  ;;  %69 = vst [vmem:[#allocation0 + $0x118] sm:$0xf] %v540_v12  ;;  %v543_v13 = vld [vmem:[%s890_s0 + $0x80] sm:$0xf] }
   0xa   :  { %v546_v14 = vld [vmem:[%s890_s0 + $0x74] sm:$0xf]  ;;  %v549_v15 = vld [vmem:[%s890_s0 + $0x68] sm:$0xf]  ;;  %84 = vst [vmem:[#allocation0 + $0x100] sm:$0xf] %v543_v13 }
   0xb   :  { %99 = vst [vmem:[#allocation0 + $0xe8] sm:$0xf] %v546_v14  ;;  %114 = vst [vmem:[#allocation0 + $0xd0] sm:$0xf] %v549_v15  ;;  %v529_v16 = vld [vmem:[%s890_s0 + $0xb8] sm:$0xf] }
   0xc   :  { %v532_v17 = vld [vmem:[%s890_s0 + $0xac] sm:$0xf]  ;;  %v535_v18 = vld [vmem:[%s890_s0 + $0xa0] sm:$0xf]  ;;  %14 = vst [vmem:[#allocation0 + $0x170] sm:$0xf] %v529_v16 }
   0xd   :  { %29 = vst [vmem:[#allocation0 + $0x158] sm:$0xf] %v532_v17  ;;  %44 = vst [vmem:[#allocation0 + $0x140] sm:$0xf] %v535_v18  ;;  %v538_v19 = vld [vmem:[%s890_s0 + $0x94] sm:$0xf] }
   0xe   :  { %v541_v20 = vld [vmem:[%s890_s0 + $0x88] sm:$0xf]  ;;  %v544_v21 = vld [vmem:[%s890_s0 + $0x7c] sm:$0xf]  ;;  %59 = vst [vmem:[#allocation0 + $0x128] sm:$0xf] %v538_v19 }
   0xf   :  { %74 = vst [vmem:[#allocation0 + $0x110] sm:$0xf] %v541_v20  ;;  %89 = vst [vmem:[#allocation0 + $0xf8] sm:$0xf] %v544_v21  ;;  %v547_v22 = vld [vmem:[%s890_s0 + $0x70] sm:$0xf] }
  0x10   :  { %v550_v23 = vld [vmem:[%s890_s0 + $0x64] sm:$0xf]  ;;  %v553_v24 = vld [vmem:[%s890_s0 + $0x58] sm:$0xf]  ;;  %104 = vst [vmem:[#allocation0 + $0xe0] sm:$0xf] %v547_v22 }
  0x11   :  { %v359_v25 = vld [vmem:[#allocation0 + $0x10] ss:$24 sm:$0xf0]   ;;  %v338_v26 = vld [vmem:[#allocation0 + $0x11] ss:$24 sm:$0xf0]  }
  0x12   :  { %119 = vst [vmem:[#allocation0 + $0xc8] sm:$0xf] %v550_v23  ;;  %134 = vst [vmem:[#allocation0 + $0xb0] sm:$0xf] %v553_v24  ;;  %v556_v31 = vld [vmem:[%s890_s0 + $0x4c] sm:$0xf] }
  0x13   :  { %v357_v27 = vld [vmem:[#allocation0 + $0x10] ss:$24 sm:$0xf]   ;;  %v336_v28 = vld [vmem:[#allocation0 + $0x11] ss:$24 sm:$0xf]  }
  0x14   :  { %v361_v29 = vsel %vm339_vm0, %v359_v25, %v357_v27  ;;  %v340_v30 = vsel %vm339_vm0, %v338_v26, %v336_v28  ;;  %v559_v32 = vld [vmem:[%s890_s0 + $0x40] sm:$0xf]  ;;  %v562_v33 = vld [vmem:[%s890_s0 + $0x34] sm:$0xf]  ;;  %149 = vst [vmem:[#allocation0 + $0x98] sm:$0xf] %v556_v31 }
  0x15   :  { %362 = vrot.lane.b32.xlu1 %v361_v29, %s604_s4  ;;  %341 = vrot.lane.b32.xlu0 %v340_v30, %s605_s5  ;;  %v369_v34 = vld [vmem:[#allocation0 + $0xd0] ss:$24 sm:$0xf0]   ;;  %v348_v35 = vld [vmem:[#allocation0 + $0xd1] ss:$24 sm:$0xf0]  }
  0x16   :  { %164 = vst [vmem:[#allocation0 + $0x80] sm:$0xf] %v559_v32  ;;  %179 = vst [vmem:[#allocation0 + $0x68] sm:$0xf] %v562_v33  ;;  %v565_v40 = vld [vmem:[%s890_s0 + $0x28] sm:$0xf] }
  0x17   :  { %v367_v36 = vld [vmem:[#allocation0 + $0xd0] ss:$24 sm:$0xf]   ;;  %v346_v37 = vld [vmem:[#allocation0 + $0xd1] ss:$24 sm:$0xf]  }
  0x18   :  { %v371_v38 = vsel %vm339_vm0, %v369_v34, %v367_v36  ;;  %v350_v39 = vsel %vm339_vm0, %v348_v35, %v346_v37  ;;  %v568_v41 = vld [vmem:[%s890_s0 + $0x1c] sm:$0xf]  ;;  %v571_v42 = vld [vmem:[%s890_s0 + $0x10] sm:$0xf]  ;;  %194 = vst [vmem:[#allocation0 + $0x50] sm:$0xf] %v565_v40 }
  0x19   :  { %v390_v43 = vld [vmem:[#allocation0 + $0xca] ss:$24 sm:$0xf0]   ;;  %209 = vst [vmem:[#allocation0 + $0x38] sm:$0xf] %v568_v41  ;;  %372 = vrot.lane.b32.xlu1 %v371_v38, %s604_s4  ;;  %351 = vrot.lane.b32.xlu0 %v350_v39, %s605_s5  ;;  %s606_s16 = smov 80  }
  0x1a   :  { %224 = vst [vmem:[#allocation0 + $0x20] sm:$0xf] %v571_v42  ;;  %v574_v44 = vld [vmem:[%s890_s0 + $0x4] sm:$0xf]  ;;  %v530_v47 = vld [vmem:[%s890_s0 + $0xb4] sm:$0xf] }
  0x1b   :  { %v388_v45 = vld [vmem:[#allocation0 + $0xca] ss:$24 sm:$0xf]   ;;  %238 = vst [vmem:[#allocation0 + $0x8] sm:$0xf] %v574_v44  ;;  %s607_s2 = smov 64  }
  0x1c   :  { %v392_v46 = vsel %vm339_vm0, %v390_v43, %v388_v45  ;;  %v409_v48 = vld [vmem:[#allocation0 + $0xc9] ss:$24 sm:$0xf]   ;;  %19 = vst [vmem:[#allocation0 + $0x168] sm:$0xf] %v530_v47  ;;  %s246_s19 = smov 3 }
  0x1d   :  { %v411_v49 = vld [vmem:[#allocation0 + $0xc9] ss:$24 sm:$0xf0]   ;;  %393 = vrot.lane.b32.xlu1 %v392_v46, %s606_s16  ;;  %v380_v50 = vld [vmem:[#allocation0 + $0xa] ss:$24 sm:$0xf0]  }
  0x1e   :  { %v430_v51 = vld [vmem:[#allocation0 + $0xc8] ss:$24 sm:$0xf]   ;;  %v413_v54 = vsel %vm339_vm0, %v411_v49, %v409_v48  ;;  %v401_v55 = vld [vmem:[#allocation0 + $0x9] ss:$24 sm:$0xf0]  }
  0x1f   :  { %v432_v52 = vld [vmem:[#allocation0 + $0xc8] ss:$24 sm:$0xf0]   ;;  %v536_v56 = vld [vmem:[%s890_s0 + $0x9c] sm:$0xf]  ;;  %s608_s20 = smov 48  }
  0x20   :  { %v533_v53 = vld [vmem:[%s890_s0 + $0xa8] sm:$0xf]  ;;  %v539_v57 = vld [vmem:[%s890_s0 + $0x90] sm:$0xf]  ;;  %v542_v58 = vld [vmem:[%s890_s0 + $0x84] sm:$0xf]  ;;  %v434_v2 = vsel %vm339_vm0, %v432_v52, %v430_v51 }
  0x21   :  { %34 = vst [vmem:[#allocation0 + $0x150] sm:$0xf] %v533_v53  ;;  %49 = vst [vmem:[#allocation0 + $0x138] sm:$0xf] %v536_v56  ;;  %v545_v59 = vld [vmem:[%s890_s0 + $0x78] sm:$0xf]  ;;  %414 = vrot.lane.b32.xlu1 %v413_v54, %s607_s2 }
  0x22   :  { %64 = vst [vmem:[#allocation0 + $0x120] sm:$0xf] %v539_v57  ;;  %79 = vst [vmem:[#allocation0 + $0x108] sm:$0xf] %v542_v58  ;;  %v548_v60 = vld [vmem:[%s890_s0 + $0x6c] sm:$0xf] }
  0x23   :  { %v551_v61 = vld [vmem:[%s890_s0 + $0x60] sm:$0xf]  ;;  %94 = vst [vmem:[#allocation0 + $0xf0] sm:$0xf] %v545_v59  ;;  %109 = vst [vmem:[#allocation0 + $0xd8] sm:$0xf] %v548_v60 }
  0x24   :  { %v378_v62 = vld [vmem:[#allocation0 + $0xa] ss:$24 sm:$0xf]   ;;  %v399_v63 = vld [vmem:[#allocation0 + $0x9] ss:$24 sm:$0xf]  }
  0x25   :  { %124 = vst [vmem:[#allocation0 + $0xc0] sm:$0xf] %v551_v61  ;;  %v382_v0 = vsel %vm339_vm0, %v380_v50, %v378_v62  ;;  %v554_v1 = vld [vmem:[%s890_s0 + $0x54] sm:$0xf]  ;;  %v557_v5 = vld [vmem:[%s890_s0 + $0x48] sm:$0xf]  ;;  %v403_v8 = vsel %vm339_vm0, %v401_v55, %v399_v63  ;;  %435 = vrot.lane.b32.xlu1 %v434_v2, %s608_s20 }
  0x26   :  { %383 = vrot.lane.b32.xlu0 %v382_v0, %s606_s16  ;;  %v420_v3 = vld [vmem:[#allocation0 + $0x8] ss:$24 sm:$0xf]   ;;  %139 = vst [vmem:[#allocation0 + $0xa8] sm:$0xf] %v554_v1  ;;  %s252_s21 = smov 3 }
  0x27   :  { %v422_v4 = vld [vmem:[#allocation0 + $0x8] ss:$24 sm:$0xf0]   ;;  %v560_v6 = vld [vmem:[%s890_s0 + $0x3c] sm:$0xf]  ;;  %s258_s22 = smov 3 }
  0x28   :  { %v563_v7 = vld [vmem:[%s890_s0 + $0x30] sm:$0xf]  ;;  %154 = vst [vmem:[#allocation0 + $0x90] sm:$0xf] %v557_v5  ;;  %169 = vst [vmem:[#allocation0 + $0x78] sm:$0xf] %v560_v6  ;;  %v424_v15 = vsel %vm339_vm0, %v422_v4, %v420_v3 }
  0x29   :  { %184 = vst [vmem:[#allocation0 + $0x60] sm:$0xf] %v563_v7  ;;  %v566_v9 = vld [vmem:[%s890_s0 + $0x24] sm:$0xf]  ;;  %v569_v10 = vld [vmem:[%s890_s0 + $0x18] sm:$0xf] }
  0x2a   :  { %v572_v11 = vld [vmem:[%s890_s0 + $0xc] sm:$0xf]  ;;  %199 = vst [vmem:[#allocation0 + $0x48] sm:$0xf] %v566_v9  ;;  %214 = vst [vmem:[#allocation0 + $0x30] sm:$0xf] %v569_v10  ;;  %404 = vrot.lane.b32.xlu0 %v403_v8, %s607_s2 }
  0x2b   :  { %229 = vst [vmem:[#allocation0 + $0x18] sm:$0xf] %v572_v11  ;;  %v239_v12 = vld [vmem:[%s890_s0] sm:$0xf]  ;;  %s774_s0 = smov 3  ;;  %s264_s23 = smov 3 }
  0x2c   :  { %240 = vst [vmem:[#allocation0] sm:$0xf] %v239_v12  ;;  %v453_v13 = vld [vmem:[#allocation0 + $0xc2] ss:$24 sm:$0xf0]   ;;  %s270_s24 = smov 3 }
  0x2d   :  { %v474_v14 = vld [vmem:[#allocation0 + $0xc1] ss:$24 sm:$0xf0]   ;;  %v451_v16 = vld [vmem:[#allocation0 + $0xc2] ss:$24 sm:$0xf]  }
  0x2e   :  { %v472_v17 = vld [vmem:[#allocation0 + $0xc1] ss:$24 sm:$0xf]   ;;  %v455_v18 = vsel %vm339_vm0, %v453_v13, %v451_v16  ;;  %s609_s25 = smov 32   ;;  %s276_s26 = smov 3  ;;  %425 = vrot.lane.b32.xlu0 %v424_v15, %s608_s20  ;;  %vm385_vm4 = vcmask 786048  }
  0x2f   :  { %456 = vrot.lane.b32.xlu1 %v455_v18, %s609_s25  ;;  %s282_s27 = smov 3  ;;  %v476_v20 = vsel %vm339_vm0, %v474_v14, %v472_v17  ;;  %s610_s5 = smov 16   ;;  %v271_v30 = vld [vmem:[#allocation0 + $0x78] ss:$18 sm:%s270_s24]   ;;  %vm406_vm5 = vcmask 654848   ;;  %vm427_vm6 = vcmask 523648  }
  0x30   :  { %v443_v19 = vld [vmem:[#allocation0 + $0x2] ss:$24 sm:$0xf0]   ;;  %v464_v21 = vld [vmem:[#allocation0 + $0x1] ss:$24 sm:$0xf0]  }
  0x31   :  { %v253_v23 = vld [vmem:[#allocation0 + $0x30] ss:$18 sm:%s252_s21]   ;;  %v265_v29 = vld [vmem:[#allocation0 + $0x60] ss:$18 sm:%s264_s23]   ;;  %s288_s12 = smov 3  ;;  %s294_s13 = smov 3 }
  0x32   :  { %v247_v22 = vld [vmem:[#allocation0 + $0x18] ss:$18 sm:%s246_s19]   ;;  %v259_v24 = vld [vmem:[#allocation0 + $0x48] ss:$18 sm:%s258_s22]   ;;  %s300_s18 = smov 3  ;;  %s312_s23 = smov 3 }
  0x33   :  { %v441_v25 = vld [vmem:[#allocation0 + $0x2] ss:$24 sm:$0xf]   ;;  %v462_v26 = vld [vmem:[#allocation0 + $0x1] ss:$24 sm:$0xf]   ;;  %477 = vrot.lane.b32.xlu1 %v476_v20, %s610_s5 }
  0x34   :  { %575 = vst.msk [vmem:[%s891_s1 + $0x1] ss:$8 sm:$0x3] %vm243_vm1, %v247_v22   ;;  %576 = vst.msk [vmem:[%s891_s1 + $0x2] ss:$8 sm:$0x3] %vm243_vm1, %v253_v23   ;;  %v445_v27 = vsel %vm339_vm0, %v443_v19, %v441_v25  ;;  %v466_v33 = vsel %vm339_vm0, %v464_v21, %v462_v26 }
  0x35   :  { %577 = vst.msk [vmem:[%s891_s1 + $0x3] ss:$8 sm:$0x3] %vm243_vm1, %v259_v24   ;;  %v242_v28 = vld [vmem:[#allocation0] ss:$18 sm:%s774_s0]   ;;  %446 = vrot.lane.b32.xlu0 %v445_v27, %s609_s25  ;;  %s306_s0 = smov 3 }
  0x36   :  { %244 = vst.msk [vmem:[%s891_s1] ss:$8 sm:$0x3] %vm243_vm1, %v242_v28   ;;  %578 = vst.msk [vmem:[%s891_s1 + $0x4] ss:$8 sm:$0x3] %vm243_vm1, %v265_v29  }
  0x37   :  { %579 = vst.msk [vmem:[%s891_s1 + $0x5] ss:$8 sm:$0x3] %vm243_vm1, %v271_v30   ;;  %v277_v31 = vld [vmem:[#allocation0 + $0x90] ss:$18 sm:%s276_s26]   ;;  %s318_s24 = smov 3 }
  0x38   :  { %v283_v32 = vld [vmem:[#allocation0 + $0xa8] ss:$18 sm:%s282_s27]   ;;  %580 = vst.msk [vmem:[%s891_s1 + $0x6] ss:$8 sm:$0x3] %vm243_vm1, %v277_v31   ;;  %s324_s29 = smov 3 }
  0x39   :  { %581 = vst.msk [vmem:[%s891_s1 + $0x7] ss:$8 sm:$0x3] %vm243_vm1, %v283_v32   ;;  %v289_v34 = vld [vmem:[#allocation0 + $0xc0] ss:$18 sm:%s288_s12]   ;;  %s330_s30 = smov 3  ;;  %467 = vrot.lane.b32.xlu0 %v466_v33, %s610_s5 }
  0x3a   :  { %v295_v35 = vld [vmem:[#allocation0 + $0xd8] ss:$18 sm:%s294_s13]   ;;  %582 = vst.msk [vmem:[%s891_s1 + $0x10] ss:$8 sm:$0x3] %vm243_vm1, %v289_v34   ;;  %vm448_vm7 = vcmask 392448  }
  0x3b   :  { %583 = vst.msk [vmem:[%s891_s1 + $0x11] ss:$8 sm:$0x3] %vm243_vm1, %v295_v35   ;;  %v301_v36 = vld [vmem:[#allocation0 + $0xf0] ss:$18 sm:%s300_s18]   ;;  %vm469_vm8 = vcmask 261248  }
  0x3c   :  { %v307_v37 = vld [vmem:[#allocation0 + $0x108] ss:$18 sm:%s306_s0]   ;;  %584 = vst.msk [vmem:[%s891_s1 + $0x12] ss:$8 sm:$0x3] %vm243_vm1, %v301_v36  }
  0x3d   :  { %585 = vst.msk [vmem:[%s891_s1 + $0x13] ss:$8 sm:$0x3] %vm243_vm1, %v307_v37   ;;  %v319_v38 = vld [vmem:[#allocation0 + $0x138] ss:$18 sm:%s318_s24]  }
  0x3e   :  { %v313_v39 = vld [vmem:[#allocation0 + $0x120] ss:$18 sm:%s312_s23]   ;;  %587 = vst.msk [vmem:[%s891_s1 + $0x15] ss:$8 sm:$0x3] %vm243_vm1, %v319_v38  }
  0x3f   :  { %v325_v40 = vld [vmem:[#allocation0 + $0x150] ss:$18 sm:%s324_s29]   ;;  %586 = vst.msk [vmem:[%s891_s1 + $0x14] ss:$8 sm:$0x3] %vm243_vm1, %v313_v39  }
  0x40   :  { %v331_v41 = vld [vmem:[#allocation0 + $0x168] ss:$18 sm:%s330_s30]   ;;  %588 = vst.msk [vmem:[%s891_s1 + $0x16] ss:$8 sm:$0x3] %vm243_vm1, %v325_v40  }
  0x41   :  { %589 = vst.msk [vmem:[%s891_s1 + $0x17] ss:$8 sm:$0x3] %vm243_vm1, %v331_v41  }
  0x87   :  { %v363_v42 = vpop.permute.xlu1 %362   ;;  %v342_v43 = vpop.permute.xlu0 %341  }
  0x88   :  { %344 = vst.msk [vmem:[%s891_s1] sm:$0xff] %vm343_vm2, %v342_v43  }
  0x89   :  { %365 = vst.msk [vmem:[%s891_s1] sm:$0xff] %vm364_vm3, %v363_v42  }
  0x8b   :  { %v373_v44 = vpop.permute.xlu1 %372   ;;  %v352_v45 = vpop.permute.xlu0 %351  }
  0x8c   :  { %590 = vst.msk [vmem:[%s891_s1 + $0x10] sm:$0xff] %vm343_vm2, %v352_v45  }
  0x8d   :  { %591 = vst.msk [vmem:[%s891_s1 + $0x10] sm:$0xff] %vm364_vm3, %v373_v44  }
  0x8f   :  { %v394_v46 = vpop.permute.xlu1 %393  }
  0x90   :  { %592 = vst.msk [vmem:[%s891_s1 + $0x10] sm:$0xff] %vm385_vm4, %v394_v46  }
  0x93   :  { %v415_v47 = vpop.permute.xlu1 %414  }
  0x94   :  { %593 = vst.msk [vmem:[%s891_s1 + $0x10] sm:$0xff] %vm406_vm5, %v415_v47  }
  0x97   :  { %v436_v49 = vpop.permute.xlu1 %435  }
  0x98   :  { %v384_v48 = vpop.permute.xlu0 %383   ;;  %594 = vst.msk [vmem:[%s891_s1 + $0x10] sm:$0xff] %vm427_vm6, %v436_v49  }
  0x99   :  { %386 = vst.msk [vmem:[%s891_s1] sm:$0xff] %vm385_vm4, %v384_v48  }
  0x9c   :  { %v405_v50 = vpop.permute.xlu0 %404  }
  0x9d   :  { %407 = vst.msk [vmem:[%s891_s1] sm:$0xff] %vm406_vm5, %v405_v50  }
  0xa0   :  { %v426_v52 = vpop.permute.xlu0 %425  }
  0xa1   :  { %v457_v51 = vpop.permute.xlu1 %456   ;;  %428 = vst.msk [vmem:[%s891_s1] sm:$0xff] %vm427_vm6, %v426_v52  }
  0xa2   :  { %595 = vst.msk [vmem:[%s891_s1 + $0x10] sm:$0xff] %vm448_vm7, %v457_v51  }
  0xa5   :  { %v478_v53 = vpop.permute.xlu1 %477  }
  0xa6   :  { %596 = vst.msk [vmem:[%s891_s1 + $0x10] sm:$0xff] %vm469_vm8, %v478_v53  }
  0xa7   :  { %v447_v54 = vpop.permute.xlu0 %446  }
  0xa8   :  { %449 = vst.msk [vmem:[%s891_s1] sm:$0xff] %vm448_vm7, %v447_v54  }
  0xab   :  { %v468_v55 = vpop.permute.xlu0 %467  }
  0xac   :  { %470 = vst.msk [vmem:[%s891_s1] sm:$0xff] %vm469_vm8, %v468_v55  }

// kernel: gymn_forward.5
= control target key start
LH: loop header
LB: loop body
LE: loop exit
PB: predicated region body
PF: predicated region fallthrough
CT: control target
= control target key end

     0   :  { %s2574_s12 = smov 0   ;;  %s2576_s13 = smov 0   ;;  %s3272_s0 = inlined_call_operand.vmem [shape: bf16[576,1024], index: 0, kind: input, shape index: {}]   ;;  %s3273_s1 = inlined_call_operand.vmem [shape: bf16[64,576], index: 1, kind: input, shape index: {}]   ;;  %s3274_s2 = inlined_call_operand.vmem [shape: f32[16,1], index: 2, kind: input, shape index: {}]   ;;  %s3275_s3 = inlined_call_operand.vmem [shape: f32[16,1024], index: 3, kind: output, shape index: {}]  }
   0x1   :  { %s2578_s14 = smov 0  }
   0x2 LB: > { %s2070_s15 = sadd.s32 4294967295, %s2551_s14   ;;  %s2591_s16 = sadd.s32 1, %s2551_s14   ;;  %s2551_s14 = sphi %s2578_s14, %s3279_s14   ;;  %s2547_s13 = sphi %s2576_s13, %s3278_s13   ;;  %s2543_s12 = sphi %s2574_s12, %s3277_s12  }
   0x3   : > { %s17_s17 = ssub.s32 %s2551_s14, %s2591_s16  ;;  %s20_s18 = sadd.s32 1, %s2547_s13 }
   0x4   : > { %p18_p0 = scmp.eq.s32.totalorder %s17_s17, 0  ;;  %p27_p1 = scmp.ne.s32.totalorder %s2547_s13, %s2543_s12 }
   0x5   : > { %p28_p2 = scmp.eq.s32.totalorder %s2551_s14, 0  ;;  %p99_p3 = scmp.eq.s32.totalorder %s2070_s15, 1 }
   0x6   : > { %s2602_s19 = scalar_select %p18_p0, %s2547_s13, %s20_s18  }
   0x7   : > { %p29_p4 = por %p28_p2, %p27_p1  ;;  %p2604_p5 = por %p99_p3, %p27_p1 }
   0x8   : > { %p2073_p6 = scmp.ge.s32.totalorder %s2551_s14, 2 }
   0xa   : > { %127 = sbr.rel (%p2073_p6) target bundleno = 91 (0x5b), region = 24 }
   0xf   : > { %130 = sbr.rel (!%p29_p4) target bundleno = 91 (0x5b), region = 28  ;;  %s132_s21 = sand.u32 (%p29_p4), 1, %s2547_s13  }
  0x10   : > { %s2255_s22 = sshll.u32 (%p29_p4), %s2551_s14, 4  ;;  %s2257_s23 = smul.u32 (%p29_p4), 1152, %s132_s21 }
  0x11   : > { %s2614_s26 = scalar_lea.vmem (%p29_p4), %s3272_s0, %s2255_s22 }
  0x12   : > { %v150_v0 = vld [vmem:[%s2614_s26] sm:$0xff] (%p29_p4)  ;;  %v152_v1 = vld [vmem:[%s2614_s26 + $0x8] sm:$0xff] (%p29_p4)  ;;  %s2622_s27 = scalar_lea.vmem (%p29_p4), [#allocation2], %s2257_s23 }
  0x13   : > { %v154_v2 = vld [vmem:[%s2614_s26 + $0x20] sm:$0xff] (%p29_p4)  ;;  %v156_v3 = vld [vmem:[%s2614_s26 + $0x28] sm:$0xff] (%p29_p4)  ;;  %151 = vst [vmem:[%s2622_s27] sm:$0xff] (%p29_p4), %v150_v0  ;;  %153 = vst [vmem:[%s2622_s27 + $0x8] sm:$0xff] (%p29_p4), %v152_v1 }
  0x14   : > { %v158_v4 = vld [vmem:[%s2614_s26 + $0x40] sm:$0xff]  ;;  %v160_v5 = vld [vmem:[%s2614_s26 + $0x48] sm:$0xff]  ;;  %155 = vst [vmem:[%s2622_s27 + $0x10] sm:$0xff] %v154_v2  ;;  %157 = vst [vmem:[%s2622_s27 + $0x18] sm:$0xff] %v156_v3 }
  0x15   : > { %159 = vst [vmem:[%s2622_s27 + $0x20] sm:$0xff] %v158_v4  ;;  %161 = vst [vmem:[%s2622_s27 + $0x28] sm:$0xff] %v160_v5  ;;  %v162_v6 = vld [vmem:[%s2614_s26 + $0x60] sm:$0xff]  ;;  %v164_v7 = vld [vmem:[%s2614_s26 + $0x68] sm:$0xff] }
  0x16   : > { %v166_v8 = vld [vmem:[%s2614_s26 + $0x80] sm:$0xff]  ;;  %163 = vst [vmem:[%s2622_s27 + $0x30] sm:$0xff] %v162_v6  ;;  %165 = vst [vmem:[%s2622_s27 + $0x38] sm:$0xff] %v164_v7  ;;  %v168_v9 = vld [vmem:[%s2614_s26 + $0x88] sm:$0xff] }
  0x17   : > { %167 = vst [vmem:[%s2622_s27 + $0x40] sm:$0xff] %v166_v8  ;;  %v170_v10 = vld [vmem:[%s2614_s26 + $0xa0] sm:$0xff]  ;;  %v172_v11 = vld [vmem:[%s2614_s26 + $0xa8] sm:$0xff]  ;;  %169 = vst [vmem:[%s2622_s27 + $0x48] sm:$0xff] %v168_v9 }
  0x18   : > { %171 = vst [vmem:[%s2622_s27 + $0x50] sm:$0xff] %v170_v10  ;;  %173 = vst [vmem:[%s2622_s27 + $0x58] sm:$0xff] %v172_v11  ;;  %v174_v12 = vld [vmem:[%s2614_s26 + $0xc0] sm:$0xff]  ;;  %v176_v13 = vld [vmem:[%s2614_s26 + $0xc8] sm:$0xff] }
  0x19   : > { %v178_v14 = vld [vmem:[%s2614_s26 + $0xe0] sm:$0xff]  ;;  %175 = vst [vmem:[%s2622_s27 + $0x60] sm:$0xff] %v174_v12  ;;  %177 = vst [vmem:[%s2622_s27 + $0x68] sm:$0xff] %v176_v13  ;;  %v180_v15 = vld [vmem:[%s2614_s26 + $0xe8] sm:$0xff] }
  0x1a   : > { %179 = vst [vmem:[%s2622_s27 + $0x70] sm:$0xff] %v178_v14  ;;  %v182_v16 = vld [vmem:[%s2614_s26 + $0x100] sm:$0xff]  ;;  %v184_v17 = vld [vmem:[%s2614_s26 + $0x108] sm:$0xff]  ;;  %181 = vst [vmem:[%s2622_s27 + $0x78] sm:$0xff] %v180_v15 }
  0x1b   : > { %183 = vst [vmem:[%s2622_s27 + $0x80] sm:$0xff] %v182_v16  ;;  %185 = vst [vmem:[%s2622_s27 + $0x88] sm:$0xff] %v184_v17  ;;  %v186_v18 = vld [vmem:[%s2614_s26 + $0x120] sm:$0xff]  ;;  %v188_v19 = vld [vmem:[%s2614_s26 + $0x128] sm:$0xff] }
  0x1c   : > { %v190_v20 = vld [vmem:[%s2614_s26 + $0x140] sm:$0xff]  ;;  %187 = vst [vmem:[%s2622_s27 + $0x90] sm:$0xff] %v186_v18  ;;  %189 = vst [vmem:[%s2622_s27 + $0x98] sm:$0xff] %v188_v19  ;;  %v192_v21 = vld [vmem:[%s2614_s26 + $0x148] sm:$0xff] }
  0x1d   : > { %191 = vst [vmem:[%s2622_s27 + $0xa0] sm:$0xff] %v190_v20  ;;  %v194_v22 = vld [vmem:[%s2614_s26 + $0x160] sm:$0xff]  ;;  %v196_v23 = vld [vmem:[%s2614_s26 + $0x168] sm:$0xff]  ;;  %193 = vst [vmem:[%s2622_s27 + $0xa8] sm:$0xff] %v192_v21 }
  0x1e   : > { %195 = vst [vmem:[%s2622_s27 + $0xb0] sm:$0xff] %v194_v22  ;;  %197 = vst [vmem:[%s2622_s27 + $0xb8] sm:$0xff] %v196_v23  ;;  %v198_v24 = vld [vmem:[%s2614_s26 + $0x180] sm:$0xff]  ;;  %v200_v25 = vld [vmem:[%s2614_s26 + $0x188] sm:$0xff] }
  0x1f   : > { %v202_v26 = vld [vmem:[%s2614_s26 + $0x1a0] sm:$0xff]  ;;  %199 = vst [vmem:[%s2622_s27 + $0xc0] sm:$0xff] %v198_v24  ;;  %201 = vst [vmem:[%s2622_s27 + $0xc8] sm:$0xff] %v200_v25  ;;  %v204_v27 = vld [vmem:[%s2614_s26 + $0x1a8] sm:$0xff] }
  0x20   : > { %203 = vst [vmem:[%s2622_s27 + $0xd0] sm:$0xff] %v202_v26  ;;  %v206_v28 = vld [vmem:[%s2614_s26 + $0x1c0] sm:$0xff]  ;;  %v208_v29 = vld [vmem:[%s2614_s26 + $0x1c8] sm:$0xff]  ;;  %205 = vst [vmem:[%s2622_s27 + $0xd8] sm:$0xff] %v204_v27 }
  0x21   : > { %207 = vst [vmem:[%s2622_s27 + $0xe0] sm:$0xff] %v206_v28  ;;  %209 = vst [vmem:[%s2622_s27 + $0xe8] sm:$0xff] %v208_v29  ;;  %v210_v30 = vld [vmem:[%s2614_s26 + $0x1e0] sm:$0xff]  ;;  %v212_v31 = vld [vmem:[%s2614_s26 + $0x1e8] sm:$0xff] }
  0x22   : > { %v214_v32 = vld [vmem:[%s2614_s26 + $0x200] sm:$0xff]  ;;  %211 = vst [vmem:[%s2622_s27 + $0xf0] sm:$0xff] %v210_v30  ;;  %213 = vst [vmem:[%s2622_s27 + $0xf8] sm:$0xff] %v212_v31  ;;  %v216_v33 = vld [vmem:[%s2614_s26 + $0x208] sm:$0xff] }
  0x23   : > { %215 = vst [vmem:[%s2622_s27 + $0x100] sm:$0xff] %v214_v32  ;;  %v218_v34 = vld [vmem:[%s2614_s26 + $0x220] sm:$0xff]  ;;  %v220_v35 = vld [vmem:[%s2614_s26 + $0x228] sm:$0xff]  ;;  %217 = vst [vmem:[%s2622_s27 + $0x108] sm:$0xff] %v216_v33 }
  0x24   : > { %219 = vst [vmem:[%s2622_s27 + $0x110] sm:$0xff] %v218_v34  ;;  %221 = vst [vmem:[%s2622_s27 + $0x118] sm:$0xff] %v220_v35  ;;  %v222_v36 = vld [vmem:[%s2614_s26 + $0x240] sm:$0xff]  ;;  %v224_v37 = vld [vmem:[%s2614_s26 + $0x248] sm:$0xff] }
  0x25   : > { %v226_v38 = vld [vmem:[%s2614_s26 + $0x260] sm:$0xff]  ;;  %223 = vst [vmem:[%s2622_s27 + $0x120] sm:$0xff] %v222_v36  ;;  %225 = vst [vmem:[%s2622_s27 + $0x128] sm:$0xff] %v224_v37  ;;  %v228_v39 = vld [vmem:[%s2614_s26 + $0x268] sm:$0xff] }
  0x26   : > { %227 = vst [vmem:[%s2622_s27 + $0x130] sm:$0xff] %v226_v38  ;;  %v230_v40 = vld [vmem:[%s2614_s26 + $0x280] sm:$0xff]  ;;  %v232_v41 = vld [vmem:[%s2614_s26 + $0x288] sm:$0xff]  ;;  %229 = vst [vmem:[%s2622_s27 + $0x138] sm:$0xff] %v228_v39 }
  0x27   : > { %231 = vst [vmem:[%s2622_s27 + $0x140] sm:$0xff] %v230_v40  ;;  %233 = vst [vmem:[%s2622_s27 + $0x148] sm:$0xff] %v232_v41  ;;  %v234_v42 = vld [vmem:[%s2614_s26 + $0x2a0] sm:$0xff]  ;;  %v236_v43 = vld [vmem:[%s2614_s26 + $0x2a8] sm:$0xff] }
  0x28   : > { %v238_v44 = vld [vmem:[%s2614_s26 + $0x2c0] sm:$0xff]  ;;  %235 = vst [vmem:[%s2622_s27 + $0x150] sm:$0xff] %v234_v42  ;;  %237 = vst [vmem:[%s2622_s27 + $0x158] sm:$0xff] %v236_v43  ;;  %v240_v45 = vld [vmem:[%s2614_s26 + $0x2c8] sm:$0xff] }
  0x29   : > { %239 = vst [vmem:[%s2622_s27 + $0x160] sm:$0xff] %v238_v44  ;;  %v242_v46 = vld [vmem:[%s2614_s26 + $0x2e0] sm:$0xff]  ;;  %v244_v47 = vld [vmem:[%s2614_s26 + $0x2e8] sm:$0xff]  ;;  %241 = vst [vmem:[%s2622_s27 + $0x168] sm:$0xff] %v240_v45 }
  0x2a   : > { %243 = vst [vmem:[%s2622_s27 + $0x170] sm:$0xff] %v242_v46  ;;  %245 = vst [vmem:[%s2622_s27 + $0x178] sm:$0xff] %v244_v47  ;;  %v246_v48 = vld [vmem:[%s2614_s26 + $0x300] sm:$0xff]  ;;  %v248_v49 = vld [vmem:[%s2614_s26 + $0x308] sm:$0xff] }
  0x2b   : > { %v250_v50 = vld [vmem:[%s2614_s26 + $0x320] sm:$0xff]  ;;  %247 = vst [vmem:[%s2622_s27 + $0x180] sm:$0xff] %v246_v48  ;;  %249 = vst [vmem:[%s2622_s27 + $0x188] sm:$0xff] %v248_v49  ;;  %v252_v51 = vld [vmem:[%s2614_s26 + $0x328] sm:$0xff] }
  0x2c   : > { %251 = vst [vmem:[%s2622_s27 + $0x190] sm:$0xff] %v250_v50  ;;  %v254_v52 = vld [vmem:[%s2614_s26 + $0x340] sm:$0xff]  ;;  %v256_v53 = vld [vmem:[%s2614_s26 + $0x348] sm:$0xff]  ;;  %253 = vst [vmem:[%s2622_s27 + $0x198] sm:$0xff] %v252_v51 }
  0x2d   : > { %255 = vst [vmem:[%s2622_s27 + $0x1a0] sm:$0xff] %v254_v52  ;;  %257 = vst [vmem:[%s2622_s27 + $0x1a8] sm:$0xff] %v256_v53  ;;  %v258_v54 = vld [vmem:[%s2614_s26 + $0x360] sm:$0xff]  ;;  %v260_v55 = vld [vmem:[%s2614_s26 + $0x368] sm:$0xff] }
  0x2e   : > { %v262_v56 = vld [vmem:[%s2614_s26 + $0x380] sm:$0xff]  ;;  %259 = vst [vmem:[%s2622_s27 + $0x1b0] sm:$0xff] %v258_v54  ;;  %261 = vst [vmem:[%s2622_s27 + $0x1b8] sm:$0xff] %v260_v55  ;;  %v264_v57 = vld [vmem:[%s2614_s26 + $0x388] sm:$0xff] }
  0x2f   : > { %263 = vst [vmem:[%s2622_s27 + $0x1c0] sm:$0xff] %v262_v56  ;;  %v266_v58 = vld [vmem:[%s2614_s26 + $0x3a0] sm:$0xff]  ;;  %v268_v59 = vld [vmem:[%s2614_s26 + $0x3a8] sm:$0xff]  ;;  %265 = vst [vmem:[%s2622_s27 + $0x1c8] sm:$0xff] %v264_v57 }
  0x30   : > { %267 = vst [vmem:[%s2622_s27 + $0x1d0] sm:$0xff] %v266_v58  ;;  %269 = vst [vmem:[%s2622_s27 + $0x1d8] sm:$0xff] %v268_v59  ;;  %v270_v60 = vld [vmem:[%s2614_s26 + $0x3c0] sm:$0xff]  ;;  %v272_v61 = vld [vmem:[%s2614_s26 + $0x3c8] sm:$0xff] }
  0x31   : > { %v274_v62 = vld [vmem:[%s2614_s26 + $0x3e0] sm:$0xff]  ;;  %271 = vst [vmem:[%s2622_s27 + $0x1e0] sm:$0xff] %v270_v60  ;;  %273 = vst [vmem:[%s2622_s27 + $0x1e8] sm:$0xff] %v272_v61  ;;  %v276_v63 = vld [vmem:[%s2614_s26 + $0x3e8] sm:$0xff] }
  0x32   : > { %275 = vst [vmem:[%s2622_s27 + $0x1f0] sm:$0xff] %v274_v62  ;;  %v278_v0 = vld [vmem:[%s2614_s26 + $0x400] sm:$0xff]  ;;  %v280_v1 = vld [vmem:[%s2614_s26 + $0x408] sm:$0xff]  ;;  %277 = vst [vmem:[%s2622_s27 + $0x1f8] sm:$0xff] %v276_v63 }
  0x33   : > { %279 = vst [vmem:[%s2622_s27 + $0x200] sm:$0xff] %v278_v0  ;;  %281 = vst [vmem:[%s2622_s27 + $0x208] sm:$0xff] %v280_v1  ;;  %v282_v2 = vld [vmem:[%s2614_s26 + $0x420] sm:$0xff]  ;;  %v284_v3 = vld [vmem:[%s2614_s26 + $0x428] sm:$0xff] }
  0x34   : > { %v286_v4 = vld [vmem:[%s2614_s26 + $0x440] sm:$0xff]  ;;  %283 = vst [vmem:[%s2622_s27 + $0x210] sm:$0xff] %v282_v2  ;;  %285 = vst [vmem:[%s2622_s27 + $0x218] sm:$0xff] %v284_v3  ;;  %v288_v5 = vld [vmem:[%s2614_s26 + $0x448] sm:$0xff] }
  0x35   : > { %287 = vst [vmem:[%s2622_s27 + $0x220] sm:$0xff] %v286_v4  ;;  %v290_v6 = vld [vmem:[%s2614_s26 + $0x460] sm:$0xff]  ;;  %v292_v7 = vld [vmem:[%s2614_s26 + $0x468] sm:$0xff]  ;;  %289 = vst [vmem:[%s2622_s27 + $0x228] sm:$0xff] %v288_v5 }
  0x36   : > { %291 = vst [vmem:[%s2622_s27 + $0x230] sm:$0xff] %v290_v6  ;;  %293 = vst [vmem:[%s2622_s27 + $0x238] sm:$0xff] %v292_v7  ;;  %v294_v8 = vld [vmem:[%s2614_s26 + $0x480] sm:$0xff]  ;;  %v296_v9 = vld [vmem:[%s2614_s26 + $0x488] sm:$0xff] }
  0x37   : > { %v298_v10 = vld [vmem:[%s2614_s26 + $0x4a0] sm:$0xff]  ;;  %295 = vst [vmem:[%s2622_s27 + $0x240] sm:$0xff] %v294_v8  ;;  %297 = vst [vmem:[%s2622_s27 + $0x248] sm:$0xff] %v296_v9  ;;  %v300_v11 = vld [vmem:[%s2614_s26 + $0x4a8] sm:$0xff] }
  0x38   : > { %299 = vst [vmem:[%s2622_s27 + $0x250] sm:$0xff] %v298_v10  ;;  %v302_v12 = vld [vmem:[%s2614_s26 + $0x4c0] sm:$0xff]  ;;  %v304_v13 = vld [vmem:[%s2614_s26 + $0x4c8] sm:$0xff]  ;;  %301 = vst [vmem:[%s2622_s27 + $0x258] sm:$0xff] %v300_v11 }
  0x39   : > { %303 = vst [vmem:[%s2622_s27 + $0x260] sm:$0xff] %v302_v12  ;;  %305 = vst [vmem:[%s2622_s27 + $0x268] sm:$0xff] %v304_v13  ;;  %v306_v14 = vld [vmem:[%s2614_s26 + $0x4e0] sm:$0xff]  ;;  %v308_v15 = vld [vmem:[%s2614_s26 + $0x4e8] sm:$0xff] }
  0x3a   : > { %v310_v16 = vld [vmem:[%s2614_s26 + $0x500] sm:$0xff]  ;;  %307 = vst [vmem:[%s2622_s27 + $0x270] sm:$0xff] %v306_v14  ;;  %309 = vst [vmem:[%s2622_s27 + $0x278] sm:$0xff] %v308_v15  ;;  %v312_v17 = vld [vmem:[%s2614_s26 + $0x508] sm:$0xff] }
  0x3b   : > { %311 = vst [vmem:[%s2622_s27 + $0x280] sm:$0xff] %v310_v16  ;;  %v314_v18 = vld [vmem:[%s2614_s26 + $0x520] sm:$0xff]  ;;  %v316_v19 = vld [vmem:[%s2614_s26 + $0x528] sm:$0xff]  ;;  %313 = vst [vmem:[%s2622_s27 + $0x288] sm:$0xff] %v312_v17 }
  0x3c   : > { %315 = vst [vmem:[%s2622_s27 + $0x290] sm:$0xff] %v314_v18  ;;  %317 = vst [vmem:[%s2622_s27 + $0x298] sm:$0xff] %v316_v19  ;;  %v318_v20 = vld [vmem:[%s2614_s26 + $0x540] sm:$0xff]  ;;  %v320_v21 = vld [vmem:[%s2614_s26 + $0x548] sm:$0xff] }
  0x3d   : > { %v322_v22 = vld [vmem:[%s2614_s26 + $0x560] sm:$0xff]  ;;  %319 = vst [vmem:[%s2622_s27 + $0x2a0] sm:$0xff] %v318_v20  ;;  %321 = vst [vmem:[%s2622_s27 + $0x2a8] sm:$0xff] %v320_v21  ;;  %v324_v23 = vld [vmem:[%s2614_s26 + $0x568] sm:$0xff] }
  0x3e   : > { %323 = vst [vmem:[%s2622_s27 + $0x2b0] sm:$0xff] %v322_v22  ;;  %v326_v24 = vld [vmem:[%s2614_s26 + $0x580] sm:$0xff]  ;;  %v328_v25 = vld [vmem:[%s2614_s26 + $0x588] sm:$0xff]  ;;  %325 = vst [vmem:[%s2622_s27 + $0x2b8] sm:$0xff] %v324_v23 }
  0x3f   : > { %327 = vst [vmem:[%s2622_s27 + $0x2c0] sm:$0xff] %v326_v24  ;;  %329 = vst [vmem:[%s2622_s27 + $0x2c8] sm:$0xff] %v328_v25  ;;  %v330_v26 = vld [vmem:[%s2614_s26 + $0x5a0] sm:$0xff]  ;;  %v332_v27 = vld [vmem:[%s2614_s26 + $0x5a8] sm:$0xff] }
  0x40   : > { %v334_v28 = vld [vmem:[%s2614_s26 + $0x5c0] sm:$0xff]  ;;  %331 = vst [vmem:[%s2622_s27 + $0x2d0] sm:$0xff] %v330_v26  ;;  %333 = vst [vmem:[%s2622_s27 + $0x2d8] sm:$0xff] %v332_v27  ;;  %v336_v29 = vld [vmem:[%s2614_s26 + $0x5c8] sm:$0xff] }
  0x41   : > { %335 = vst [vmem:[%s2622_s27 + $0x2e0] sm:$0xff] %v334_v28  ;;  %v338_v30 = vld [vmem:[%s2614_s26 + $0x5e0] sm:$0xff]  ;;  %v340_v31 = vld [vmem:[%s2614_s26 + $0x5e8] sm:$0xff]  ;;  %337 = vst [vmem:[%s2622_s27 + $0x2e8] sm:$0xff] %v336_v29 }
  0x42   : > { %339 = vst [vmem:[%s2622_s27 + $0x2f0] sm:$0xff] %v338_v30  ;;  %341 = vst [vmem:[%s2622_s27 + $0x2f8] sm:$0xff] %v340_v31  ;;  %v342_v32 = vld [vmem:[%s2614_s26 + $0x600] sm:$0xff]  ;;  %v344_v33 = vld [vmem:[%s2614_s26 + $0x608] sm:$0xff] }
  0x43   : > { %v346_v34 = vld [vmem:[%s2614_s26 + $0x620] sm:$0xff]  ;;  %343 = vst [vmem:[%s2622_s27 + $0x300] sm:$0xff] %v342_v32  ;;  %345 = vst [vmem:[%s2622_s27 + $0x308] sm:$0xff] %v344_v33  ;;  %v348_v35 = vld [vmem:[%s2614_s26 + $0x628] sm:$0xff] }
  0x44   : > { %347 = vst [vmem:[%s2622_s27 + $0x310] sm:$0xff] %v346_v34  ;;  %v350_v36 = vld [vmem:[%s2614_s26 + $0x640] sm:$0xff]  ;;  %v352_v37 = vld [vmem:[%s2614_s26 + $0x648] sm:$0xff]  ;;  %349 = vst [vmem:[%s2622_s27 + $0x318] sm:$0xff] %v348_v35 }
  0x45   : > { %351 = vst [vmem:[%s2622_s27 + $0x320] sm:$0xff] %v350_v36  ;;  %353 = vst [vmem:[%s2622_s27 + $0x328] sm:$0xff] %v352_v37  ;;  %v354_v38 = vld [vmem:[%s2614_s26 + $0x660] sm:$0xff]  ;;  %v356_v39 = vld [vmem:[%s2614_s26 + $0x668] sm:$0xff] }
  0x46   : > { %v358_v40 = vld [vmem:[%s2614_s26 + $0x680] sm:$0xff]  ;;  %355 = vst [vmem:[%s2622_s27 + $0x330] sm:$0xff] %v354_v38  ;;  %357 = vst [vmem:[%s2622_s27 + $0x338] sm:$0xff] %v356_v39  ;;  %v360_v41 = vld [vmem:[%s2614_s26 + $0x688] sm:$0xff] }
  0x47   : > { %359 = vst [vmem:[%s2622_s27 + $0x340] sm:$0xff] %v358_v40  ;;  %v362_v42 = vld [vmem:[%s2614_s26 + $0x6a0] sm:$0xff]  ;;  %v364_v43 = vld [vmem:[%s2614_s26 + $0x6a8] sm:$0xff]  ;;  %361 = vst [vmem:[%s2622_s27 + $0x348] sm:$0xff] %v360_v41 }
  0x48   : > { %363 = vst [vmem:[%s2622_s27 + $0x350] sm:$0xff] %v362_v42  ;;  %365 = vst [vmem:[%s2622_s27 + $0x358] sm:$0xff] %v364_v43  ;;  %v366_v44 = vld [vmem:[%s2614_s26 + $0x6c0] sm:$0xff]  ;;  %v368_v45 = vld [vmem:[%s2614_s26 + $0x6c8] sm:$0xff] }
  0x49   : > { %v370_v46 = vld [vmem:[%s2614_s26 + $0x6e0] sm:$0xff]  ;;  %367 = vst [vmem:[%s2622_s27 + $0x360] sm:$0xff] %v366_v44  ;;  %369 = vst [vmem:[%s2622_s27 + $0x368] sm:$0xff] %v368_v45  ;;  %v372_v47 = vld [vmem:[%s2614_s26 + $0x6e8] sm:$0xff] }
  0x4a   : > { %371 = vst [vmem:[%s2622_s27 + $0x370] sm:$0xff] %v370_v46  ;;  %v374_v48 = vld [vmem:[%s2614_s26 + $0x700] sm:$0xff]  ;;  %v376_v49 = vld [vmem:[%s2614_s26 + $0x708] sm:$0xff]  ;;  %373 = vst [vmem:[%s2622_s27 + $0x378] sm:$0xff] %v372_v47 }
  0x4b   : > { %375 = vst [vmem:[%s2622_s27 + $0x380] sm:$0xff] %v374_v48  ;;  %377 = vst [vmem:[%s2622_s27 + $0x388] sm:$0xff] %v376_v49  ;;  %v378_v50 = vld [vmem:[%s2614_s26 + $0x720] sm:$0xff]  ;;  %v380_v51 = vld [vmem:[%s2614_s26 + $0x728] sm:$0xff] }
  0x4c   : > { %v382_v52 = vld [vmem:[%s2614_s26 + $0x740] sm:$0xff]  ;;  %379 = vst [vmem:[%s2622_s27 + $0x390] sm:$0xff] %v378_v50  ;;  %381 = vst [vmem:[%s2622_s27 + $0x398] sm:$0xff] %v380_v51  ;;  %v384_v53 = vld [vmem:[%s2614_s26 + $0x748] sm:$0xff] }
  0x4d   : > { %383 = vst [vmem:[%s2622_s27 + $0x3a0] sm:$0xff] %v382_v52  ;;  %v386_v54 = vld [vmem:[%s2614_s26 + $0x760] sm:$0xff]  ;;  %v388_v55 = vld [vmem:[%s2614_s26 + $0x768] sm:$0xff]  ;;  %385 = vst [vmem:[%s2622_s27 + $0x3a8] sm:$0xff] %v384_v53 }
  0x4e   : > { %387 = vst [vmem:[%s2622_s27 + $0x3b0] sm:$0xff] %v386_v54  ;;  %389 = vst [vmem:[%s2622_s27 + $0x3b8] sm:$0xff] %v388_v55  ;;  %v390_v56 = vld [vmem:[%s2614_s26 + $0x780] sm:$0xff]  ;;  %v392_v57 = vld [vmem:[%s2614_s26 + $0x788] sm:$0xff] }
  0x4f   : > { %v394_v58 = vld [vmem:[%s2614_s26 + $0x7a0] sm:$0xff]  ;;  %391 = vst [vmem:[%s2622_s27 + $0x3c0] sm:$0xff] %v390_v56  ;;  %393 = vst [vmem:[%s2622_s27 + $0x3c8] sm:$0xff] %v392_v57  ;;  %v396_v59 = vld [vmem:[%s2614_s26 + $0x7a8] sm:$0xff] }
  0x50   : > { %395 = vst [vmem:[%s2622_s27 + $0x3d0] sm:$0xff] %v394_v58  ;;  %v398_v60 = vld [vmem:[%s2614_s26 + $0x7c0] sm:$0xff]  ;;  %v400_v61 = vld [vmem:[%s2614_s26 + $0x7c8] sm:$0xff]  ;;  %397 = vst [vmem:[%s2622_s27 + $0x3d8] sm:$0xff] %v396_v59 }
  0x51   : > { %399 = vst [vmem:[%s2622_s27 + $0x3e0] sm:$0xff] %v398_v60  ;;  %401 = vst [vmem:[%s2622_s27 + $0x3e8] sm:$0xff] %v400_v61  ;;  %v402_v62 = vld [vmem:[%s2614_s26 + $0x7e0] sm:$0xff]  ;;  %v404_v63 = vld [vmem:[%s2614_s26 + $0x7e8] sm:$0xff] }
  0x52   : > { %v406_v0 = vld [vmem:[%s2614_s26 + $0x800] sm:$0xff]  ;;  %403 = vst [vmem:[%s2622_s27 + $0x3f0] sm:$0xff] %v402_v62  ;;  %405 = vst [vmem:[%s2622_s27 + $0x3f8] sm:$0xff] %v404_v63  ;;  %v408_v1 = vld [vmem:[%s2614_s26 + $0x808] sm:$0xff] }
  0x53   : > { %407 = vst [vmem:[%s2622_s27 + $0x400] sm:$0xff] %v406_v0  ;;  %v410_v2 = vld [vmem:[%s2614_s26 + $0x820] sm:$0xff]  ;;  %v412_v3 = vld [vmem:[%s2614_s26 + $0x828] sm:$0xff]  ;;  %409 = vst [vmem:[%s2622_s27 + $0x408] sm:$0xff] %v408_v1 }
  0x54   : > { %411 = vst [vmem:[%s2622_s27 + $0x410] sm:$0xff] %v410_v2  ;;  %413 = vst [vmem:[%s2622_s27 + $0x418] sm:$0xff] %v412_v3  ;;  %v414_v4 = vld [vmem:[%s2614_s26 + $0x840] sm:$0xff]  ;;  %v416_v5 = vld [vmem:[%s2614_s26 + $0x848] sm:$0xff] }
  0x55   : > { %v418_v6 = vld [vmem:[%s2614_s26 + $0x860] sm:$0xff]  ;;  %415 = vst [vmem:[%s2622_s27 + $0x420] sm:$0xff] %v414_v4  ;;  %417 = vst [vmem:[%s2622_s27 + $0x428] sm:$0xff] %v416_v5  ;;  %v420_v7 = vld [vmem:[%s2614_s26 + $0x868] sm:$0xff] }
  0x56   : > { %419 = vst [vmem:[%s2622_s27 + $0x430] sm:$0xff] %v418_v6  ;;  %v422_v8 = vld [vmem:[%s2614_s26 + $0x880] sm:$0xff]  ;;  %v424_v9 = vld [vmem:[%s2614_s26 + $0x888] sm:$0xff]  ;;  %421 = vst [vmem:[%s2622_s27 + $0x438] sm:$0xff] %v420_v7 }
  0x57   : > { %423 = vst [vmem:[%s2622_s27 + $0x440] sm:$0xff] %v422_v8  ;;  %425 = vst [vmem:[%s2622_s27 + $0x448] sm:$0xff] %v424_v9  ;;  %v426_v10 = vld [vmem:[%s2614_s26 + $0x8a0] sm:$0xff]  ;;  %v428_v11 = vld [vmem:[%s2614_s26 + $0x8a8] sm:$0xff] }
  0x58   : > { %v430_v12 = vld [vmem:[%s2614_s26 + $0x8c0] sm:$0xff]  ;;  %427 = vst [vmem:[%s2622_s27 + $0x450] sm:$0xff] %v426_v10  ;;  %429 = vst [vmem:[%s2622_s27 + $0x458] sm:$0xff] %v428_v11  ;;  %v432_v13 = vld [vmem:[%s2614_s26 + $0x8c8] sm:$0xff] }
  0x59   : > { %431 = vst [vmem:[%s2622_s27 + $0x460] sm:$0xff] %v430_v12  ;;  %v434_v14 = vld [vmem:[%s2614_s26 + $0x8e0] sm:$0xff]  ;;  %v436_v15 = vld [vmem:[%s2614_s26 + $0x8e8] sm:$0xff]  ;;  %433 = vst [vmem:[%s2622_s27 + $0x468] sm:$0xff] %v432_v13 }
  0x5a   : > { %435 = vst [vmem:[%s2622_s27 + $0x470] sm:$0xff] %v434_v14  ;;  %437 = vst [vmem:[%s2622_s27 + $0x478] sm:$0xff] %v436_v15 }
  0x5b PF: > { %p2076_p7 = scmp.ge.s32.totalorder %s2551_s14, 1  ;;  %p442_p8 = scmp.lt.s32.totalorder %s2551_s14, 3 }
  0x5d   : > { %p443_p9 = pnand %p2076_p7, %p442_p8 }
  0x5e   : > { %s449_s28 = sand.u32 (!%p443_p9), 1, %s2543_s12  }
  0x5f   : > { %446 = sbr.rel (%p443_p9) target bundleno = 506 (0x1fa), region = 51 }
  0x60   : > { %s2258_s29 = smul.u32 (!%p443_p9), 1152, %s449_s28 }
  0x62   : > { %s2923_s7 = scalar_lea.vmem (!%p443_p9), [#allocation2], %s2258_s29 }
  0x64   : > { %v2914_v16 = vld [vmem:[%s3273_s1 + $0x4] ss:$20 sps:$4 sm:$0xff]   ;;  %v2553_v17 = vmov 0   ;;  %v2920_v18 = vld [vmem:[%s3273_s1 + $0xc] ss:$20 sps:$4 sm:$0xff]   ;;  %vm1462_vm0 = vcmask 523264  }
  0x65   : > { %2284 = vset.pattern.permute.xlu0 %v2553_v17  ;;  %1507 = vmatprep.mubr.bf16.mxu0 %v2914_v16  ;;  %v2285_v19 = vld [vmem:[%s2923_s7 + $0xe4] ss:$16 sps:$4 sm:$0xff]   ;;  %v2289_v21 = vld [vmem:[%s2923_s7 + $0xe0] ss:$16 sps:$4 sm:$0xff]  }
  0x66   : > { %1580 = vmatprep.mubr.bf16.mxu1 %v2920_v18  ;;  %v2287_v20 = vld [vmem:[%s2923_s7 + $0x2e4] ss:$16 sps:$4 sm:$0xff]   ;;  %1475 = vmatprep.subr.bf16.mxu0 %v2285_v19  ;;  %v2290_v22 = vld [vmem:[%s2923_s7 + $0x2e0] ss:$16 sps:$4 sm:$0xff]  }
  0x67   : > { %1548 = vmatprep.subr.bf16.mxu1 %v2287_v20  ;;  %v2291_v23 = vld [vmem:[%s2923_s7 + $0xc4] ss:$16 sps:$4 sm:$0xff]   ;;  %1476 = vmatpush1.bf16.msra.mxu0 %v2289_v21  ;;  %v2295_v25 = vld [vmem:[%s2923_s7 + $0xc0] ss:$16 sps:$4 sm:$0xff]  }
  0x68   : > { %1549 = vmatpush1.bf16.msra.mxu1 %v2290_v22  ;;  %v2293_v24 = vld [vmem:[%s2923_s7 + $0x2c4] ss:$16 sps:$4 sm:$0xff]   ;;  %1477 = vmatprep.subr.bf16.mxu0 %v2291_v23  ;;  %v2296_v26 = vld [vmem:[%s2923_s7 + $0x2c0] ss:$16 sps:$4 sm:$0xff]   ;;  %v2392_v23 = vld [vmem:[%s2923_s7 + $0xec] ss:$16 sps:$4 sm:$0xff]  }
  0x69   : > { %1550 = vmatprep.subr.bf16.mxu1 %v2293_v24  ;;  %v2297_v27 = vld [vmem:[%s2923_s7 + $0xa4] ss:$16 sps:$4 sm:$0xff]   ;;  %v2301_v29 = vld [vmem:[%s2923_s7 + $0xa0] ss:$16 sps:$4 sm:$0xff]  }
  0x6a   : > { %v2299_v28 = vld [vmem:[%s2923_s7 + $0x2a4] ss:$16 sps:$4 sm:$0xff]   ;;  %v2302_v30 = vld [vmem:[%s2923_s7 + $0x2a0] ss:$16 sps:$4 sm:$0xff]  }
  0x6b   : > { %1478 = vmatpush1.bf16.msra.mxu0 %v2295_v25  ;;  %v2303_v31 = vld [vmem:[%s2923_s7 + $0x84] ss:$16 sps:$4 sm:$0xff]   ;;  %v2307_v33 = vld [vmem:[%s2923_s7 + $0x80] ss:$16 sps:$4 sm:$0xff]   ;;  %v3000_v25 = vld [vmem:[%s3273_s1 + $0x8] ss:$20 sps:$4 sm:$0xff]  }
  0x6c   : > { %1551 = vmatpush1.bf16.msra.mxu1 %v2296_v26  ;;  %1479 = vmatprep.subr.bf16.mxu0 %v2297_v27  ;;  %v2305_v32 = vld [vmem:[%s2923_s7 + $0x284] ss:$16 sps:$4 sm:$0xff]   ;;  %v2308_v34 = vld [vmem:[%s2923_s7 + $0x280] ss:$16 sps:$4 sm:$0xff]  }
  0x6d   : > { %1552 = vmatprep.subr.bf16.mxu1 %v2299_v28  ;;  %v2309_v35 = vld [vmem:[%s2923_s7 + $0x64] ss:$16 sps:$4 sm:$0xff]   ;;  %v2313_v37 = vld [vmem:[%s2923_s7 + $0x60] ss:$16 sps:$4 sm:$0xff]   ;;  %v2390_v28 = vld [vmem:[%s2923_s7 + $0xe8] ss:$16 sps:$4 sm:$0xff]  }
  0x6e   : > { %v2311_v36 = vld [vmem:[%s2923_s7 + $0x264] ss:$16 sps:$4 sm:$0xff]   ;;  %v2314_v38 = vld [vmem:[%s2923_s7 + $0x260] ss:$16 sps:$4 sm:$0xff]  }
  0x6f   : > { %1480 = vmatpush1.bf16.msra.mxu0 %v2301_v29  ;;  %v2315_v39 = vld [vmem:[%s2923_s7 + $0x44] ss:$16 sps:$4 sm:$0xff]   ;;  %v2319_v41 = vld [vmem:[%s2923_s7 + $0x40] ss:$16 sps:$4 sm:$0xff]   ;;  %v2395_v29 = vld [vmem:[%s2923_s7 + $0xcc] ss:$16 sps:$4 sm:$0xff]  }
  0x70   : > { %1553 = vmatpush1.bf16.msra.mxu1 %v2302_v30  ;;  %1481 = vmatprep.subr.bf16.mxu0 %v2303_v31  ;;  %v2317_v40 = vld [vmem:[%s2923_s7 + $0x244] ss:$16 sps:$4 sm:$0xff]   ;;  %v2320_v42 = vld [vmem:[%s2923_s7 + $0x240] ss:$16 sps:$4 sm:$0xff]  }
  0x71   : > { %1554 = vmatprep.subr.bf16.mxu1 %v2305_v32  ;;  %v2321_v43 = vld [vmem:[%s2923_s7 + $0x24] ss:$16 sps:$4 sm:$0xff]   ;;  %v2325_v45 = vld [vmem:[%s2923_s7 + $0x20] ss:$16 sps:$4 sm:$0xff]   ;;  %v2393_v32 = vld [vmem:[%s2923_s7 + $0xc8] ss:$16 sps:$4 sm:$0xff]  }
  0x72   : > { %v2323_v44 = vld [vmem:[%s2923_s7 + $0x224] ss:$16 sps:$4 sm:$0xff]   ;;  %v2326_v46 = vld [vmem:[%s2923_s7 + $0x220] ss:$16 sps:$4 sm:$0xff]  }
  0x73   : > { %1482 = vmatpush1.bf16.msra.mxu0 %v2307_v33  ;;  %v2327_v47 = vld [vmem:[%s2923_s7 + $0x4] ss:$16 sps:$4 sm:$0xff]   ;;  %v2331_v49 = vld [vmem:[%s2923_s7] ss:$16 sps:$4 sm:$0xff]  }
  0x74   : > { %1555 = vmatpush1.bf16.msra.mxu1 %v2308_v34  ;;  %1483 = vmatprep.subr.bf16.mxu0 %v2309_v35  ;;  %v2329_v48 = vld [vmem:[%s2923_s7 + $0x204] ss:$16 sps:$4 sm:$0xff]   ;;  %v2332_v50 = vld [vmem:[%s2923_s7 + $0x200] ss:$16 sps:$4 sm:$0xff]   ;;  %v2407_v34 = vld [vmem:[%s2923_s7 + $0xac] ss:$16 sps:$4 sm:$0xff]  }
  0x75   : > { %1556 = vmatprep.subr.bf16.mxu1 %v2311_v36  ;;  %v2333_v51 = vld [vmem:[%s2923_s7 + $0x1e4] ss:$16 sps:$4 sm:$0xff]   ;;  %v2337_v53 = vld [vmem:[%s2923_s7 + $0x1e0] ss:$16 sps:$4 sm:$0xff]   ;;  %v3027_v36 = vld [vmem:[%s3273_s1 + $0x28] ss:$20 sps:$4 sm:$0xff]  }
  0x76   : > { %v2335_v52 = vld [vmem:[%s2923_s7 + $0x3e4] ss:$16 sps:$4 sm:$0xff]   ;;  %v2338_v54 = vld [vmem:[%s2923_s7 + $0x3e0] ss:$16 sps:$4 sm:$0xff]  }
  0x77   : > { %1484 = vmatpush1.bf16.msra.mxu0 %v2313_v37  ;;  %v2339_v55 = vld [vmem:[%s2923_s7 + $0x1c4] ss:$16 sps:$4 sm:$0xff]   ;;  %v2343_v57 = vld [vmem:[%s2923_s7 + $0x1c0] ss:$16 sps:$4 sm:$0xff]  }
  0x78   : > { %1557 = vmatpush1.bf16.msra.mxu1 %v2314_v38  ;;  %1485 = vmatprep.subr.bf16.mxu0 %v2315_v39  ;;  %v2341_v56 = vld [vmem:[%s2923_s7 + $0x3c4] ss:$16 sps:$4 sm:$0xff]   ;;  %v2344_v58 = vld [vmem:[%s2923_s7 + $0x3c0] ss:$16 sps:$4 sm:$0xff]   ;;  %v2405_v38 = vld [vmem:[%s2923_s7 + $0xa8] ss:$16 sps:$4 sm:$0xff]  }
  0x79   : > { %1558 = vmatprep.subr.bf16.mxu1 %v2317_v40  ;;  %v2345_v59 = vld [vmem:[%s2923_s7 + $0x1a4] ss:$16 sps:$4 sm:$0xff]   ;;  %v2349_v61 = vld [vmem:[%s2923_s7 + $0x1a0] ss:$16 sps:$4 sm:$0xff]   ;;  %v2410_v39 = vld [vmem:[%s2923_s7 + $0x8c] ss:$16 sps:$4 sm:$0xff]  }
  0x7a   : > { %v2347_v60 = vld [vmem:[%s2923_s7 + $0x3a4] ss:$16 sps:$4 sm:$0xff]   ;;  %v2350_v62 = vld [vmem:[%s2923_s7 + $0x3a0] ss:$16 sps:$4 sm:$0xff]  }
  0x7b   : > { %1486 = vmatpush1.bf16.msra.mxu0 %v2319_v41  ;;  %v2351_v63 = vld [vmem:[%s2923_s7 + $0x184] ss:$16 sps:$4 sm:$0xff]   ;;  %v2355_v1 = vld [vmem:[%s2923_s7 + $0x180] ss:$16 sps:$4 sm:$0xff]  }
  0x7c   : > { %1559 = vmatpush1.bf16.msra.mxu1 %v2320_v42  ;;  %1487 = vmatprep.subr.bf16.mxu0 %v2321_v43  ;;  %v2353_v0 = vld [vmem:[%s2923_s7 + $0x384] ss:$16 sps:$4 sm:$0xff]   ;;  %v2356_v2 = vld [vmem:[%s2923_s7 + $0x380] ss:$16 sps:$4 sm:$0xff]  }
  0x7d   : > { %1560 = vmatprep.subr.bf16.mxu1 %v2323_v44  ;;  %v2357_v3 = vld [vmem:[%s2923_s7 + $0x164] ss:$16 sps:$4 sm:$0xff]   ;;  %v2361_v5 = vld [vmem:[%s2923_s7 + $0x160] ss:$16 sps:$4 sm:$0xff]   ;;  %v2408_v44 = vld [vmem:[%s2923_s7 + $0x88] ss:$16 sps:$4 sm:$0xff]  }
  0x7e   : > { %v2359_v4 = vld [vmem:[%s2923_s7 + $0x364] ss:$16 sps:$4 sm:$0xff]   ;;  %v2362_v6 = vld [vmem:[%s2923_s7 + $0x360] ss:$16 sps:$4 sm:$0xff]  }
  0x7f   : > { %1488 = vmatpush1.bf16.msra.mxu0 %v2325_v45  ;;  %v2363_v7 = vld [vmem:[%s2923_s7 + $0x144] ss:$16 sps:$4 sm:$0xff]   ;;  %v2367_v9 = vld [vmem:[%s2923_s7 + $0x140] ss:$16 sps:$4 sm:$0xff]  }
  0x80   : > { %1561 = vmatpush1.bf16.msra.mxu1 %v2326_v46  ;;  %1489 = vmatprep.subr.bf16.mxu0 %v2327_v47  ;;  %v2365_v8 = vld [vmem:[%s2923_s7 + $0x344] ss:$16 sps:$4 sm:$0xff]   ;;  %v2368_v10 = vld [vmem:[%s2923_s7 + $0x340] ss:$16 sps:$4 sm:$0xff]   ;;  %v3061_v46 = vld [vmem:[%s3273_s1 + $0x58] ss:$20 sps:$4 sm:$0xff]  }
  0x81   : > { %1562 = vmatprep.subr.bf16.mxu1 %v2329_v48  ;;  %v2369_v11 = vld [vmem:[%s2923_s7 + $0x124] ss:$16 sps:$4 sm:$0xff]   ;;  %v2373_v13 = vld [vmem:[%s2923_s7 + $0x120] ss:$16 sps:$4 sm:$0xff]   ;;  %v2422_v47 = vld [vmem:[%s2923_s7 + $0x6c] ss:$16 sps:$4 sm:$0xff]  }
  0x82   : > { %v2371_v12 = vld [vmem:[%s2923_s7 + $0x324] ss:$16 sps:$4 sm:$0xff]   ;;  %v2374_v14 = vld [vmem:[%s2923_s7 + $0x320] ss:$16 sps:$4 sm:$0xff]  }
  0x83   : > { %1490 = vmatpush1.bf16.msra.mxu0 %v2331_v49  ;;  %v2375_v15 = vld [vmem:[%s2923_s7 + $0x104] ss:$16 sps:$4 sm:$0xff]   ;;  %v2379_v20 = vld [vmem:[%s2923_s7 + $0x100] ss:$16 sps:$4 sm:$0xff]   ;;  %v2420_v49 = vld [vmem:[%s2923_s7 + $0x68] ss:$16 sps:$4 sm:$0xff]  }
  0x84   : > { %1563 = vmatpush1.bf16.msra.mxu1 %v2332_v50  ;;  %1491 = vmatprep.subr.bf16.mxu0 %v2333_v51  ;;  %v2377_v19 = vld [vmem:[%s2923_s7 + $0x304] ss:$16 sps:$4 sm:$0xff]   ;;  %v2380_v21 = vld [vmem:[%s2923_s7 + $0x300] ss:$16 sps:$4 sm:$0xff]   ;;  %v2425_v51 = vld [vmem:[%s2923_s7 + $0x4c] ss:$16 sps:$4 sm:$0xff]  }
  0x85   : > { %1564 = vmatprep.subr.bf16.mxu1 %v2335_v52  ;;  %v2389_v22 = vld [vmem:[%s2923_s7 + $0x464] ss:$16 sps:$4 sm:$0xff]   ;;  %v2387_v26 = vld [vmem:[%s2923_s7 + $0x460] ss:$16 sps:$4 sm:$0xff]  }
  0x86   : > { %v2995_v24 = vld [vmem:[%s3273_s1] ss:$20 sps:$4 sm:$0xff]   ;;  %v3032_v37 = vld [vmem:[%s3273_s1 + $0x30] ss:$20 sps:$4 sm:$0xff]  }
  0x87   : > { %1492 = vmatpush2.bf16.msra.mxu0 %v2337_v53  ;;  %v3006_v27 = vld [vmem:[%s3273_s1 + $0x2c] ss:$20 sps:$4 sm:$0xff]   ;;  %v3013_v30 = vld [vmem:[%s3273_s1 + $0x34] ss:$20 sps:$4 sm:$0xff]   ;;  %v3044_v41 = vld [vmem:[%s3273_s1 + $0x5c] ss:$20 sps:$4 sm:$0xff]  }
  0x88   : > { %1565 = vmatpush2.bf16.msra.mxu1 %v2338_v54  ;;  %1493 = vmatprep.subr.bf16.mxu0 %v2339_v55  ;;  %v2404_v31 = vld [vmem:[%s2923_s7 + $0x444] ss:$16 sps:$4 sm:$0xff]   ;;  %v2402_v33 = vld [vmem:[%s2923_s7 + $0x440] ss:$16 sps:$4 sm:$0xff]   ;;  %v2443_v53 = vld [vmem:[%s2923_s7 + $0x2ec] ss:$16 sps:$4 sm:$0xff]  }
  0x89   : > { %1566 = vmatprep.subr.bf16.mxu1 %v2341_v56  ;;  %v2419_v35 = vld [vmem:[%s2923_s7 + $0x424] ss:$16 sps:$4 sm:$0xff]   ;;  %v2417_v42 = vld [vmem:[%s2923_s7 + $0x420] ss:$16 sps:$4 sm:$0xff]   ;;  %v2423_v54 = vld [vmem:[%s2923_s7 + $0x48] ss:$16 sps:$4 sm:$0xff]  }
  0x8a   : > { %v3039_v40 = vld [vmem:[%s3273_s1 + $0x54] ss:$20 sps:$4 sm:$0xff]   ;;  %v3056_v45 = vld [vmem:[%s3273_s1 + $0x50] ss:$20 sps:$4 sm:$0xff]   ;;  %v2437_v55 = vld [vmem:[%s2923_s7 + $0x2c] ss:$16 sps:$4 sm:$0xff]  }
  0x8b   : > { %1494 = vmatpush2.bf16.msra.mxu0 %v2343_v57  ;;  %v2434_v43 = vld [vmem:[%s2923_s7 + $0x404] ss:$16 sps:$4 sm:$0xff]   ;;  %v2432_v48 = vld [vmem:[%s2923_s7 + $0x400] ss:$16 sps:$4 sm:$0xff]   ;;  %v3087_v56 = vld [vmem:[%s3273_s1 + $0x78] ss:$20 sps:$4 sm:$0xff]  }
  0x8c   : > { %1567 = vmatpush2.bf16.msra.mxu1 %v2344_v58  ;;  %1495 = vmatprep.subr.bf16.mxu0 %v2345_v59  ;;  %v3069_v50 = vld [vmem:[%s3273_s1 + $0x7c] ss:$20 sps:$4 sm:$0xff]   ;;  %v3075_v52 = vld [vmem:[%s3273_s1 + $0x84] ss:$20 sps:$4 sm:$0xff]   ;;  %v3092_v57 = vld [vmem:[%s3273_s1 + $0x80] ss:$20 sps:$4 sm:$0xff]  }
  0x8d   : > { %1568 = vmatprep.subr.bf16.mxu1 %v2347_v60  ;;  %v2435_v58 = vld [vmem:[%s2923_s7 + $0x28] ss:$16 sps:$4 sm:$0xff]   ;;  %v2440_v59 = vld [vmem:[%s2923_s7 + $0xc] ss:$16 sps:$4 sm:$0xff]  }
  0x8e   : > { %v2438_v60 = vld [vmem:[%s2923_s7 + $0x8] ss:$16 sps:$4 sm:$0xff]  }
  0x8f   : > { %1496 = vmatpush2.bf16.msra.mxu0 %v2349_v61  ;;  %v2447_v61 = vld [vmem:[%s2923_s7 + $0x1ec] ss:$16 sps:$4 sm:$0xff]  }
  0x90   : > { %1569 = vmatpush2.bf16.msra.mxu1 %v2350_v62  ;;  %1497 = vmatprep.subr.bf16.mxu0 %v2351_v63  ;;  %v2441_v62 = vld [vmem:[%s2923_s7 + $0x2e8] ss:$16 sps:$4 sm:$0xff]   ;;  %v3106_v63 = vld [vmem:[%s3273_s1 + $0x10] ss:$20 sps:$4 sm:$0xff]  }
  0x91   : > { %1570 = vmatprep.subr.bf16.mxu1 %v2353_v0  ;;  %v2445_v0 = vld [vmem:[%s2923_s7 + $0x1e8] ss:$16 sps:$4 sm:$0xff]  }
  0x93   : > { %1498 = vmatpush2.bf16.msra.mxu0 %v2355_v1  ;;  %v2450_v1 = vld [vmem:[%s2923_s7 + $0x2cc] ss:$16 sps:$4 sm:$0xff]  }
  0x94   : > { %1571 = vmatpush2.bf16.msra.mxu1 %v2356_v2  ;;  %1499 = vmatprep.subr.bf16.mxu0 %v2357_v3  ;;  %v2453_v2 = vld [vmem:[%s2923_s7 + $0x1cc] ss:$16 sps:$4 sm:$0xff]   ;;  %v2451_v3 = vld [vmem:[%s2923_s7 + $0x1c8] ss:$16 sps:$4 sm:$0xff]  }
  0x95   : > { %1572 = vmatprep.subr.bf16.mxu1 %v2359_v4  ;;  %v2456_v4 = vld [vmem:[%s2923_s7 + $0x2ac] ss:$16 sps:$4 sm:$0xff]  }
  0x97   : > { %1500 = vmatpush2.bf16.msra.mxu0 %v2361_v5  ;;  %v2460_v5 = vld [vmem:[%s2923_s7 + $0x1ac] ss:$16 sps:$4 sm:$0xff]  }
  0x98   : > { %1573 = vmatpush2.bf16.msra.mxu1 %v2362_v6  ;;  %1501 = vmatprep.subr.bf16.mxu0 %v2363_v7  ;;  %v2454_v6 = vld [vmem:[%s2923_s7 + $0x2a8] ss:$16 sps:$4 sm:$0xff]  }
  0x99   : > { %1574 = vmatprep.subr.bf16.mxu1 %v2365_v8  ;;  %v3122_v7 = vld [vmem:[%s3273_s1 + $0x38] ss:$20 sps:$4 sm:$0xff]  }
  0x9a   : > { %v2458_v8 = vld [vmem:[%s2923_s7 + $0x1a8] ss:$16 sps:$4 sm:$0xff]  }
  0x9b   : > { %1502 = vmatpush2.bf16.msra.mxu0 %v2367_v9  ;;  %v2463_v9 = vld [vmem:[%s2923_s7 + $0x28c] ss:$16 sps:$4 sm:$0xff]  }
  0x9c   : > { %1575 = vmatpush2.bf16.msra.mxu1 %v2368_v10  ;;  %1503 = vmatprep.subr.bf16.mxu0 %v2369_v11  ;;  %v2466_v10 = vld [vmem:[%s2923_s7 + $0x18c] ss:$16 sps:$4 sm:$0xff]   ;;  %v1937_v11 = vld [vmem:[%s3274_s2] sm:$0xff] }
  0x9d   : > { %1576 = vmatprep.subr.bf16.mxu1 %v2371_v12  ;;  %1941 = vperm.xlu0 %2284, %v1937_v11   ;;  %v2461_v12 = vld [vmem:[%s2923_s7 + $0x288] ss:$16 sps:$4 sm:$0xff]  }
  0x9f   : > { %1504 = vmatpush2.bf16.msra.mxu0 %v2373_v13  ;;  %v2464_v13 = vld [vmem:[%s2923_s7 + $0x188] ss:$16 sps:$4 sm:$0xff]  }
  0xa0   : > { %1577 = vmatpush2.bf16.msra.mxu1 %v2374_v14  ;;  %1505 = vmatprep.subr.bf16.mxu0 %v2375_v15  ;;  %v1938_v14 = vld [vmem:[%s3274_s2 + $0x8] sm:$0xff] }
  0xa1   : > { %1578 = vmatprep.subr.bf16.mxu1 %v2377_v19  ;;  %v2469_v15 = vld [vmem:[%s2923_s7 + $0x26c] ss:$16 sps:$4 sm:$0xff]   ;;  %1946 = vperm.xlu0 %2284, %v1938_v14  }
  0xa2   : > { %v2473_v19 = vld [vmem:[%s2923_s7 + $0x16c] ss:$16 sps:$4 sm:$0xff]  }
  0xa3   : > { %1506 = vmatpush2.bf16.msra.mxu0 %v2379_v20  ;;  %v3143_v20 = vld [vmem:[%s3273_s1 + $0x60] ss:$20 sps:$4 sm:$0xff]  }
  0xa4   : > { %1579 = vmatpush2.bf16.msra.mxu1 %v2380_v21  ;;  %1629 = vmatprep.subr.bf16.mxu0 %v2389_v22  ;;  %v2467_v21 = vld [vmem:[%s2923_s7 + $0x268] ss:$16 sps:$4 sm:$0xff]  }
  0xa5   : > { %1694 = vmatprep.subr.bf16.mxu1 %v2392_v23  ;;  %v2471_v22 = vld [vmem:[%s2923_s7 + $0x168] ss:$16 sps:$4 sm:$0xff]   ;;  %v2476_v23 = vld [vmem:[%s2923_s7 + $0x24c] ss:$16 sps:$4 sm:$0xff]  }
  0xa6   : > { %1508 = vmatmul.mubr.bf16.vlgmr.msra.gmra.mxu0 %v2995_v24 }
  0xa7   : > { %1581 = vmatmul.mubr.bf16.vlgmr.msra.gmra.mxu1 %v3000_v25  ;;  %1630 = vmatpush1.bf16.msra.mxu0 %v2387_v26  ;;  %v2479_v26 = vld [vmem:[%s2923_s7 + $0x14c] ss:$16 sps:$4 sm:$0xff]  }
  0xa8   : > { %1695 = vmatpush1.bf16.msra.mxu1 %v2390_v28  ;;  %1517 = vmatprep.mubr.bf16.mxu0 %v3006_v27  ;;  %v2474_v28 = vld [vmem:[%s2923_s7 + $0x248] ss:$16 sps:$4 sm:$0xff]  }
  0xa9   : > { %1696 = vmatprep.subr.bf16.mxu1 %v2395_v29  ;;  %1590 = vmatprep.mubr.bf16.mxu1 %v3013_v30  ;;  %v2477_v29 = vld [vmem:[%s2923_s7 + $0x148] ss:$16 sps:$4 sm:$0xff]  }
  0xaa   : > { %1631 = vmatprep.subr.bf16.mxu0 %v2404_v31  ;;  %v2482_v31 = vld [vmem:[%s2923_s7 + $0x22c] ss:$16 sps:$4 sm:$0xff]  }
  0xab   : > { %1632 = vmatpush1.bf16.msra.mxu0 %v2402_v33  ;;  %v3159_v33 = vld [vmem:[%s3273_s1 + $0x88] ss:$20 sps:$4 sm:$0xff]  }
  0xac   : > { %1697 = vmatpush1.bf16.msra.mxu1 %v2393_v32  ;;  %1633 = vmatprep.subr.bf16.mxu0 %v2419_v35  ;;  %v2486_v32 = vld [vmem:[%s2923_s7 + $0x12c] ss:$16 sps:$4 sm:$0xff]   ;;  %v2484_v35 = vld [vmem:[%s2923_s7 + $0x128] ss:$16 sps:$4 sm:$0xff]  }
  0xad   : > { %1698 = vmatprep.subr.bf16.mxu1 %v2407_v34  ;;  %v2480_v34 = vld [vmem:[%s2923_s7 + $0x228] ss:$16 sps:$4 sm:$0xff]  }
  0xae   : > { %1518 = vmatmul.mubr.bf16.gmra.mxu0 %v3027_v36 }
  0xaf   : > { %1591 = vmatmul.mubr.bf16.gmra.mxu1 %v3032_v37  ;;  %1527 = vmatprep.mubr.bf16.mxu0 %v3039_v40 }
  0xb0   : > { %1699 = vmatpush1.bf16.msra.mxu1 %v2405_v38  ;;  %1600 = vmatprep.mubr.bf16.mxu1 %v3044_v41  ;;  %v2489_v38 = vld [vmem:[%s2923_s7 + $0x20c] ss:$16 sps:$4 sm:$0xff]  }
  0xb1   : > { %1700 = vmatprep.subr.bf16.mxu1 %v2410_v39  ;;  %1634 = vmatpush1.bf16.msra.mxu0 %v2417_v42  ;;  %v2492_v39 = vld [vmem:[%s2923_s7 + $0x10c] ss:$16 sps:$4 sm:$0xff]   ;;  %v2487_v42 = vld [vmem:[%s2923_s7 + $0x208] ss:$16 sps:$4 sm:$0xff]  }
  0xb2   : > { %1635 = vmatprep.subr.bf16.mxu0 %v2434_v43  ;;  %v2490_v43 = vld [vmem:[%s2923_s7 + $0x108] ss:$16 sps:$4 sm:$0xff]  }
  0xb4   : > { %1701 = vmatpush1.bf16.msra.mxu1 %v2408_v44  ;;  %v2495_v44 = vld [vmem:[%s2923_s7 + $0x3ec] ss:$16 sps:$4 sm:$0xff]  }
  0xb5   : > { %1702 = vmatprep.subr.bf16.mxu1 %v2422_v47  ;;  %1636 = vmatpush1.bf16.msra.mxu0 %v2432_v48  ;;  %v2498_v47 = vld [vmem:[%s2923_s7 + $0x46c] ss:$16 sps:$4 sm:$0xff]   ;;  %v2493_v48 = vld [vmem:[%s2923_s7 + $0x3e8] ss:$16 sps:$4 sm:$0xff]  }
  0xb6   : > { %1528 = vmatmul.mubr.bf16.gmra.mxu0 %v3056_v45  ;;  %1767 = vmatprep.subr.bf16.mxu0 %v2443_v53  ;;  %v2507_v53 = vld [vmem:[%s2923_s7 + $0x44c] ss:$16 sps:$4 sm:$0xff]  }
  0xb7   : > { %1601 = vmatmul.mubr.bf16.gmra.mxu1 %v3061_v46  ;;  %1537 = vmatprep.mubr.bf16.mxu0 %v3069_v50 }
  0xb8   : > { %1703 = vmatpush1.bf16.msra.mxu1 %v2420_v49  ;;  %1610 = vmatprep.mubr.bf16.mxu1 %v3075_v52  ;;  %v2496_v49 = vld [vmem:[%s2923_s7 + $0x468] ss:$16 sps:$4 sm:$0xff]  }
  0xb9   : > { %1704 = vmatprep.subr.bf16.mxu1 %v2425_v51  ;;  %v2501_v51 = vld [vmem:[%s2923_s7 + $0x3cc] ss:$16 sps:$4 sm:$0xff]  }
  0xbc   : > { %1705 = vmatpush1.bf16.msra.mxu1 %v2423_v54  ;;  %v2499_v54 = vld [vmem:[%s2923_s7 + $0x3c8] ss:$16 sps:$4 sm:$0xff]  }
  0xbd   : > { %1706 = vmatprep.subr.bf16.mxu1 %v2437_v55  ;;  %v2504_v55 = vld [vmem:[%s2923_s7 + $0x3ac] ss:$16 sps:$4 sm:$0xff]  }
  0xbe   : > { %1538 = vmatmul.mubr.bf16.gmra.mxu0 %v3087_v56 }
  0xbf   : > { %1611 = vmatmul.mubr.bf16.gmra.mxu1 %v3092_v57  ;;  %1653 = vmatprep.mubr.bf16.mxu0 %v2553_v17 }
  0xc0   : > { %1707 = vmatpush1.bf16.msra.mxu1 %v2435_v58  ;;  %1726 = vmatprep.mubr.bf16.mxu1 %v2914_v16  ;;  %v2448_v16 = vld [vmem:[%s2923_s7 + $0x2c8] ss:$16 sps:$4 sm:$0xff]   ;;  %v2516_v58 = vld [vmem:[%s2923_s7 + $0x42c] ss:$16 sps:$4 sm:$0xff]  }
  0xc1   : > { %1708 = vmatprep.subr.bf16.mxu1 %v2440_v59  ;;  %v2502_v59 = vld [vmem:[%s2923_s7 + $0x3a8] ss:$16 sps:$4 sm:$0xff]  }
  0xc4   : > { %1709 = vmatpush1.bf16.msra.mxu1 %v2438_v60  ;;  %v2514_v60 = vld [vmem:[%s2923_s7 + $0x428] ss:$16 sps:$4 sm:$0xff]  }
  0xc5   : > { %1710 = vmatprep.subr.bf16.mxu1 %v2447_v61  ;;  %v2525_v61 = vld [vmem:[%s2923_s7 + $0x40c] ss:$16 sps:$4 sm:$0xff]  }
  0xc6   : > { %2242 = vmatmul.mubr.msk.bf16.vlgmr.msra.gmra.mxu0 %vm1462_vm0, %v3106_v63 }
  0xc7   : > { %1768 = vmatpush1.bf16.msra.mxu0 %v2441_v62  ;;  %1663 = vmatprep.mubr.bf16.mxu0 %v2553_v17  ;;  %v2513_v62 = vld [vmem:[%s2923_s7 + $0x36c] ss:$16 sps:$4 sm:$0xff]  }
  0xc8   : > { %1711 = vmatpush2.bf16.msra.mxu1 %v2445_v0  ;;  %1769 = vmatprep.subr.bf16.mxu0 %v2450_v1  ;;  %v2523_v0 = vld [vmem:[%s2923_s7 + $0x408] ss:$16 sps:$4 sm:$0xff]  }
  0xc9   : > { %1712 = vmatprep.subr.bf16.mxu1 %v2453_v2  ;;  %v2511_v1 = vld [vmem:[%s2923_s7 + $0x368] ss:$16 sps:$4 sm:$0xff]   ;;  %v2519_v2 = vld [vmem:[%s2923_s7 + $0x34c] ss:$16 sps:$4 sm:$0xff]  }
  0xcb   : > { %1770 = vmatpush1.bf16.msra.mxu0 %v2448_v16  ;;  %v2520_v16 = vld [vmem:[%s2923_s7 + $0x328] ss:$16 sps:$4 sm:$0xff]  }
  0xcc   : > { %1713 = vmatpush2.bf16.msra.mxu1 %v2451_v3  ;;  %1771 = vmatprep.subr.bf16.mxu0 %v2456_v4  ;;  %v2528_v3 = vld [vmem:[%s2923_s7 + $0x30c] ss:$16 sps:$4 sm:$0xff]   ;;  %v2526_v4 = vld [vmem:[%s2923_s7 + $0x308] ss:$16 sps:$4 sm:$0xff]  }
  0xcd   : > { %1714 = vmatprep.subr.bf16.mxu1 %v2460_v5 }
  0xce   : > { %2243 = vmatmul.mubr.msk.bf16.gmra.mxu0 %vm1462_vm0, %v3122_v7 }
  0xcf   : > { %1772 = vmatpush1.bf16.msra.mxu0 %v2454_v6  ;;  %1673 = vmatprep.mubr.bf16.mxu0 %v2553_v17 }
  0xd0   : > { %1715 = vmatpush2.bf16.msra.mxu1 %v2458_v8  ;;  %1773 = vmatprep.subr.bf16.mxu0 %v2463_v9 }
  0xd1   : > { %1716 = vmatprep.subr.bf16.mxu1 %v2466_v10 }
  0xd3   : > { %1774 = vmatpush1.bf16.msra.mxu0 %v2461_v12 }
  0xd4   : > { %1717 = vmatpush2.bf16.msra.mxu1 %v2464_v13  ;;  %1775 = vmatprep.subr.bf16.mxu0 %v2469_v15 }
  0xd5   : > { %1718 = vmatprep.subr.bf16.mxu1 %v2473_v19 }
  0xd6   : > { %2244 = vmatmul.mubr.msk.bf16.gmra.mxu0 %vm1462_vm0, %v3143_v20 }
  0xd7   : > { %1776 = vmatpush1.bf16.msra.mxu0 %v2467_v21  ;;  %1683 = vmatprep.mubr.bf16.mxu0 %v2553_v17 }
  0xd8   : > { %1719 = vmatpush2.bf16.msra.mxu1 %v2471_v22  ;;  %1777 = vmatprep.subr.bf16.mxu0 %v2476_v23 }
  0xd9   : > { %1720 = vmatprep.subr.bf16.mxu1 %v2479_v26 }
  0xdb   : > { %1778 = vmatpush1.bf16.msra.mxu0 %v2474_v28 }
  0xdc   : > { %1721 = vmatpush2.bf16.msra.mxu1 %v2477_v29  ;;  %1779 = vmatprep.subr.bf16.mxu0 %v2482_v31 }
  0xdd   : > { %1722 = vmatprep.subr.bf16.mxu1 %v2486_v32 }
  0xde   : > { %2245 = vmatmul.mubr.msk.bf16.gmra.mxu0 %vm1462_vm0, %v3159_v33 }
  0xdf   : > { %1780 = vmatpush1.bf16.msra.mxu0 %v2480_v34  ;;  %1799 = vmatprep.mubr.bf16.mxu0 %v2920_v18  ;;  %v2505_v18 = vld [vmem:[%s2923_s7 + $0x448] ss:$16 sps:$4 sm:$0xff]  }
  0xe0   : > { %1723 = vmatpush2.bf16.msra.mxu1 %v2484_v35  ;;  %1781 = vmatprep.subr.bf16.mxu0 %v2489_v38 }
  0xe1   : > { %1724 = vmatprep.subr.bf16.mxu1 %v2492_v39 }
  0xe3   : > { %1782 = vmatpush1.bf16.msra.mxu0 %v2487_v42 }
  0xe4   : > { %1725 = vmatpush2.bf16.msra.mxu1 %v2490_v43  ;;  %1783 = vmatprep.subr.bf16.mxu0 %v2495_v44 }
  0xe5   : > { %1848 = vmatprep.subr.bf16.mxu1 %v2498_v47 }
  0xe7   : > { %1727 = vmatmul.mubr.bf16.vlgmr.msra.gmra.mxu1 %v2995_v24  ;;  %1784 = vmatpush2.bf16.msra.mxu0 %v2493_v48  ;;  %v2510_v24 = vld [vmem:[%s2923_s7 + $0x38c] ss:$16 sps:$4 sm:$0xff]  }
  0xe8   : > { %1849 = vmatpush1.bf16.msra.mxu1 %v2496_v49  ;;  %1785 = vmatprep.subr.bf16.mxu0 %v2501_v51 }
  0xe9   : > { %1736 = vmatprep.mubr.bf16.mxu1 %v3006_v27  ;;  %1850 = vmatprep.subr.bf16.mxu1 %v2507_v53  ;;  %v2508_v27 = vld [vmem:[%s2923_s7 + $0x388] ss:$16 sps:$4 sm:$0xff]  }
  0xeb   : > { %1786 = vmatpush2.bf16.msra.mxu0 %v2499_v54 }
  0xec   : > { %1851 = vmatpush1.bf16.msra.mxu1 %v2505_v18  ;;  %1787 = vmatprep.subr.bf16.mxu0 %v2504_v55 }
  0xed   : > { %1852 = vmatprep.subr.bf16.mxu1 %v2516_v58 }
  0xef   : > { %1737 = vmatmul.mubr.bf16.gmra.mxu1 %v3027_v36  ;;  %1788 = vmatpush2.bf16.msra.mxu0 %v2502_v59  ;;  %v2517_v36 = vld [vmem:[%s2923_s7 + $0x348] ss:$16 sps:$4 sm:$0xff]  }
  0xf0   : > { %1746 = vmatprep.mubr.bf16.mxu1 %v3039_v40  ;;  %1789 = vmatprep.subr.bf16.mxu0 %v2510_v24  ;;  %v2522_v40 = vld [vmem:[%s2923_s7 + $0x32c] ss:$16 sps:$4 sm:$0xff]   ;;  %s2077_s7 = sshll.u32 %s449_s28, 6  ;;  %s2256_s28 = sshll.u32 (%p2604_p5), %s2070_s15, 5 }
  0xf1   : > { %1853 = vmatpush1.bf16.msra.mxu1 %v2514_v60  ;;  %s3228_s12 = scalar_lea.vmem [#allocation3], %s2077_s7  ;;  %s1982_s21 = scalar_lea.vmem (%p2604_p5), %s3275_s3, %s2256_s28 }
  0xf2   : > { %1854 = vmatprep.subr.bf16.mxu1 %v2525_v61 }
  0xf3   : > { %1790 = vmatpush2.bf16.msra.mxu0 %v2508_v27 }
  0xf4   : > { %1791 = vmatprep.subr.bf16.mxu0 %v2513_v62 }
  0xf5   : > { %1855 = vmatpush1.bf16.msra.mxu1 %v2523_v0 }
  0xf7   : > { %1747 = vmatmul.mubr.bf16.gmra.mxu1 %v3056_v45  ;;  %1792 = vmatpush2.bf16.msra.mxu0 %v2511_v1 }
  0xf8   : > { %1756 = vmatprep.mubr.bf16.mxu1 %v3069_v50  ;;  %1793 = vmatprep.subr.bf16.mxu0 %v2519_v2 }
  0xfb   : > { %1794 = vmatpush2.bf16.msra.mxu0 %v2517_v36 }
  0xfc   : > { %1795 = vmatprep.subr.bf16.mxu0 %v2522_v40 }
  0xff   : > { %1757 = vmatmul.mubr.bf16.gmra.mxu1 %v3087_v56  ;;  %1796 = vmatpush2.bf16.msra.mxu0 %v2520_v16 }
 0x100   : > { %1872 = vmatprep.mubr.bf16.mxu1 %v2553_v17  ;;  %1797 = vmatprep.subr.bf16.mxu0 %v2528_v3 }
 0x103   : > { %1798 = vmatpush2.bf16.msra.mxu0 %v2526_v4 }
 0x106   : > { %1800 = vmatmul.mubr.bf16.vlgmr.msra.gmra.mxu0 %v3000_v25 }
 0x107   : > { %2246 = vmatmul.mubr.msk.bf16.vlgmr.msra.gmra.mxu1 %vm1462_vm0, %v3106_v63  ;;  %1809 = vmatprep.mubr.bf16.mxu0 %v3013_v30 }
 0x108   : > { %1882 = vmatprep.mubr.bf16.mxu1 %v2553_v17 }
 0x10e   : > { %1810 = vmatmul.mubr.bf16.gmra.mxu0 %v3032_v37 }
 0x10f   : > { %2247 = vmatmul.mubr.msk.bf16.gmra.mxu1 %vm1462_vm0, %v3122_v7  ;;  %1819 = vmatprep.mubr.bf16.mxu0 %v3044_v41 }
 0x110   : > { %1892 = vmatprep.mubr.bf16.mxu1 %v2553_v17 }
 0x116   : > { %1820 = vmatmul.mubr.bf16.gmra.mxu0 %v3061_v46 }
 0x117   : > { %2248 = vmatmul.mubr.msk.bf16.gmra.mxu1 %vm1462_vm0, %v3143_v20  ;;  %1829 = vmatprep.mubr.bf16.mxu0 %v3075_v52 }
 0x118   : > { %1902 = vmatprep.mubr.bf16.mxu1 %v2553_v17 }
 0x11e   : > { %1830 = vmatmul.mubr.bf16.gmra.mxu0 %v3092_v57 }
 0x11f   : > { %2249 = vmatmul.mubr.msk.bf16.gmra.mxu1 %vm1462_vm0, %v3159_v33 }
 0x166   : > { %v1509_v25 = vpop.f32.mrf.mxu0 }
 0x167   : > { %v1582_v30 = vpop.f32.mrf.mxu1 }
 0x168   : > { %v1511_v37 = vpop.f32.mrf.mxu0  ;;  %v1583_v47 = vadd.f32 %v1582_v30, %v1509_v25 }
 0x169   : > { %v1584_v41 = vpop.f32.mrf.mxu1 }
 0x16a   : > { %v1513_v45 = vpop.f32.mrf.mxu0  ;;  %v1585_v51 = vadd.f32 %v1584_v41, %v1511_v37 }
 0x16b   : > { %v1586_v50 = vpop.f32.mrf.mxu1 }
 0x16c   : > { %v1515_v56 = vpop.f32.mrf.mxu0  ;;  %v1587_v53 = vadd.f32 %v1586_v50, %v1513_v45  ;;  %v3220_v45 = vpop.permute.xlu0 %1941 }
 0x16d   : > { %v1588_v63 = vpop.f32.mrf.mxu1 }
 0x16e   : > { %v1519_v46 = vpop.f32.mrf.mxu0  ;;  %v1589_v54 = vadd.f32 %v1588_v63, %v1515_v56 }
 0x16f   : > { %v1592_v7 = vpop.f32.mrf.mxu1 }
 0x170   : > { %v1521_v5 = vpop.f32.mrf.mxu0  ;;  %v1593_v48 = vadd.f32 %v1592_v7, %v1519_v46 }
 0x171   : > { %v1594_v17 = vpop.f32.mrf.mxu1 }
 0x172   : > { %v1523_v6 = vpop.f32.mrf.mxu0  ;;  %v1595_v18 = vadd.f32 %v1594_v17, %v1521_v5 }
 0x173   : > { %v1596_v10 = vpop.f32.mrf.mxu1 }
 0x174   : > { %v1525_v52 = vpop.f32.mrf.mxu0  ;;  %v1597_v58 = vadd.f32 %v1596_v10, %v1523_v6 }
 0x175   : > { %v1598_v13 = vpop.f32.mrf.mxu1 }
 0x176   : > { %v1529_v8 = vpop.f32.mrf.mxu0  ;;  %v1599_v61 = vadd.f32 %v1598_v13, %v1525_v52 }
 0x177   : > { %v1602_v19 = vpop.f32.mrf.mxu1 }
 0x178   : > { %v1531_v9 = vpop.f32.mrf.mxu0  ;;  %v1603_v59 = vadd.f32 %v1602_v19, %v1529_v8 }
 0x179   : > { %v1604_v22 = vpop.f32.mrf.mxu1 }
 0x17a   : > { %v1533_v57 = vpop.f32.mrf.mxu0  ;;  %v1605_v27 = vadd.f32 %v1604_v22, %v1531_v9 }
 0x17b   : > { %v1606_v28 = vpop.f32.mrf.mxu1 }
 0x17c   : > { %v1535_v11 = vpop.f32.mrf.mxu0  ;;  %v1607_v62 = vadd.f32 %v1606_v28, %v1533_v57 }
 0x17d   : > { %v1608_v32 = vpop.f32.mrf.mxu1 }
 0x17e   : > { %v1539_v12 = vpop.f32.mrf.mxu0  ;;  %v1609_v4 = vadd.f32 %v1608_v32, %v1535_v11 }
 0x17f   : > { %v1612_v35 = vpop.f32.mrf.mxu1 }
 0x180   : > { %v1541_v14 = vpop.f32.mrf.mxu0  ;;  %v1613_v24 = vadd.f32 %v1612_v35, %v1539_v12 }
 0x181   : > { %v1614_v42 = vpop.f32.mrf.mxu1 }
 0x182   : > { %v1543_v15 = vpop.f32.mrf.mxu0  ;;  %v1615_v2 = vadd.f32 %v1614_v42, %v1541_v14 }
 0x183   : > { %v1616_v49 = vpop.f32.mrf.mxu1 }
 0x184   : > { %v1545_v20 = vpop.f32.mrf.mxu0  ;;  %v1617_v25 = vadd.f32 %v1616_v49, %v1543_v15 }
 0x185   : > { %v1618_v36 = vpop.f32.mrf.mxu1 }
 0x186   : > { %v1655_v21 = vpop.f32.mrf.mxu0  ;;  %v1619_v5 = vadd.f32 %v1618_v36, %v1545_v20 }
 0x187   : > { %v1656_v40 = vadd.f32 %v1655_v21, %v1583_v47 }
 0x188   : > { %v1657_v23 = vpop.f32.mrf.mxu0 }
 0x189   : > { %v1658_v30 = vadd.f32 %v1657_v23, %v1585_v51 }
 0x18a   : > { %v1659_v26 = vpop.f32.mrf.mxu0 }
 0x18b   : > { %v1660_v6 = vadd.f32 %v1659_v26, %v1587_v53  ;;  %v3225_v26 = vpop.permute.xlu0 %1946 }
 0x18c   : > { %v1661_v29 = vpop.f32.mrf.mxu0 }
 0x18d   : > { %v1662_v11 = vadd.f32 %v1661_v29, %v1589_v54 }
 0x18e   : > { %v1665_v31 = vpop.f32.mrf.mxu0 }
 0x18f   : > { %v1666_v60 = vadd.f32 %v1665_v31, %v1593_v48 }
 0x190   : > { %v1667_v33 = vpop.f32.mrf.mxu0 }
 0x191   : > { %v1668_v0 = vadd.f32 %v1667_v33, %v1595_v18  ;;  %v1913_v50 = vmax.f32 %v1656_v40, %v1666_v60 }
 0x192   : > { %v1669_v34 = vpop.f32.mrf.mxu0 }
 0x193   : > { %v1670_v37 = vadd.f32 %v1669_v34, %v1597_v58  ;;  %v1914_v7 = vmax.f32 %v1658_v30, %v1668_v0 }
 0x194   : > { %v1671_v38 = vpop.f32.mrf.mxu0 }
 0x195   : > { %v1672_v52 = vadd.f32 %v1671_v38, %v1599_v61  ;;  %v1917_v12 = vmax.f32 %v1660_v6, %v1670_v37 }
 0x196   : > { %v1675_v39 = vpop.f32.mrf.mxu0 }
 0x197   : > { %v1676_v16 = vadd.f32 %v1675_v39, %v1603_v59  ;;  %v1918_v20 = vmax.f32 %v1662_v11, %v1672_v52 }
 0x198   : > { %v1677_v43 = vpop.f32.mrf.mxu0 }
 0x199   : > { %v1678_v56 = vadd.f32 %v1677_v43, %v1605_v27 }
 0x19a   : > { %v1679_v44 = vpop.f32.mrf.mxu0 }
 0x19b   : > { %v1680_v17 = vadd.f32 %v1679_v44, %v1607_v62 }
 0x19c   : > { %v1681_v55 = vpop.f32.mrf.mxu0 }
 0x19d   : > { %v1682_v13 = vadd.f32 %v1681_v55, %v1609_v4 }
 0x19e   : > { %v1685_v1 = vpop.f32.mrf.mxu0 }
 0x19f   : > { %v1686_v3 = vadd.f32 %v1685_v1, %v1613_v24 }
 0x1a0   : > { %v1687_v41 = vpop.f32.mrf.mxu0 }
 0x1a1   : > { %v1921_v46 = vmax.f32 %v1676_v16, %v1686_v3  ;;  %v1688_v63 = vadd.f32 %v1687_v41, %v1615_v2 }
 0x1a2   : > { %v1689_v8 = vpop.f32.mrf.mxu0 }
 0x1a3   : > { %v1929_v9 = vmax.f32 %v1913_v50, %v1921_v46  ;;  %v1922_v57 = vmax.f32 %v1678_v56, %v1688_v63  ;;  %v1690_v10 = vadd.f32 %v1689_v8, %v1617_v25 }
 0x1a4   : > { %v1691_v14 = vpop.f32.mrf.mxu0 }
 0x1a5   : > { %v1930_v15 = vmax.f32 %v1914_v7, %v1922_v57  ;;  %v1925_v19 = vmax.f32 %v1680_v17, %v1690_v10  ;;  %v1949_v21 = vadd.f32 %v3220_v45, %v1929_v9  ;;  %v1692_v22 = vadd.f32 %v1691_v14, %v1619_v5 }
 0x1a7   : > { %v1728_v23 = vpop.f32.mrf.mxu1  ;;  %v1933_v28 = vmax.f32 %v1917_v12, %v1925_v19  ;;  %v1950_v31 = vadd.f32 %v3220_v45, %v1930_v15  ;;  %v1957_v32 = vmax.f32 %v1949_v21, 0.0  ;;  %v1926_v33 = vmax.f32 %v1682_v13, %v1692_v22 }
 0x1a9   : > { %v1730_v34 = vpop.f32.mrf.mxu1  ;;  %v1958_v35 = vmax.f32 %v1950_v31, 0.0  ;;  %1965 = vst [vmem:[%s3228_s12] sm:$0xff] %v1957_v32  ;;  %v1934_v29 = vmax.f32 %v1918_v20, %v1926_v33  ;;  %v1953_v38 = vadd.f32 %v3225_v26, %v1933_v28 }
 0x1ab   : > { %v1732_v39 = vpop.f32.mrf.mxu1  ;;  %1966 = vst [vmem:[%s3228_s12 + $0x8] sm:$0xff] %v1958_v35  ;;  %v1954_v42 = vadd.f32 %v3225_v26, %v1934_v29  ;;  %v1961_v43 = vmax.f32 %v1953_v38, 0.0 }
 0x1ad   : > { %v1734_v44 = vpop.f32.mrf.mxu1  ;;  %v1962_v47 = vmax.f32 %v1954_v42, 0.0  ;;  %1969 = vst [vmem:[%s3228_s12 + $0x20] sm:$0xff] %v1961_v43 }
 0x1af   : > { %v1738_v48 = vpop.f32.mrf.mxu1  ;;  %1970 = vst [vmem:[%s3228_s12 + $0x28] sm:$0xff] %v1962_v47 }
 0x1b1   : > { %v1740_v49 = vpop.f32.mrf.mxu1 }
 0x1b3   : > { %v1742_v51 = vpop.f32.mrf.mxu1 }
 0x1b5   : > { %v1744_v53 = vpop.f32.mrf.mxu1 }
 0x1b7   : > { %v1748_v54 = vpop.f32.mrf.mxu1 }
 0x1b9   : > { %v1750_v18 = vpop.f32.mrf.mxu1 }
 0x1bb   : > { %v1752_v55 = vpop.f32.mrf.mxu1 }
 0x1bd   : > { %v1754_v58 = vpop.f32.mrf.mxu1 }
 0x1bf   : > { %v1758_v59 = vpop.f32.mrf.mxu1 }
 0x1c1   : > { %v1760_v24 = vpop.f32.mrf.mxu1 }
 0x1c3   : > { %v1762_v60 = vpop.f32.mrf.mxu1 }
 0x1c5   : > { %v3236_v61 = vpop.f32.mrf.mxu1 }
 0x1c6   : > { %v1801_v27 = vpop.f32.mrf.mxu0 }
 0x1c7   : > { %v1874_v62 = vpop.f32.mrf.mxu1  ;;  %v1802_v17 = vadd.f32 %v1801_v27, %v1728_v23 }
 0x1c8   : > { %v1803_v0 = vpop.f32.mrf.mxu0 }
 0x1c9   : > { %v1876_v1 = vpop.f32.mrf.mxu1  ;;  %v1804_v11 = vadd.f32 %v1803_v0, %v1730_v34  ;;  %v1875_v21 = vadd.f32 %v1874_v62, %v1802_v17 }
 0x1ca   : > { %v1805_v2 = vpop.f32.mrf.mxu0 }
 0x1cb   : > { %v1878_v36 = vpop.f32.mrf.mxu1  ;;  %v1806_v28 = vadd.f32 %v1805_v2, %v1732_v39  ;;  %v1877_v38 = vadd.f32 %v1876_v1, %v1804_v11 }
 0x1cc   : > { %v1807_v40 = vpop.f32.mrf.mxu0 }
 0x1cd   : > { %v1880_v16 = vpop.f32.mrf.mxu1  ;;  %v1808_v47 = vadd.f32 %v1807_v40, %v1734_v44  ;;  %v1879_v39 = vadd.f32 %v1878_v36, %v1806_v28 }
 0x1ce   : > { %v1811_v3 = vpop.f32.mrf.mxu0 }
 0x1cf   : > { %v1884_v4 = vpop.f32.mrf.mxu1  ;;  %v1812_v7 = vadd.f32 %v1811_v3, %v1738_v48  ;;  %v1881_v40 = vadd.f32 %v1880_v16, %v1808_v47 }
 0x1d0   : > { %v1813_v25 = vpop.f32.mrf.mxu0 }
 0x1d1   : > { %v1886_v30 = vpop.f32.mrf.mxu1  ;;  %v1814_v9 = vadd.f32 %v1813_v25, %v1740_v49  ;;  %v1885_v13 = vadd.f32 %v1884_v4, %v1812_v7 }
 0x1d2   : > { %v1815_v37 = vpop.f32.mrf.mxu0 }
 0x1d3   : > { %v1888_v41 = vpop.f32.mrf.mxu1  ;;  %v1816_v14 = vadd.f32 %v1815_v37, %v1742_v51  ;;  %v1887_v31 = vadd.f32 %v1886_v30, %v1814_v9  ;;  %v1915_v34 = vmax.f32 %v1875_v21, %v1885_v13  ;;  %v2003_v9 = vld [vmem:[%s3228_s12 + $0x20] sm:$0xff] (%p2604_p5) }
 0x1d4   : > { %v1817_v50 = vpop.f32.mrf.mxu0  ;;  %2004 = vst [vmem:[%s1982_s21 + $0x40] sm:$0xff] (%p2604_p5), %v2003_v9 }
 0x1d5   : > { %v1890_v56 = vpop.f32.mrf.mxu1  ;;  %v1818_v32 = vadd.f32 %v1817_v50, %v1744_v53  ;;  %v1889_v48 = vadd.f32 %v1888_v41, %v1816_v14  ;;  %v1916_v0 = vmax.f32 %v1877_v38, %v1887_v31 }
 0x1d6   : > { %v1821_v46 = vpop.f32.mrf.mxu0 }
 0x1d7   : > { %v1894_v63 = vpop.f32.mrf.mxu1  ;;  %v1822_v12 = vadd.f32 %v1821_v46, %v1748_v54  ;;  %v1891_v53 = vadd.f32 %v1890_v56, %v1818_v32 }
 0x1d8   : > { %v1823_v5 = vpop.f32.mrf.mxu0 }
 0x1d9   : > { %v1896_v6 = vpop.f32.mrf.mxu1  ;;  %v1824_v22 = vadd.f32 %v1823_v5, %v1750_v18  ;;  %v1895_v23 = vadd.f32 %v1894_v63, %v1822_v12  ;;  %v1920_v41 = vmax.f32 %v1881_v40, %v1891_v53 }
 0x1da   : > { %v1825_v52 = vpop.f32.mrf.mxu0 }
 0x1db   : > { %v1898_v8 = vpop.f32.mrf.mxu1  ;;  %v1826_v33 = vadd.f32 %v1825_v52, %v1752_v55  ;;  %v1897_v27 = vadd.f32 %v1896_v6, %v1824_v22 }
 0x1dc   : > { %v1827_v57 = vpop.f32.mrf.mxu0 }
 0x1dd   : > { %v1900_v10 = vpop.f32.mrf.mxu1  ;;  %v1828_v49 = vadd.f32 %v1827_v57, %v1754_v58  ;;  %v1899_v55 = vadd.f32 %v1898_v8, %v1826_v33  ;;  %v1919_v58 = vmax.f32 %v1879_v39, %v1889_v48  ;;  %v1997_v8 = vld [vmem:[%s3228_s12 + $0x8] sm:$0xff] (%p2604_p5) }
 0x1de   : > { %v1831_v15 = vpop.f32.mrf.mxu0  ;;  %v2005_v57 = vld [vmem:[%s3228_s12 + $0x28] sm:$0xff] (%p2604_p5)  ;;  %1998 = vst [vmem:[%s1982_s21 + $0x8] sm:$0xff] (%p2604_p5), %v1997_v8 }
 0x1df   : > { %v1904_v19 = vpop.f32.mrf.mxu1  ;;  %v1832_v20 = vadd.f32 %v1831_v15, %v1758_v59  ;;  %v1901_v25 = vadd.f32 %v1900_v10, %v1828_v49  ;;  %2006 = vst [vmem:[%s1982_s21 + $0x48] sm:$0xff] (%p2604_p5), %v2005_v57 }
 0x1e0   : > { %v1833_v35 = vpop.f32.mrf.mxu0 }
 0x1e1   : > { %v1906_v29 = vpop.f32.mrf.mxu1  ;;  %v1905_v42 = vadd.f32 %v1904_v19, %v1832_v20  ;;  %v1834_v43 = vadd.f32 %v1833_v35, %v1760_v24 }
 0x1e2   : > { %v1835_v51 = vpop.f32.mrf.mxu0 }
 0x1e3   : > { %v1908_v54 = vpop.f32.mrf.mxu1  ;;  %v1923_v62 = vmax.f32 %v1895_v23, %v1905_v42  ;;  %v1907_v18 = vadd.f32 %v1906_v29, %v1834_v43  ;;  %v1836_v59 = vadd.f32 %v1835_v51, %v1762_v60 }
 0x1e4   : > { %v1837_v2 = vpop.f32.mrf.mxu0 }
 0x1e5   : > { %v1910_v3 = vpop.f32.mrf.mxu1  ;;  %v1931_v1 = vmax.f32 %v1915_v34, %v1923_v62  ;;  %v1924_v4 = vmax.f32 %v1897_v27, %v1907_v18  ;;  %v1909_v24 = vadd.f32 %v1908_v54, %v1836_v59  ;;  %v1838_v44 = vadd.f32 %v1837_v2, %v3236_v61 }
 0x1e7   : > { %v1951_v30 = vadd.f32 %v3220_v45, %v1931_v1  ;;  %v1932_v60 = vmax.f32 %v1916_v0, %v1924_v4  ;;  %v1927_v36 = vmax.f32 %v1899_v55, %v1909_v24  ;;  %v1911_v37 = vadd.f32 %v1910_v3, %v1838_v44 }
 0x1e9   : > { %v1959_v50 = vmax.f32 %v1951_v30, 0.0  ;;  %v1952_v56 = vadd.f32 %v3220_v45, %v1932_v60  ;;  %v1935_v46 = vmax.f32 %v1919_v58, %v1927_v36  ;;  %v1928_v63 = vmax.f32 %v1901_v25, %v1911_v37  ;;  %v1995_v45 = vld [vmem:[%s3228_s12] sm:$0xff] (%p2604_p5) }
 0x1ea   : > { %1996 = vst [vmem:[%s1982_s21] sm:$0xff] (%p2604_p5), %v1995_v45 }
 0x1eb   : > { %1967 = vst [vmem:[%s3228_s12 + $0x10] sm:$0xff] %v1959_v50  ;;  %v1960_v5 = vmax.f32 %v1952_v56, 0.0  ;;  %v1955_v61 = vadd.f32 %v3225_v26, %v1935_v46  ;;  %v1936_v16 = vmax.f32 %v1920_v41, %v1928_v63 }
 0x1ed   : > { %1968 = vst [vmem:[%s3228_s12 + $0x18] sm:$0xff] %v1960_v5  ;;  %v1963_v6 = vmax.f32 %v1955_v61, 0.0  ;;  %v1956_v7 = vadd.f32 %v3225_v26, %v1936_v16  ;;  %1979 = sbr.rel (!%p2604_p5) target bundleno = 506 (0x1fa), region = 59 }
 0x1ef   : > { %1971 = vst [vmem:[%s3228_s12 + $0x30] sm:$0xff] %v1963_v6  ;;  %v1964_v52 = vmax.f32 %v1956_v7, 0.0 }
 0x1f1   : > { %1972 = vst [vmem:[%s3228_s12 + $0x38] sm:$0xff] %v1964_v52 }
 0x1f2   : > { %v1999_v26 = vld [vmem:[%s3228_s12 + $0x10] sm:$0xff] }
 0x1f3   : > { %2000 = vst [vmem:[%s1982_s21 + $0x10] sm:$0xff] %v1999_v26 }
 0x1f4   : > { %v2001_v17 = vld [vmem:[%s3228_s12 + $0x18] sm:$0xff] }
 0x1f5   : > { %2002 = vst [vmem:[%s1982_s21 + $0x18] sm:$0xff] %v2001_v17 }
 0x1f6   : > { %v2007_v10 = vld [vmem:[%s3228_s12 + $0x30] sm:$0xff] }
 0x1f7   : > { %2008 = vst [vmem:[%s1982_s21 + $0x50] sm:$0xff] %v2007_v10 }
 0x1f8   : > { %v2009_v11 = vld [vmem:[%s3228_s12 + $0x38] sm:$0xff] }
 0x1f9   : > { %2010 = vst [vmem:[%s1982_s21 + $0x58] sm:$0xff] %v2009_v11 }
 0x1fa PF: > { %p10_p10 = scmp.ge.s32.totalorder %s2591_s16, 4   ;;  %s3277_s12 = smov %s2547_s13 }
 0x1fb   : > { %s3278_s13 = smov %s2602_s19  ;;  %s3279_s14 = smov %s2591_s16 }
 0x1fc   :  { %12 = sbr.rel (!%p10_p10) target bundleno = 2 (0x2), region = 113 }

// kernel: gymn_forward.6
= control target key start
LH: loop header
LB: loop body
LE: loop exit
PB: predicated region body
PF: predicated region fallthrough
CT: control target
= control target key end

     0   :  { %v901_v1 = vmov 0   ;;  %vm427_vm0 = vcmask 523264   ;;  %s1102_s0 = inlined_call_operand.vmem [shape: bf16[576,128], index: 0, kind: input, shape index: {}]   ;;  %s1103_s1 = inlined_call_operand.vmem [shape: bf16[64,576], index: 1, kind: input, shape index: {}]   ;;  %s1104_s2 = inlined_call_operand.vmem [shape: f32[16,1], index: 2, kind: input, shape index: {}]   ;;  %s1105_s3 = inlined_call_operand.vmem [shape: f32[16,128], index: 3, kind: output, shape index: {}]  }
   0x1   :  { %v837_v0 = vld [vmem:[%s1102_s0 + $0x78] sm:$0xff]   ;;  %836 = vset.pattern.permute.xlu0 %v901_v1  ;;  %v841_v5 = vld [vmem:[%s1102_s0 + $0x70] sm:$0xff]   ;;  %v845_v9 = vld [vmem:[%s1102_s0 + $0x68] sm:$0xff]  }
   0x2   :  { %v838_v2 = vld [vmem:[%s1102_s0 + $0xf8] sm:$0xff]   ;;  %723 = vmatprep.subr.bf16.mxu0 %v837_v0  ;;  %v842_v6 = vld [vmem:[%s1102_s0 + $0xf0] sm:$0xff]   ;;  %v846_v10 = vld [vmem:[%s1102_s0 + $0xe8] sm:$0xff]  }
   0x3   :  { %v839_v3 = vld [vmem:[%s1102_s0 + $0x38] sm:$0xff]   ;;  %763 = vmatprep.subr.bf16.mxu1 %v838_v2  ;;  %v843_v7 = vld [vmem:[%s1102_s0 + $0x30] sm:$0xff]   ;;  %v847_v11 = vld [vmem:[%s1102_s0 + $0x28] sm:$0xff]  }
   0x4   :  { %v840_v4 = vld [vmem:[%s1102_s0 + $0xb8] sm:$0xff]   ;;  %724 = vmatpush3.bf16.msra.mxu0 %v839_v3  ;;  %v844_v8 = vld [vmem:[%s1102_s0 + $0xb0] sm:$0xff]   ;;  %v848_v12 = vld [vmem:[%s1102_s0 + $0xa8] sm:$0xff]  }
   0x5   :  { %764 = vmatpush3.bf16.msra.mxu1 %v840_v4  ;;  %725 = vmatprep.subr.bf16.mxu0 %v841_v5  ;;  %v849_v13 = vld [vmem:[%s1102_s0 + $0x60] sm:$0xff]   ;;  %v853_v17 = vld [vmem:[%s1102_s0 + $0x58] sm:$0xff]   ;;  %v857_v21 = vld [vmem:[%s1102_s0 + $0x50] sm:$0xff]  }
   0x6   :  { %765 = vmatprep.subr.bf16.mxu1 %v842_v6  ;;  %v850_v14 = vld [vmem:[%s1102_s0 + $0xe0] sm:$0xff]   ;;  %v854_v18 = vld [vmem:[%s1102_s0 + $0xd8] sm:$0xff]   ;;  %v858_v22 = vld [vmem:[%s1102_s0 + $0xd0] sm:$0xff]  }
   0x7   :  { %v851_v15 = vld [vmem:[%s1102_s0 + $0x20] sm:$0xff]   ;;  %v855_v19 = vld [vmem:[%s1102_s0 + $0x18] sm:$0xff]   ;;  %v859_v23 = vld [vmem:[%s1102_s0 + $0x10] sm:$0xff]  }
   0x8   :  { %726 = vmatpush3.bf16.msra.mxu0 %v843_v7  ;;  %v852_v16 = vld [vmem:[%s1102_s0 + $0xa0] sm:$0xff]   ;;  %v856_v20 = vld [vmem:[%s1102_s0 + $0x98] sm:$0xff]   ;;  %v860_v24 = vld [vmem:[%s1102_s0 + $0x90] sm:$0xff]  }
   0x9   :  { %766 = vmatpush3.bf16.msra.mxu1 %v844_v8  ;;  %727 = vmatprep.subr.bf16.mxu0 %v845_v9  ;;  %v861_v25 = vld [vmem:[%s1102_s0 + $0x48] sm:$0xff]   ;;  %v865_v29 = vld [vmem:[%s1102_s0 + $0x40] sm:$0xff]   ;;  %v875_v37 = vld [vmem:[%s1102_s0 + $0x118] sm:$0xff]  }
   0xa   :  { %767 = vmatprep.subr.bf16.mxu1 %v846_v10  ;;  %v862_v26 = vld [vmem:[%s1102_s0 + $0xc8] sm:$0xff]   ;;  %v866_v30 = vld [vmem:[%s1102_s0 + $0xc0] sm:$0xff]   ;;  %v882_v40 = vld [vmem:[%s1102_s0 + $0x110] sm:$0xff]  }
   0xb   :  { %v863_v27 = vld [vmem:[%s1102_s0 + $0x8] sm:$0xff]   ;;  %v867_v31 = vld [vmem:[%s1102_s0] sm:$0xff]   ;;  %v885_v44 = vld [vmem:[%s1103_s1 + $0x5c] ss:$20 sps:$4 sm:$0xff]  }
   0xc   :  { %728 = vmatpush3.bf16.msra.mxu0 %v847_v11  ;;  %v864_v28 = vld [vmem:[%s1102_s0 + $0x88] sm:$0xff]   ;;  %v868_v32 = vld [vmem:[%s1102_s0 + $0x80] sm:$0xff]   ;;  %v890_v49 = vld [vmem:[%s1103_s1 + $0x7c] ss:$20 sps:$4 sm:$0xff]  }
   0xd   :  { %768 = vmatpush3.bf16.msra.mxu1 %v848_v12  ;;  %729 = vmatprep.subr.bf16.mxu0 %v849_v13  ;;  %v869_v33 = vld [vmem:[%s1103_s1] ss:$20 sps:$4 sm:$0xff]   ;;  %v871_v34 = vld [vmem:[%s1103_s1 + $0x4] ss:$20 sps:$4 sm:$0xff]   ;;  %v872_v35 = vld [vmem:[%s1103_s1 + $0x8] ss:$20 sps:$4 sm:$0xff]  }
   0xe   :  { %769 = vmatprep.subr.bf16.mxu1 %v850_v14  ;;  %v874_v36 = vld [vmem:[%s1103_s1 + $0xc] ss:$20 sps:$4 sm:$0xff]   ;;  %472 = vmatprep.mubr.bf16.mxu0 %v871_v34  ;;  %v878_v39 = vld [vmem:[%s1103_s1 + $0x34] ss:$20 sps:$4 sm:$0xff]   ;;  %v881_v42 = vld [vmem:[%s1103_s1 + $0x30] ss:$20 sps:$4 sm:$0xff]  }
   0xf   :  { %537 = vmatprep.mubr.bf16.mxu1 %v874_v36  ;;  %v876_v38 = vld [vmem:[%s1103_s1 + $0x2c] ss:$20 sps:$4 sm:$0xff]   ;;  %v880_v41 = vld [vmem:[%s1103_s1 + $0x28] ss:$20 sps:$4 sm:$0xff]   ;;  %v887_v47 = vld [vmem:[%s1103_s1 + $0x50] ss:$20 sps:$4 sm:$0xff]  }
  0x10   :  { %730 = vmatpush3.bf16.msra.mxu0 %v851_v15  ;;  %v883_v43 = vld [vmem:[%s1103_s1 + $0x54] ss:$20 sps:$4 sm:$0xff]   ;;  %v896_v46 = vld [vmem:[%s1102_s0 + $0x100] sm:$0xff]   ;;  %v888_v48 = vld [vmem:[%s1103_s1 + $0x58] ss:$20 sps:$4 sm:$0xff]  }
  0x11   :  { %770 = vmatpush3.bf16.msra.mxu1 %v852_v16  ;;  %731 = vmatprep.subr.bf16.mxu0 %v853_v17  ;;  %v889_v45 = vld [vmem:[%s1102_s0 + $0x108] sm:$0xff]   ;;  %v892_v50 = vld [vmem:[%s1103_s1 + $0x84] ss:$20 sps:$4 sm:$0xff]   ;;  %v895_v54 = vld [vmem:[%s1103_s1 + $0x80] ss:$20 sps:$4 sm:$0xff]  }
  0x12   :  { %771 = vmatprep.subr.bf16.mxu1 %v854_v18  ;;  %v641_v51 = vld [vmem:[%s1104_s2] sm:$0xff]  ;;  %v642_v52 = vld [vmem:[%s1104_s2 + $0x8] sm:$0xff] }
  0x13   :  { %645 = vperm.xlu0 %836, %v641_v51   ;;  %v894_v53 = vld [vmem:[%s1103_s1 + $0x78] ss:$20 sps:$4 sm:$0xff]   ;;  %v897_v55 = vld [vmem:[%s1103_s1 + $0x10] ss:$20 sps:$4 sm:$0xff]   ;;  %v898_v56 = vld [vmem:[%s1103_s1 + $0x60] ss:$20 sps:$4 sm:$0xff]  }
  0x14   :  { %732 = vmatpush3.bf16.msra.mxu0 %v855_v19  ;;  %v899_v57 = vld [vmem:[%s1103_s1 + $0x38] ss:$20 sps:$4 sm:$0xff]   ;;  %v900_v58 = vld [vmem:[%s1103_s1 + $0x88] ss:$20 sps:$4 sm:$0xff]  }
  0x15   :  { %772 = vmatpush3.bf16.msra.mxu1 %v856_v20  ;;  %733 = vmatprep.subr.bf16.mxu0 %v857_v21 }
  0x16   :  { %773 = vmatprep.subr.bf16.mxu1 %v858_v22 }
  0x17   :  { %650 = vperm.xlu0 %836, %v642_v52  }
  0x18   :  { %734 = vmatpush3.bf16.msra.mxu0 %v859_v23 }
  0x19   :  { %774 = vmatpush3.bf16.msra.mxu1 %v860_v24  ;;  %735 = vmatprep.subr.bf16.mxu0 %v861_v25 }
  0x1a   :  { %775 = vmatprep.subr.bf16.mxu1 %v862_v26 }
  0x1c   :  { %736 = vmatpush3.bf16.msra.mxu0 %v863_v27 }
  0x1d   :  { %776 = vmatpush3.bf16.msra.mxu1 %v864_v28  ;;  %737 = vmatprep.subr.bf16.mxu0 %v865_v29 }
  0x1e   :  { %777 = vmatprep.subr.bf16.mxu1 %v866_v30 }
  0x20   :  { %738 = vmatpush3.bf16.msra.mxu0 %v867_v31 }
  0x21   :  { %778 = vmatpush3.bf16.msra.mxu1 %v868_v32  ;;  %811 = vmatprep.subr.bf16.mxu0 %v875_v37 }
  0x22   :  { %827 = vmatprep.subr.bf16.mxu1 %v875_v37 }
  0x23   :  { %473 = vmatmul.mubr.bf16.vlgmr.msra.gmra.mxu0 %v869_v33 }
  0x24   :  { %538 = vmatmul.mubr.bf16.vlgmr.msra.gmra.mxu1 %v872_v35  ;;  %812 = vmatpush3.bf16.msra.mxu0 %v875_v37 }
  0x25   :  { %831 = vmatpush3.bf16.msra.mxu1 %v875_v37  ;;  %480 = vmatprep.mubr.bf16.mxu0 %v876_v38 }
  0x26   :  { %545 = vmatprep.mubr.bf16.mxu1 %v878_v39  ;;  %813 = vmatprep.subr.bf16.mxu0 %v882_v40 }
  0x27   :  { %828 = vmatprep.subr.bf16.mxu1 %v882_v40 }
  0x28   :  { %814 = vmatpush3.bf16.msra.mxu0 %v882_v40 }
  0x29   :  { %832 = vmatpush3.bf16.msra.mxu1 %v882_v40  ;;  %815 = vmatprep.subr.bf16.mxu0 %v889_v45 }
  0x2a   :  { %829 = vmatprep.subr.bf16.mxu1 %v889_v45 }
  0x2b   :  { %481 = vmatmul.mubr.bf16.gmra.mxu0 %v880_v41 }
  0x2c   :  { %546 = vmatmul.mubr.bf16.gmra.mxu1 %v881_v42  ;;  %488 = vmatprep.mubr.bf16.mxu0 %v883_v43 }
  0x2d   :  { %553 = vmatprep.mubr.bf16.mxu1 %v885_v44  ;;  %816 = vmatpush3.bf16.msra.mxu0 %v889_v45 }
  0x2e   :  { %833 = vmatpush3.bf16.msra.mxu1 %v889_v45  ;;  %817 = vmatprep.subr.bf16.mxu0 %v896_v46 }
  0x2f   :  { %830 = vmatprep.subr.bf16.mxu1 %v896_v46 }
  0x31   :  { %818 = vmatpush3.bf16.msra.mxu0 %v896_v46 }
  0x32   :  { %834 = vmatpush3.bf16.msra.mxu1 %v896_v46 }
  0x33   :  { %489 = vmatmul.mubr.bf16.gmra.mxu0 %v887_v47 }
  0x34   :  { %554 = vmatmul.mubr.bf16.gmra.mxu1 %v888_v48  ;;  %496 = vmatprep.mubr.bf16.mxu0 %v890_v49 }
  0x35   :  { %561 = vmatprep.mubr.bf16.mxu1 %v892_v50 }
  0x3b   :  { %497 = vmatmul.mubr.bf16.gmra.mxu0 %v894_v53 }
  0x3c   :  { %562 = vmatmul.mubr.bf16.gmra.mxu1 %v895_v54  ;;  %819 = vmatprep.mubr.msk.bf16.mxu0 %vm427_vm0, %v897_v55 }
  0x3d   :  { %823 = vmatprep.mubr.msk.bf16.mxu1 %vm427_vm0, %v898_v56 }
  0x43   :  { %820 = vmatmul.mubr.msk.bf16.vlgmr.msra.gmra.mxu0 %vm427_vm0, %v899_v57 }
  0x44   :  { %824 = vmatmul.mubr.msk.bf16.vlgmr.msra.gmra.mxu1 %vm427_vm0, %v900_v58 }
  0xe3   :  { %v739_v59 = vpop.f32.mrf.mxu0 }
  0xe4   :  { %v779_v60 = vpop.f32.mrf.mxu1 }
  0xe5   :  { %v740_v61 = vpop.f32.mrf.mxu0 }
  0xe6   :  { %v780_v62 = vpop.f32.mrf.mxu1  ;;  %v741_v23 = vadd.f32 %v740_v61, %v739_v59 }
  0xe7   :  { %v742_v63 = vpop.f32.mrf.mxu0  ;;  %v781_v24 = vadd.f32 %v780_v62, %v779_v60 }
  0xe8   :  { %v782_v0 = vpop.f32.mrf.mxu1 }
  0xe9   :  { %v743_v1 = vpop.f32.mrf.mxu0  ;;  %v540_v39 = vadd.f32 %v781_v24, %v741_v23 }
  0xea   :  { %v783_v2 = vpop.f32.mrf.mxu1  ;;  %v744_v35 = vadd.f32 %v743_v1, %v742_v63  ;;  %v646_v1 = vpop.permute.xlu0 %645 }
  0xeb   :  { %v745_v3 = vpop.f32.mrf.mxu0  ;;  %v784_v36 = vadd.f32 %v783_v2, %v782_v0 }
  0xec   :  { %v785_v4 = vpop.f32.mrf.mxu1 }
  0xed   :  { %v746_v5 = vpop.f32.mrf.mxu0  ;;  %v543_v59 = vadd.f32 %v784_v36, %v744_v35 }
  0xee   :  { %v786_v6 = vpop.f32.mrf.mxu1  ;;  %v747_v25 = vadd.f32 %v746_v5, %v745_v3 }
  0xef   :  { %v748_v7 = vpop.f32.mrf.mxu0  ;;  %v787_v26 = vadd.f32 %v786_v6, %v785_v4 }
  0xf0   :  { %v788_v8 = vpop.f32.mrf.mxu1 }
  0xf1   :  { %v749_v9 = vpop.f32.mrf.mxu0  ;;  %v548_v37 = vadd.f32 %v787_v26, %v747_v25 }
  0xf2   :  { %v789_v10 = vpop.f32.mrf.mxu1  ;;  %v750_v40 = vadd.f32 %v749_v9, %v748_v7 }
  0xf3   :  { %v751_v11 = vpop.f32.mrf.mxu0  ;;  %v790_v41 = vadd.f32 %v789_v10, %v788_v8 }
  0xf4   :  { %v791_v12 = vpop.f32.mrf.mxu1 }
  0xf5   :  { %v752_v13 = vpop.f32.mrf.mxu0  ;;  %v551_v57 = vadd.f32 %v790_v41, %v750_v40 }
  0xf6   :  { %v792_v14 = vpop.f32.mrf.mxu1  ;;  %v753_v28 = vadd.f32 %v752_v13, %v751_v11 }
  0xf7   :  { %v754_v15 = vpop.f32.mrf.mxu0  ;;  %v793_v29 = vadd.f32 %v792_v14, %v791_v12  ;;  %v651_v12 = vpop.permute.xlu0 %650 }
  0xf8   :  { %v794_v16 = vpop.f32.mrf.mxu1 }
  0xf9   :  { %v755_v17 = vpop.f32.mrf.mxu0  ;;  %v556_v44 = vadd.f32 %v793_v29, %v753_v28 }
  0xfa   :  { %v795_v18 = vpop.f32.mrf.mxu1  ;;  %v756_v42 = vadd.f32 %v755_v17, %v754_v15 }
  0xfb   :  { %v757_v19 = vpop.f32.mrf.mxu0  ;;  %v796_v45 = vadd.f32 %v795_v18, %v794_v16 }
  0xfc   :  { %v797_v20 = vpop.f32.mrf.mxu1 }
  0xfd   :  { %v758_v21 = vpop.f32.mrf.mxu0  ;;  %v559_v63 = vadd.f32 %v796_v45, %v756_v42 }
  0xfe   :  { %v798_v22 = vpop.f32.mrf.mxu1  ;;  %v759_v31 = vadd.f32 %v758_v21, %v757_v19 }
  0xff   :  { %v760_v27 = vpop.f32.mrf.mxu0  ;;  %v799_v32 = vadd.f32 %v798_v22, %v797_v20 }
 0x100   :  { %v800_v30 = vpop.f32.mrf.mxu1 }
 0x101   :  { %v761_v33 = vpop.f32.mrf.mxu0  ;;  %v564_v48 = vadd.f32 %v799_v32, %v759_v31 }
 0x102   :  { %v801_v34 = vpop.f32.mrf.mxu1  ;;  %v762_v46 = vadd.f32 %v761_v33, %v760_v27 }
 0x103   :  { %v821_v38 = vpop.f32.mrf.mxu0  ;;  %v802_v47 = vadd.f32 %v801_v34, %v800_v30 }
 0x104   :  { %v825_v43 = vpop.f32.mrf.mxu1  ;;  %v613_v50 = vadd.f32 %v821_v38, %v548_v37 }
 0x105   :  { %v604_v49 = vpop.f32.mrf.mxu0  ;;  %v629_v53 = vadd.f32 %v825_v43, %v564_v48  ;;  %v567_v61 = vadd.f32 %v802_v47, %v762_v46 }
 0x106   :  { %v605_v51 = vadd.f32 %v604_v49, %v540_v39  ;;  %v620_v52 = vpop.f32.mrf.mxu1 }
 0x107   :  { %v621_v54 = vadd.f32 %v620_v52, %v556_v44  ;;  %v822_v55 = vpop.f32.mrf.mxu0 }
 0x108   :  { %v635_v56 = vmax.f32 %v605_v51, %v613_v50  ;;  %v826_v58 = vpop.f32.mrf.mxu1  ;;  %v616_v0 = vadd.f32 %v822_v55, %v551_v57 }
 0x109   :  { %v637_v60 = vmax.f32 %v621_v54, %v629_v53  ;;  %v607_v62 = vpop.f32.mrf.mxu0  ;;  %v632_v4 = vadd.f32 %v826_v58, %v567_v61 }
 0x10a   :  { %v608_v2 = vadd.f32 %v607_v62, %v543_v59  ;;  %v623_v3 = vpop.f32.mrf.mxu1 }
 0x10b   :  { %v639_v5 = vmax.f32 %v635_v56, %v637_v60  ;;  %v624_v6 = vadd.f32 %v623_v3, %v559_v63 }
 0x10c   :  { %v636_v7 = vmax.f32 %v608_v2, %v616_v0 }
 0x10d   :  { %v653_v8 = vadd.f32 %v646_v1, %v639_v5  ;;  %v638_v9 = vmax.f32 %v624_v6, %v632_v4 }
 0x10f   :  { %v655_v10 = vmax.f32 %v653_v8, 0.0  ;;  %v640_v11 = vmax.f32 %v636_v7, %v638_v9 }
 0x111   :  { %657 = vst [vmem:[%s1105_s3] sm:$0xff] %v655_v10  ;;  %v654_v13 = vadd.f32 %v651_v12, %v640_v11 }
 0x113   :  { %v656_v14 = vmax.f32 %v654_v13, 0.0 }
 0x115   :  { %658 = vst [vmem:[%s1105_s3 + $0x8] sm:$0xff] %v656_v14 }

// kernel: gymn_forward.7
= control target key start
LH: loop header
LB: loop body
LE: loop exit
PB: predicated region body
PF: predicated region fallthrough
CT: control target
= control target key end

     0   :  { %v70_v3 = vlaneseq  ;;  %v486_v5 = vmov 0.0   ;;  %v487_v6 = vmov 1983009808   ;;  %vm488_vm0 = vmmov 0   ;;  %s708_s0 = inlined_call_operand.vmem [shape: f32[2,288], index: 0, kind: input, shape index: {}]   ;;  %s709_s1 = inlined_call_operand.vmem [shape: f32[288,100], index: 1, kind: input, shape index: {}]   ;;  %s710_s2 = inlined_call_operand.vmem [shape: f32[1,100], index: 2, kind: input, shape index: {}]   ;;  %s711_s3 = inlined_call_operand.vmem [shape: f32[100,11], index: 3, kind: input, shape index: {}]   ;;  %s712_s4 = inlined_call_operand.vmem [shape: f32[1,11], index: 4, kind: input, shape index: {}]   ;;  %s713_s5 = inlined_call_operand.hbm [shape: f32[2,11], index: 5, kind: output, shape index: {}]  }
   0x1   :  { %v53_v0 = vld [vmem:[%s709_s1 + $0xf8] sm:$0xff]  ;;  %v52_v2 = vld [vmem:[%s709_s1 + $0xf0] sm:$0xff]  ;;  %415 = vmatprep.subr.mxu1 %v486_v5  ;;  %v68_v7 = vunpack.c.l.s4 %v487_v6  ;;  %v51_v8 = vld [vmem:[%s709_s1 + $0xe8] sm:$0xff]  ;;  %423 = vmatprep.mubr.msk.f32.mxu1 %vm488_vm0, %v486_v5 }
   0x2   :  { %v37_v1 = vld [vmem:[%s709_s1 + $0x78] sm:$0xff]  ;;  %361 = vmatprep.subr.mxu0 %v53_v0  ;;  %v36_v4 = vld [vmem:[%s709_s1 + $0x70] sm:$0xff]  ;;  %v35_v9 = vld [vmem:[%s709_s1 + $0x68] sm:$0xff]  ;;  %v71_v12 = vshrl.u32 %v70_v3, 7 }
   0x3   :  { %362 = vmatpush3.msra.mxu0 %v37_v1  ;;  %v50_v10 = vld [vmem:[%s709_s1 + $0xe0] sm:$0xff]  ;;  %v69_v11 = vunpack.c.0.s8 %v68_v7  ;;  %v49_v14 = vld [vmem:[%s709_s1 + $0xd8] sm:$0xff]  ;;  %v48_v16 = vld [vmem:[%s709_s1 + $0xd0] sm:$0xff] }
   0x4   :  { %363 = vmatprep.subr.mxu0 %v52_v2  ;;  %v34_v13 = vld [vmem:[%s709_s1 + $0x60] sm:$0xff]  ;;  %v33_v15 = vld [vmem:[%s709_s1 + $0x58] sm:$0xff]  ;;  %v32_v18 = vld [vmem:[%s709_s1 + $0x50] sm:$0xff] }
   0x5   :  { %364 = vmatpush3.msra.mxu0 %v36_v4  ;;  %v72_v17 = vsub.s32 %v69_v11, %v71_v12  ;;  %v47_v19 = vld [vmem:[%s709_s1 + $0xc8] sm:$0xff]  ;;  %v57_v20 = vld [vmem:[%s709_s1 + $0x118] sm:$0xff]  ;;  %v21_v22 = vld [vmem:[%s708_s0] sm:$0x3f] }
   0x6   :  { %365 = vmatprep.subr.mxu0 %v51_v8  ;;  %v31_v21 = vld [vmem:[%s709_s1 + $0x48] sm:$0xff]  ;;  %416 = vmatpush3.msra.mxu1 %v57_v20  ;;  %v56_v23 = vld [vmem:[%s709_s1 + $0x110] sm:$0xff]  ;;  %v46_v24 = vld [vmem:[%s709_s1 + $0xc0] sm:$0xff]  ;;  %v66_v25 = vcombine.high %v21_v22, %v21_v22 }
   0x7   :  { %366 = vmatpush3.msra.mxu0 %v35_v9  ;;  %417 = vmatprep.subr.mxu1 %v486_v5  ;;  %v578_v26 = vrot.slane %v21_v22, %v72_v17  ;;  %v55_v27 = vld [vmem:[%s709_s1 + $0x108] sm:$0xff]  ;;  %v30_v28 = vld [vmem:[%s709_s1 + $0x40] sm:$0xff]  ;;  %v45_v29 = vld [vmem:[%s709_s1 + $0xb8] sm:$0xff] }
   0x8   :  { %367 = vmatprep.subr.mxu0 %v50_v10  ;;  %418 = vmatpush3.msra.mxu1 %v56_v23 }
   0x9   :  { %368 = vmatpush3.msra.mxu0 %v34_v13  ;;  %v81_v30 = vcombine.high %v578_v26, %v578_v26  ;;  %419 = vmatprep.subr.mxu1 %v486_v5 }
   0xa   :  { %369 = vmatprep.subr.mxu0 %v49_v14 }
   0xb   :  { %370 = vmatpush3.msra.mxu0 %v33_v15 }
   0xc   :  { %371 = vmatprep.subr.mxu0 %v48_v16 }
   0xd   :  { %372 = vmatpush3.msra.mxu0 %v32_v18 }
   0xe   :  { %373 = vmatprep.subr.mxu0 %v47_v19 }
   0xf   :  { %374 = vmatpush3.msra.mxu0 %v31_v21 }
  0x10   :  { %10 = vsyncpa [#allocation3], 0  ;;  %375 = vmatprep.subr.mxu0 %v46_v24  ;;  %v29_v31 = vld [vmem:[%s709_s1 + $0x38] sm:$0xff]  ;;  %v80_v32 = vrot.slane %v66_v25, %v72_v17  ;;  %420 = vmatpush3.msra.mxu1 %v55_v27  ;;  %v54_v33 = vld [vmem:[%s709_s1 + $0x100] sm:$0xff]  ;;  %vm84_vm1 = vcmask 261120   ;;  %vm252_vm2 = vcmask 1043456  }
  0x11   :  { %376 = vmatpush3.msra.mxu0 %v30_v28  ;;  %v44_v34 = vld [vmem:[%s709_s1 + $0xb0] sm:$0xff]  ;;  %151 = vmatprep.mubr.f32.mxu0 %v81_v30  ;;  %v43_v36 = vld [vmem:[%s709_s1 + $0xa8] sm:$0xff]  ;;  %v240_v37 = vld [vmem:[%s711_s3 + $0x60] sm:$0xf]  ;;  %vm248_vm3 = vcmask 818176   ;;  %vm327_vm4 = vcmask 82944  }
  0x12   :  { %377 = vmatprep.subr.mxu0 %v45_v29  ;;  %v28_v35 = vld [vmem:[%s709_s1 + $0x30] sm:$0xff]  ;;  %421 = vmatprep.subr.mxu1 %v486_v5  ;;  %v27_v38 = vld [vmem:[%s709_s1 + $0x28] sm:$0xff]  ;;  %v42_v39 = vld [vmem:[%s709_s1 + $0xa0] sm:$0xff] }
  0x13   :  { %378 = vmatpush3.msra.mxu0 %v29_v31  ;;  %422 = vmatpush3.msra.mxu1 %v54_v33  ;;  %v239_v40 = vld [vmem:[%s711_s3 + $0x58] sm:$0xff]  ;;  %v26_v41 = vld [vmem:[%s709_s1 + $0x20] sm:$0xff]  ;;  %v238_v43 = vld [vmem:[%s711_s3 + $0x50] sm:$0xff] }
  0x14   :  { %379 = vmatprep.subr.mxu0 %v44_v34  ;;  %424 = vmatmul.mubr.msk.f32.vlgmr.msra.gmra.mxu1 %vm84_vm1, %v80_v32  ;;  %v41_v42 = vld [vmem:[%s709_s1 + $0x98] sm:$0xff]  ;;  %v40_v45 = vld [vmem:[%s709_s1 + $0x90] sm:$0xff]  ;;  %v237_v46 = vld [vmem:[%s711_s3 + $0x48] sm:$0xff] }
  0x15   :  { %380 = vmatpush3.msra.mxu0 %v28_v35  ;;  %426 = vmatprep.subr.mxu1 %v486_v5  ;;  %v25_v44 = vld [vmem:[%s709_s1 + $0x18] sm:$0xff]  ;;  %v24_v47 = vld [vmem:[%s709_s1 + $0x10] sm:$0xff]  ;;  %v39_v48 = vld [vmem:[%s709_s1 + $0x88] sm:$0xff] }
  0x16   :  { %381 = vmatprep.subr.mxu0 %v43_v36  ;;  %427 = vmatpush3.msk.msra.mxu1 %vm252_vm2, %v240_v37  ;;  %v236_v49 = vld [vmem:[%s711_s3 + $0x40] sm:$0xff]  ;;  %v23_v50 = vld [vmem:[%s709_s1 + $0x8] sm:$0xff]  ;;  %v235_v52 = vld [vmem:[%s711_s3 + $0x38] sm:$0xff] }
  0x17   :  { %382 = vmatpush3.msra.mxu0 %v27_v38  ;;  %428 = vmatprep.subr.mxu1 %v486_v5  ;;  %v38_v51 = vld [vmem:[%s709_s1 + $0x80] sm:$0xff]  ;;  %v234_v54 = vld [vmem:[%s711_s3 + $0x30] sm:$0xff]  ;;  %v233_v55 = vld [vmem:[%s711_s3 + $0x28] sm:$0xff] }
  0x18   :  { %383 = vmatprep.subr.mxu0 %v42_v39  ;;  %429 = vmatpush3.msra.mxu1 %v239_v40  ;;  %v22_v53 = vld [vmem:[%s709_s1] sm:$0xff]  ;;  %v231_v57 = vld [vmem:[%s711_s3 + $0x18] sm:$0xff]  ;;  %v230_v58 = vld [vmem:[%s711_s3 + $0x10] sm:$0xff] }
  0x19   :  { %384 = vmatpush3.msra.mxu0 %v26_v41  ;;  %430 = vmatprep.subr.mxu1 %v486_v5  ;;  %v232_v56 = vld [vmem:[%s711_s3 + $0x20] sm:$0xff]  ;;  %v229_v59 = vld [vmem:[%s711_s3 + $0x8] sm:$0xff] }
  0x1a   :  { %385 = vmatprep.subr.mxu0 %v41_v42  ;;  %431 = vmatpush3.msra.mxu1 %v238_v43  ;;  %v228_v60 = vld [vmem:[%s711_s3] sm:$0xff] }
  0x1b   :  { %386 = vmatpush3.msra.mxu0 %v25_v44  ;;  %432 = vmatprep.subr.mxu1 %v486_v5  ;;  %v356_v1 = vld [vmem:[%s710_s2] ss:$0 sm:$0xff]  ;;  %s489_s2 = smov [#allocation2]  }
  0x1c   :  { %387 = vmatprep.subr.mxu0 %v40_v45  ;;  %433 = vmatpush3.msra.mxu1 %v237_v46  ;;  %s348_s3 = sshll.u32 %s489_s2, 4  ;;  %s349_s3 = int_to_ptr.vmem [resolvable:$true] %s348_s3 }
  0x1d   :  { %388 = vmatpush3.msra.mxu0 %v24_v47  ;;  %434 = vmatprep.subr.mxu1 %v486_v5  ;;  %p469_p1 = scmp.lt.s32.totalorder %s349_s3, %s349_s3 }
  0x1e   :  { %389 = vmatprep.subr.mxu0 %v39_v48  ;;  %435 = vmatpush3.msra.mxu1 %v236_v49 }
  0x1f   :  { %390 = vmatpush3.msra.mxu0 %v23_v50  ;;  %436 = vmatprep.subr.mxu1 %v486_v5 }
  0x20   :  { %391 = vmatprep.subr.mxu0 %v38_v51  ;;  %437 = vmatpush3.msra.mxu1 %v235_v52 }
  0x21   :  { %392 = vmatpush3.msra.mxu0 %v22_v53  ;;  %438 = vmatprep.subr.mxu1 %v486_v5 }
  0x22   :  { %152 = vmatmul.mubr.f32.vlgmr.msra.gmra.mxu0 %v578_v26  ;;  %439 = vmatpush3.msra.mxu1 %v234_v54 }
  0x23   :  { %440 = vmatprep.subr.mxu1 %v486_v5  ;;  %452 = vmatprep.mubr.msk.f32.mxu1 %vm488_vm0, %v486_v5 }
  0x24   :  { %441 = vmatpush3.msra.mxu1 %v233_v55 }
  0x25   :  { %442 = vmatprep.subr.mxu1 %v486_v5 }
  0x26   :  { %443 = vmatpush3.msra.mxu1 %v232_v56 }
  0x27   :  { %444 = vmatprep.subr.mxu1 %v486_v5 }
  0x28   :  { %445 = vmatpush3.msra.mxu1 %v231_v57 }
  0x29   :  { %446 = vmatprep.subr.mxu1 %v486_v5 }
  0x2a   :  { %447 = vmatpush3.msra.mxu1 %v230_v58 }
  0x2b   :  { %448 = vmatprep.subr.mxu1 %v486_v5 }
  0x2c   :  { %449 = vmatpush3.msra.mxu1 %v229_v59 }
  0x2d   :  { %450 = vmatprep.subr.mxu1 %v486_v5  ;;  %v358_v5 = vld [vmem:[%s712_s4] ss:$0 sm:$0xff]  ;;  %s464_s4 = scalar_lea.vmem %s349_s3, 32 }
  0x2e   :  { %451 = vmatpush3.msra.mxu1 %v228_v60  ;;  %p465_p0 = scmp.ne.s32.totalorder %s349_s3, %s464_s4  ;;  %p470_p2 = scmp.lt.s32.totalorder %s464_s4, %s464_s4 }
  0x30   :  { %p471_p3 = por %p470_p2, %p469_p1 }
  0x32   :  { %p472_p4 = pnand %p471_p3, %p465_p0 }
  0xd4   :  { %v223_v61 = vpop.f32.mrf.mxu1 }
  0xd6   :  { %v425_v62 = vpop.f32.mrf.mxu1 }
  0xe2   :  { %v393_v63 = vpop.f32.mrf.mxu0 }
  0xe4   :  { %v394_v0 = vpop.f32.mrf.mxu0 }
  0xe5   :  { %v395_v2 = vadd.f32 %v394_v0, %v393_v63 }
  0xe7   :  { %v154_v3 = vadd.f32 %v395_v2, %v356_v1 }
  0xe9   :  { %v224_v4 = vadd.f32 %v223_v61, %v154_v3 }
  0xeb   :  { %v227_v6 = vmax.f32 %v224_v4, 0.0 }
  0xed   :  { %453 = vmatmul.mubr.msk.f32.vlgmr.msra.gmra.mxu1 %vm248_vm3, %v227_v6 }
 0x1ad   :  { %v322_v7 = vpop.f32.mrf.mxu1 }
 0x1ae   :  { %v323_v8 = vadd.f32 %v358_v5, %v322_v7 }
 0x1af   :  { %v454_v9 = vpop.f32.mrf.mxu1 }
 0x1b0   :  { %v326_v10 = vmax.f32 %v323_v8, 0.0 }
 0x1b2   :  { %v328_v11 = vsel %vm327_vm4, %v326_v10, -inf }
 0x1b3   :  { %329 = vmax.xlane.f32.xlu0 %v328_v11 }
 0x23c   :  { %v330_v12 = vpop.xlane.xlu0 %329 }
 0x23d   :  { %v331_v13 = vsub.f32 %v326_v10, %v330_v12 }
 0x23f   :  { %v332_v14 = vmul.f32 1.442695, %v331_v13 }
 0x241   :  { %460 = vpow2.f32 %v332_v14 }
 0x24e   :  { %v461_v15 = vpop.eup %460 }
 0x24f   :  { %v334_v16 = vsel %vm327_vm4, %v461_v15, 0.0 }
 0x250   :  { %335 = vadd.xlane.f32.xlu0 %v334_v16 }
 0x2d9   :  { %v336_v17 = vpop.xlane.xlu0 %335 }
 0x2da   :  { %462 = vlog2.f32 %v336_v17 }
 0x2e7   :  { %v463_v18 = vpop.eup %462 }
 0x2e8   :  { %v338_v19 = vmul.f32 0.6931472, %v463_v18 }
 0x2ea   :  { %v339_v20 = vadd.f32 %v338_v19, %v330_v12 }
 0x2ec   :  { %v340_v21 = vsub.f32 %v326_v10, %v339_v20 }
 0x2ee   :  { %341 = vst.msk [vmem:[#allocation2] sm:$0x3] %vm327_vm4, %v340_v21 }
 0x2ef   :  { %475 = shalt.err (!%p472_p4)
}
 0x2f0   :  { %351 = dma.vmem_to_hbm [thread:$0]  %s349_s3, 32, %s713_s5, [#allocation3]  }
 0x2f1   :  { %484 = dma.done.wait [#allocation3], 32  }
 0x2f2   :  { %485 = vsyncadd [#allocation3], 4294967264 }
 0x2f3   :  { %355 = vsyncpa [#allocation3], 1 }

</bundles_post_ra>
